<compile_context>
chip_gen: v7x
topology: tpu7x:2x2x1
jax: 0.10.0
libtpu: 0.0.40
codegen_flags: <defaults>
</compile_context>

<pallas_src>
import jax
import jax.numpy as jnp
import numpy as np
from jax.experimental import pallas as pl
from jax.experimental.pallas import tpu as pltpu

EPS = 1e-5
_REF_PREC = jax.lax.Precision.HIGHEST
# TODO(synk): cast MXU operands to bf16 (keep f32 accumulation and the f32
# BN/ReLU epilogue) once an accuracy budget is agreed; f32 kept here so the
# kernel matches the f32 reference within tight tolerances.


# ----------------------------------------------------------------------------
# In-kernel helpers
# ----------------------------------------------------------------------------
def _conv3x3_over_parity_planes(scr, w_ref, H, W):
    """3x3 conv (stride 1, pad 1) over a full-res grid stored as parity planes.

    scr   : VMEM ref (4, H+2, W+2, C); plane k = 2*di+dj holds the zero-padded
            full-resolution pixels (2h+di, 2w+dj) at padded coords (1+h, 1+w).
    w_ref : (9, C, Cout) ref, tap index = ky*3 + kx.
    Returns a (4, H*W, Cout) f32 value; plane k = 2*p+q holds the conv output
    at full-resolution positions (2h+p, 2w+q).

    For output parity (p, q) and tap (ky, kx) the source pixel
    (2h+p-1+ky, 2w+q-1+kx) lives in plane ((p-1+ky) % 2, (q-1+kx) % 2) at
    plane offset ((p-1+ky) // 2, (q-1+kx) // 2) in {-1, 0, 1}.
    All four parity classes are batched into one M = 4*H*W matmul per tap.
    """
    C = scr.shape[-1]
    Cout = w_ref.shape[-1]
    acc = jnp.zeros((4, H * W, Cout), jnp.float32)
    for ky in range(3):
        for kx in range(3):
            pieces = []
            for p in range(2):
                di, dy = (p - 1 + ky) % 2, (p - 1 + ky) // 2
                for q in range(2):
                    dj, dx = (q - 1 + kx) % 2, (q - 1 + kx) // 2
                    piece = scr[2 * di + dj,
                                1 + dy:1 + dy + H,
                                1 + dx:1 + dx + W, :]
                    pieces.append(piece.reshape(1, H * W, C))
            taps = jnp.concatenate(pieces, axis=0)              # (4, H*W, C)
            # TODO(synk): upgrade to a single K = 9*C im2col dot (lane-dim
            # concat of the 9 taps) for small-C layers once minor-dim concat
            # is validated on the target toolchain.
            y = jnp.dot(taps.reshape(4 * H * W, C), w_ref[ky * 3 + kx],
                        preferred_element_type=jnp.float32)
            acc = acc + y.reshape(4, H * W, Cout)
    return acc


def _channel_stats(y):
    """One-pass per-channel (sum, sum-of-squares) of a (4, H*W, C) value."""
    s = jnp.sum(jnp.sum(y, axis=0), axis=0, keepdims=True)          # (1, C)
    ss = jnp.sum(jnp.sum(y * y, axis=0), axis=0, keepdims=True)     # (1, C)
    return s, ss


# ----------------------------------------------------------------------------
# Kernels
# ----------------------------------------------------------------------------
def _stage1_kernel(x_ref, bp_ref, wu_ref, bu_ref, w1_ref,
                   y1_ref, s_ref, ss_ref, cat_scr):
    """Fused ConvTranspose2d(k=2, s=2) + channel concat + Conv3x3 (no bias).

    Per grid step (one image):
      x_ref    : (1, H, W, Cin)             input features (NHWC)
      bp_ref   : (1, 4, H, W, Cskip)        skip tensor as parity planes
      wu_ref   : (Cin, 4*Cup)               upconv weight, col = (2*di+dj)*Cup + c
      bu_ref   : (1, 4*Cup)                 upconv bias tiled per (di, dj)
      w1_ref   : (9, Cup+Cskip, C1)         conv1 weight over concat channels
      y1_ref   : (1, 4, H, W, C1)           conv1 pre-BN output (parity planes)
      s_ref    : (1, 1, C1)                 per-image channel sum of y1
      ss_ref   : (1, 1, C1)                 per-image channel sum of y1^2
      cat_scr  : VMEM (4, H+2, W+2, Cup+Cskip)  zero-padded concat parity planes
    """
    H, W, Cin = x_ref.shape[1], x_ref.shape[2], x_ref.shape[3]
    Cup = wu_ref.shape[1] // 4
    Ccat = cat_scr.shape[-1]
    C1 = w1_ref.shape[-1]

    # Zero fill establishes the 1-px zero halo (interiors are overwritten).
    # Re-done each grid step so megacore batch-sharding stays correct.
    cat_scr[...] = jnp.zeros(cat_scr.shape, cat_scr.dtype)

    # ConvTranspose2d(k=2, s=2): one MXU pass produces all 4 sub-pixel planes.
    x2d = x_ref[0].reshape(H * W, Cin)
    up = jnp.dot(x2d, wu_ref[...], preferred_element_type=jnp.float32)
    up = up + bu_ref[...]                                       # (H*W, 4*Cup)

    # Channel concat realised inside VMEM scratch: up channels at [0, Cup),
    # skip channels at [Cup, Ccat).  Never materialised in HBM.
    for k in range(4):
        cat_scr[k, 1:H + 1, 1:W + 1, 0:Cup] = (
            up[:, k * Cup:(k + 1) * Cup].reshape(H, W, Cup))
    cat_scr[:, 1:H + 1, 1:W + 1, Cup:Ccat] = bp_ref[0]

    y1 = _conv3x3_over_parity_planes(cat_scr, w1_ref, H, W)

    y1_ref[0] = y1.reshape(4, H, W, C1)
    s, ss = _channel_stats(y1)
    s_ref[0] = s
    ss_ref[0] = ss


def _stage2_kernel(y1_ref, sc_ref, sh_ref, w2_ref, y2_ref, s_ref, ss_ref, a_scr):
    """Fused BN1-apply + ReLU + Conv3x3 (no bias), emitting BN2 partial stats.

      y1_ref : (1, 4, H, W, C1)   conv1 pre-BN output (parity planes)
      sc_ref : (1, C1)            scale = gamma1 * rsqrt(var1 + eps)
      sh_ref : (1, C1)            shift = beta1 - mean1 * scale
      w2_ref : (9, C1, C2)
      y2_ref : (1, 4, H, W, C2)   conv2 pre-BN output (parity planes)
      s_ref, ss_ref : (1, 1, C2)  per-image stats of y2
      a_scr  : VMEM (4, H+2, W+2, C1)  zero-padded activation parity planes
    """
    H, W, C1 = y1_ref.shape[2], y1_ref.shape[3], y1_ref.shape[4]
    C2 = w2_ref.shape[-1]

    a_scr[...] = jnp.zeros(a_scr.shape, a_scr.dtype)
    scale = sc_ref[...].reshape(1, 1, 1, C1)
    shift = sh_ref[...].reshape(1, 1, 1, C1)
    # Single fused FMA + ReLU over all 4 parity planes, lane-dense store.
    a_scr[:, 1:H + 1, 1:W + 1, :] = jnp.maximum(
        y1_ref[0] * scale + shift, 0.0)

    y2 = _conv3x3_over_parity_planes(a_scr, w2_ref, H, W)
    y2_ref[0] = y2.reshape(4, H, W, C2)
    s, ss = _channel_stats(y2)
    s_ref[0] = s
    ss_ref[0] = ss


def _stage3_kernel(y2_ref, sc_ref, sh_ref, o_ref):
    """BN2-apply + ReLU (pointwise) on parity planes."""
    C2 = y2_ref.shape[-1]
    scale = sc_ref[...].reshape(1, 1, 1, C2)
    shift = sh_ref[...].reshape(1, 1, 1, C2)
    o_ref[0] = jnp.maximum(y2_ref[0] * scale + shift, 0.0)


# ----------------------------------------------------------------------------
# pallas_call wrappers
# ----------------------------------------------------------------------------
def _batched_spec(shape):
    # block = (1, *rest); grid axis 0 selects the image.
    return pl.BlockSpec(shape, lambda n: (n,) + (0,) * (len(shape) - 1))


def _full_spec(shape):
    # whole array resident (weights / per-channel scale & shift).
    return pl.BlockSpec(shape, lambda n: (0,) * len(shape))


_PARAMS = pltpu.CompilerParams(dimension_semantics=("parallel",))


def _stage1_call(x, bp_pp, wu_flat, bu4, w1_r):
    N, H, W, Cin = x.shape
    Cskip = bp_pp.shape[-1]
    Cup = bu4.shape[-1] // 4
    Ccat, C1 = w1_r.shape[1], w1_r.shape[2]
    grid_spec = pltpu.PrefetchScalarGridSpec(
        num_scalar_prefetch=0,
        grid=(N,),
        in_specs=[
            _batched_spec((1, H, W, Cin)),
            _batched_spec((1, 4, H, W, Cskip)),
            _full_spec((Cin, 4 * Cup)),
            _full_spec((1, 4 * Cup)),
            _full_spec((9, Ccat, C1)),
        ],
        out_specs=(
            _batched_spec((1, 4, H, W, C1)),
            _batched_spec((1, 1, C1)),
            _batched_spec((1, 1, C1)),
        ),
        scratch_shapes=[
            pltpu.VMEM((4, H + 2, W + 2, Ccat), jnp.float32),
        ],
    )
    return pl.pallas_call(
        _stage1_kernel,
        out_shape=(
            jax.ShapeDtypeStruct((N, 4, H, W, C1), jnp.float32),
            jax.ShapeDtypeStruct((N, 1, C1), jnp.float32),
            jax.ShapeDtypeStruct((N, 1, C1), jnp.float32),
        ),
        grid_spec=grid_spec,
        compiler_params=_PARAMS,
    )(x, bp_pp, wu_flat, bu4, w1_r)


def _stage2_call(y1, scale1, shift1, w2_r):
    N, _, H, W, C1 = y1.shape
    C2 = w2_r.shape[-1]
    grid_spec = pltpu.PrefetchScalarGridSpec(
        num_scalar_prefetch=0,
        grid=(N,),
        in_specs=[
            _batched_spec((1, 4, H, W, C1)),
            _full_spec((1, C1)),
            _full_spec((1, C1)),
            _full_spec((9, C1, C2)),
        ],
        out_specs=(
            _batched_spec((1, 4, H, W, C2)),
            _batched_spec((1, 1, C2)),
            _batched_spec((1, 1, C2)),
        ),
        scratch_shapes=[pltpu.VMEM((4, H + 2, W + 2, C1), jnp.float32)],
    )
    return pl.pallas_call(
        _stage2_kernel,
        out_shape=(
            jax.ShapeDtypeStruct((N, 4, H, W, C2), jnp.float32),
            jax.ShapeDtypeStruct((N, 1, C2), jnp.float32),
            jax.ShapeDtypeStruct((N, 1, C2), jnp.float32),
        ),
        grid_spec=grid_spec,
        compiler_params=_PARAMS,
    )(y1, scale1, shift1, w2_r)


def _stage3_call(y2, scale2, shift2):
    N, _, H, W, C2 = y2.shape
    grid_spec = pltpu.PrefetchScalarGridSpec(
        num_scalar_prefetch=0,
        grid=(N,),
        in_specs=[
            _batched_spec((1, 4, H, W, C2)),
            _full_spec((1, C2)),
            _full_spec((1, C2)),
        ],
        out_specs=_batched_spec((1, 4, H, W, C2)),
    )
    return pl.pallas_call(
        _stage3_kernel,
        out_shape=jax.ShapeDtypeStruct((N, 4, H, W, C2), jnp.float32),
        grid_spec=grid_spec,
        compiler_params=_PARAMS,
    )(y2, scale2, shift2)


def _bn_scale_shift(s, ss, gamma, beta, count):
    """Fold batch stats + affine params into a per-channel scale / shift."""
    total = jnp.sum(s[:, 0, :], axis=0)
    total_sq = jnp.sum(ss[:, 0, :], axis=0)
    mean = total / count
    # Biased variance (torch training-mode normalisation); E[x^2] - mean^2 in
    # f32, clamped against catastrophic cancellation.
    var = jnp.maximum(total_sq / count - mean * mean, 0.0)
    scale = gamma * jax.lax.rsqrt(var + EPS)
    shift = beta - mean * scale
    return scale.reshape(1, -1), shift.reshape(1, -1)


@jax.jit
def decoder_layer_forward(x_nchw, before_pool_nchw, params):
    """x: (N, in_ch, H, W), before_pool: (N, out_ch, 2H, 2W) -> (N, out_ch, 2H, 2W)."""
    N, Cin, H, W = x_nchw.shape
    Cskip = before_pool_nchw.shape[1]
    Cup = params["up_w"].shape[-1]
    Ccat = Cup + Cskip
    C1 = params["w1"].shape[-1]
    C2 = params["w2"].shape[-1]

    # NCHW -> NHWC for x; NCHW -> parity planes (N, 4, H, W, C) for the skip.
    x = jnp.transpose(x_nchw, (0, 2, 3, 1))
    bp_pp = before_pool_nchw.reshape(N, Cskip, H, 2, W, 2)
    bp_pp = bp_pp.transpose(0, 3, 5, 2, 4, 1).reshape(N, 4, H, W, Cskip)

    # Weight repacking (tiny, once per jit).
    wu_flat = params["up_w"].transpose(2, 0, 1, 3).reshape(Cin, 4 * Cup)
    bu4 = jnp.tile(params["up_b"], 4).reshape(1, 4 * Cup)
    w1_r = params["w1"].reshape(9, Ccat, C1)
    w2_r = params["w2"].reshape(9, C1, C2)

    count = N * (2 * H) * (2 * W)

    y1, s1, ss1 = _stage1_call(x, bp_pp, wu_flat, bu4, w1_r)
    scale1, shift1 = _bn_scale_shift(s1, ss1, params["g1"], params["b1"], count)
    y2, s2, ss2 = _stage2_call(y1, scale1, shift1, w2_r)
    scale2, shift2 = _bn_scale_shift(s2, ss2, params["g2"], params["b2"], count)
    out_pp = _stage3_call(y2, scale2, shift2)

    # parity planes -> NCHW: out[n, c, 2h+p, 2w+q] = out_pp[n, 2p+q, h, w, c]
    out = out_pp.reshape(N, 2, 2, H, W, C2)
    out = out.transpose(0, 5, 3, 1, 4, 2).reshape(N, C2, 2 * H, 2 * W)
    return out
    # TODO(synk): for production spatial sizes, add row tiling with a 1-row
    # halo inside each stage (keeps per-core VMEM bounded on v7x) and raise
    # vmem_limit_bytes for the larger tiles on v5e/v6e.


# ----------------------------------------------------------------------------
# Pure-JAX reference (correctness check)
# ----------------------------------------------------------------------------
def ref_forward(x_nchw, bp_nchw, params):
    x = jnp.transpose(x_nchw, (0, 2, 3, 1))
    bp = jnp.transpose(bp_nchw, (0, 2, 3, 1))
    N, H, W, _ = x.shape
    Cout = params["up_w"].shape[-1]
    up = jnp.einsum("nhwc,ijco->nhiwjo", x, params["up_w"], precision=_REF_PREC)
    up = (up + params["up_b"]).reshape(N, 2 * H, 2 * W, Cout)
    cat = jnp.concatenate([up, bp], axis=-1)

    def conv_bn_relu(z, w, g, b):
        zp = jnp.pad(z, ((0, 0), (1, 1), (1, 1), (0, 0)))
        Hh, Ww = z.shape[1], z.shape[2]
        acc = 0.0
        for ky in range(3):
            for kx in range(3):
                acc = acc + jnp.einsum("nhwc,co->nhwo",
                                       zp[:, ky:ky + Hh, kx:kx + Ww, :],
                                       w[ky, kx], precision=_REF_PREC)
        mean = acc.mean(axis=(0, 1, 2), keepdims=True)
        var = ((acc - mean) ** 2).mean(axis=(0, 1, 2), keepdims=True)
        y = (acc - mean) * jax.lax.rsqrt(var + EPS) * g + b
        return jnp.maximum(y, 0.0)

    h = conv_bn_relu(cat, params["w1"], params["g1"], params["b1"])
    h = conv_bn_relu(h, params["w2"], params["g2"], params["b2"])
    return jnp.transpose(h, (0, 3, 1, 2))


# ----------------------------------------------------------------------------
# Main
# ----------------------------------------------------------------------------
if __name__ == "__main__":
    key = jax.random.PRNGKey(0)
    ks = jax.random.split(key, 10)

    # DecoderLayer(in_channels=8, out_channels=4): upconv 8->4, concat with the
    # 4-channel skip gives 8 = in_channels, conv1: 8->4, conv2: 4->4.
    N, Cin, Cout, H, W = 2, 8, 4, 8, 8
    x = jax.random.normal(ks[0], (N, Cin, H, W), jnp.float32)
    before_pool = jax.random.normal(ks[1], (N, Cout, 2 * H, 2 * W), jnp.float32)

    params = dict(
        up_w=0.2 * jax.random.normal(ks[2], (2, 2, Cin, Cout), jnp.float32),
        up_b=0.1 * jax.random.normal(ks[3], (Cout,), jnp.float32),
        w1=0.1 * jax.random.normal(ks[4], (3, 3, Cin, Cout), jnp.float32),
        g1=1.0 + 0.1 * jax.random.normal(ks[5], (Cout,), jnp.float32),
        b1=0.1 * jax.random.normal(ks[6], (Cout,), jnp.float32),
        w2=0.1 * jax.random.normal(ks[7], (3, 3, Cout, Cout), jnp.float32),
        g2=1.0 + 0.1 * jax.random.normal(ks[8], (Cout,), jnp.float32),
        b2=0.1 * jax.random.normal(ks[9], (Cout,), jnp.float32),
    )

    out = decoder_layer_forward(x, before_pool, params)
    out = jax.block_until_ready(out)
    assert out.shape == (N, Cout, 2 * H, 2 * W), out.shape

    ref = ref_forward(x, before_pool, params)
    np.testing.assert_allclose(np.asarray(out), np.asarray(ref),
                               rtol=1e-2, atol=1e-2)
    print("KERNEL_OK")
</pallas_src>

<mosaic_0001>
module attributes {stable_mosaic.version = 11 : i64} {
  func.func @_stage1_kernel(%arg0: i32, %arg1: memref<1x8x8x8xf32, #tpu.memory_space<vmem>>, %arg2: memref<1x4x8x8x4xf32, #tpu.memory_space<vmem>>, %arg3: memref<8x16xf32, #tpu.memory_space<vmem>>, %arg4: memref<1x16xf32, #tpu.memory_space<vmem>>, %arg5: memref<9x8x4xf32, #tpu.memory_space<vmem>>, %arg6: memref<1x4x8x8x4xf32, #tpu.memory_space<vmem>>, %arg7: memref<1x1x4xf32, #tpu.memory_space<vmem>>, %arg8: memref<1x1x4xf32, #tpu.memory_space<vmem>>, %arg9: memref<4x10x10x8xf32, #tpu.memory_space<vmem>>) attributes {dimension_semantics = [#tpu.dimension_semantics<parallel>], iteration_bounds = array<i64: 2>, scalar_prefetch = 0 : i64, scratch_operands = 1 : i64, tpu.core_type = #tpu.core_type<tc>, window_params = [{transform_indices = @transform_0, window_bounds = array<i64: 1, 8, 8, 8>}, {transform_indices = @transform_1, window_bounds = array<i64: 1, 4, 8, 8, 4>}, {pipeline_mode = #tpu.pipeline_mode<synchronous>, transform_indices = @transform_2, window_bounds = array<i64: 8, 16>}, {pipeline_mode = #tpu.pipeline_mode<synchronous>, transform_indices = @transform_3, window_bounds = array<i64: 1, 16>}, {pipeline_mode = #tpu.pipeline_mode<synchronous>, transform_indices = @transform_4, window_bounds = array<i64: 9, 8, 4>}, {transform_indices = @transform_5, window_bounds = array<i64: 1, 4, 8, 8, 4>}, {transform_indices = @transform_6, window_bounds = array<i64: 1, 1, 4>}, {transform_indices = @transform_7, window_bounds = array<i64: 1, 1, 4>}]} {
    %cst = arith.constant 0.000000e+00 : f32
    %0 = vector.broadcast %cst : f32 to vector<4x10x10x8xf32>
    %c0 = arith.constant 0 : index
    %c0_0 = arith.constant 0 : index
    %c0_1 = arith.constant 0 : index
    %c0_2 = arith.constant 0 : index
    %1 = vector.load %arg9[%c0, %c0_0, %c0_1, %c0_2] : memref<4x10x10x8xf32, #tpu.memory_space<vmem>>, vector<4x10x10x8xf32>
    tpu.vector_store %arg9[%c0, %c0_0, %c0_1, %c0_2], %0 {strides = array<i32>} : memref<4x10x10x8xf32, #tpu.memory_space<vmem>>, vector<4x10x10x8xf32>,
    %c0_3 = arith.constant 0 : index
    %c0_4 = arith.constant 0 : index
    %c0_5 = arith.constant 0 : index
    %c0_6 = arith.constant 0 : index
    %2 = vector.load %arg1[%c0_3, %c0_4, %c0_5, %c0_6] : memref<1x8x8x8xf32, #tpu.memory_space<vmem>>, vector<1x8x8x8xf32>
    %3 = vector.shape_cast %2 : vector<1x8x8x8xf32> to vector<8x8x8xf32>
    %4 = vector.shape_cast %3 : vector<8x8x8xf32> to vector<64x8xf32>
    %c0_7 = arith.constant 0 : index
    %c0_8 = arith.constant 0 : index
    %5 = vector.load %arg3[%c0_7, %c0_8] : memref<8x16xf32, #tpu.memory_space<vmem>>, vector<8x16xf32>
    %cst_9 = arith.constant dense<0.000000e+00> : vector<64x16xf32>
    %6 = tpu.matmul %4, %5, %cst_9 {dimension_numbers = #tpu.dot_dimension_numbers<[1], [0], [0], [1], [0, 0, 1, 1], [], []>} : vector<64x8xf32>, vector<8x16xf32>, vector<64x16xf32> -> vector<64x16xf32>
    %c0_10 = arith.constant 0 : index
    %c0_11 = arith.constant 0 : index
    %7 = vector.load %arg4[%c0_10, %c0_11] : memref<1x16xf32, #tpu.memory_space<vmem>>, vector<1x16xf32>
    %8 = vector.broadcast %7 : vector<1x16xf32> to vector<64x16xf32>
    %9 = arith.addf %6, %8 : vector<64x16xf32>
    %10 = vector.extract_strided_slice %9 {offsets = [0, 0], sizes = [64, 4], strides = [1, 1]} : vector<64x16xf32> to vector<64x4xf32>
    %11 = vector.shape_cast %10 : vector<64x4xf32> to vector<8x8x4xf32>
    %c0_12 = arith.constant 0 : index
    %c1 = arith.constant 1 : index
    %c1_13 = arith.constant 1 : index
    %c0_14 = arith.constant 0 : index
    %12 = vector.load %arg9[%c0_12, %c1, %c1_13, %c0_14] : memref<4x10x10x8xf32, #tpu.memory_space<vmem>>, vector<1x8x8x4xf32>
    %13 = vector.shape_cast %12 : vector<1x8x8x4xf32> to vector<8x8x4xf32>
    %14 = vector.shape_cast %11 : vector<8x8x4xf32> to vector<1x8x8x4xf32>
    tpu.vector_store %arg9[%c0_12, %c1, %c1_13, %c0_14], %14 {strides = array<i32>} : memref<4x10x10x8xf32, #tpu.memory_space<vmem>>, vector<1x8x8x4xf32>,
    %15 = vector.extract_strided_slice %9 {offsets = [0, 4], sizes = [64, 4], strides = [1, 1]} : vector<64x16xf32> to vector<64x4xf32>
    %16 = vector.shape_cast %15 : vector<64x4xf32> to vector<8x8x4xf32>
    %c1_15 = arith.constant 1 : index
    %c1_16 = arith.constant 1 : index
    %c1_17 = arith.constant 1 : index
    %c0_18 = arith.constant 0 : index
    %17 = vector.load %arg9[%c1_15, %c1_16, %c1_17, %c0_18] : memref<4x10x10x8xf32, #tpu.memory_space<vmem>>, vector<1x8x8x4xf32>
    %18 = vector.shape_cast %17 : vector<1x8x8x4xf32> to vector<8x8x4xf32>
    %19 = vector.shape_cast %16 : vector<8x8x4xf32> to vector<1x8x8x4xf32>
    tpu.vector_store %arg9[%c1_15, %c1_16, %c1_17, %c0_18], %19 {strides = array<i32>} : memref<4x10x10x8xf32, #tpu.memory_space<vmem>>, vector<1x8x8x4xf32>,
    %20 = vector.extract_strided_slice %9 {offsets = [0, 8], sizes = [64, 4], strides = [1, 1]} : vector<64x16xf32> to vector<64x4xf32>
    %21 = vector.shape_cast %20 : vector<64x4xf32> to vector<8x8x4xf32>
    %c2 = arith.constant 2 : index
    %c1_19 = arith.constant 1 : index
    %c1_20 = arith.constant 1 : index
    %c0_21 = arith.constant 0 : index
    %22 = vector.load %arg9[%c2, %c1_19, %c1_20, %c0_21] : memref<4x10x10x8xf32, #tpu.memory_space<vmem>>, vector<1x8x8x4xf32>
    %23 = vector.shape_cast %22 : vector<1x8x8x4xf32> to vector<8x8x4xf32>
    %24 = vector.shape_cast %21 : vector<8x8x4xf32> to vector<1x8x8x4xf32>
    tpu.vector_store %arg9[%c2, %c1_19, %c1_20, %c0_21], %24 {strides = array<i32>} : memref<4x10x10x8xf32, #tpu.memory_space<vmem>>, vector<1x8x8x4xf32>,
    %25 = vector.extract_strided_slice %9 {offsets = [0, 12], sizes = [64, 4], strides = [1, 1]} : vector<64x16xf32> to vector<64x4xf32>
    %26 = vector.shape_cast %25 : vector<64x4xf32> to vector<8x8x4xf32>
    %c3 = arith.constant 3 : index
    %c1_22 = arith.constant 1 : index
    %c1_23 = arith.constant 1 : index
    %c0_24 = arith.constant 0 : index
    %27 = vector.load %arg9[%c3, %c1_22, %c1_23, %c0_24] : memref<4x10x10x8xf32, #tpu.memory_space<vmem>>, vector<1x8x8x4xf32>
    %28 = vector.shape_cast %27 : vector<1x8x8x4xf32> to vector<8x8x4xf32>
    %29 = vector.shape_cast %26 : vector<8x8x4xf32> to vector<1x8x8x4xf32>
    tpu.vector_store %arg9[%c3, %c1_22, %c1_23, %c0_24], %29 {strides = array<i32>} : memref<4x10x10x8xf32, #tpu.memory_space<vmem>>, vector<1x8x8x4xf32>,
    %c0_25 = arith.constant 0 : index
    %c0_26 = arith.constant 0 : index
    %c0_27 = arith.constant 0 : index
    %c0_28 = arith.constant 0 : index
    %c0_29 = arith.constant 0 : index
    %30 = vector.load %arg2[%c0_25, %c0_26, %c0_27, %c0_28, %c0_29] : memref<1x4x8x8x4xf32, #tpu.memory_space<vmem>>, vector<1x4x8x8x4xf32>
    %31 = vector.shape_cast %30 : vector<1x4x8x8x4xf32> to vector<4x8x8x4xf32>
    %c0_30 = arith.constant 0 : index
    %c1_31 = arith.constant 1 : index
    %c1_32 = arith.constant 1 : index
    %c4 = arith.constant 4 : index
    %32 = vector.load %arg9[%c0_30, %c1_31, %c1_32, %c4] : memref<4x10x10x8xf32, #tpu.memory_space<vmem>>, vector<4x8x8x4xf32>
    tpu.vector_store %arg9[%c0_30, %c1_31, %c1_32, %c4], %31 {strides = array<i32>} : memref<4x10x10x8xf32, #tpu.memory_space<vmem>>, vector<4x8x8x4xf32>,
    %cst_33 = arith.constant 0.000000e+00 : f32
    %33 = vector.broadcast %cst_33 : f32 to vector<4x64x4xf32>
    %c3_34 = arith.constant 3 : index
    %c0_35 = arith.constant 0 : index
    %c0_36 = arith.constant 0 : index
    %c0_37 = arith.constant 0 : index
    %34 = vector.load %arg9[%c3_34, %c0_35, %c0_36, %c0_37] : memref<4x10x10x8xf32, #tpu.memory_space<vmem>>, vector<1x8x8x8xf32>
    %35 = vector.shape_cast %34 : vector<1x8x8x8xf32> to vector<8x8x8xf32>
    %36 = vector.shape_cast %35 : vector<8x8x8xf32> to vector<1x64x8xf32>
    %c2_38 = arith.constant 2 : index
    %c0_39 = arith.constant 0 : index
    %c1_40 = arith.constant 1 : index
    %c0_41 = arith.constant 0 : index
    %37 = vector.load %arg9[%c2_38, %c0_39, %c1_40, %c0_41] : memref<4x10x10x8xf32, #tpu.memory_space<vmem>>, vector<1x8x8x8xf32>
    %38 = vector.shape_cast %37 : vector<1x8x8x8xf32> to vector<8x8x8xf32>
    %39 = vector.shape_cast %38 : vector<8x8x8xf32> to vector<1x64x8xf32>
    %c1_42 = arith.constant 1 : index
    %c1_43 = arith.constant 1 : index
    %c0_44 = arith.constant 0 : index
    %c0_45 = arith.constant 0 : index
    %40 = vector.load %arg9[%c1_42, %c1_43, %c0_44, %c0_45] : memref<4x10x10x8xf32, #tpu.memory_space<vmem>>, vector<1x8x8x8xf32>
    %41 = vector.shape_cast %40 : vector<1x8x8x8xf32> to vector<8x8x8xf32>
    %42 = vector.shape_cast %41 : vector<8x8x8xf32> to vector<1x64x8xf32>
    %c0_46 = arith.constant 0 : index
    %c1_47 = arith.constant 1 : index
    %c1_48 = arith.constant 1 : index
    %c0_49 = arith.constant 0 : index
    %43 = vector.load %arg9[%c0_46, %c1_47, %c1_48, %c0_49] : memref<4x10x10x8xf32, #tpu.memory_space<vmem>>, vector<1x8x8x8xf32>
    %44 = vector.shape_cast %43 : vector<1x8x8x8xf32> to vector<8x8x8xf32>
    %45 = vector.shape_cast %44 : vector<8x8x8xf32> to vector<1x64x8xf32>
    %46 = tpu.concatenate %36, %39, %42, %45 in 0 : vector<1x64x8xf32>, vector<1x64x8xf32>, vector<1x64x8xf32>, vector<1x64x8xf32> -> vector<4x64x8xf32>
    %47 = vector.shape_cast %46 : vector<4x64x8xf32> to vector<256x8xf32>
    %c0_50 = arith.constant 0 : index
    %c0_51 = arith.constant 0 : index
    %c0_52 = arith.constant 0 : index
    %48 = vector.load %arg5[%c0_50, %c0_51, %c0_52] : memref<9x8x4xf32, #tpu.memory_space<vmem>>, vector<1x8x4xf32>
    %49 = vector.shape_cast %48 : vector<1x8x4xf32> to vector<8x4xf32>
    %cst_53 = arith.constant dense<0.000000e+00> : vector<256x4xf32>
    %50 = tpu.matmul %47, %49, %cst_53 {dimension_numbers = #tpu.dot_dimension_numbers<[1], [0], [0], [1], [0, 0, 1, 1], [], []>} : vector<256x8xf32>, vector<8x4xf32>, vector<256x4xf32> -> vector<256x4xf32>
    %51 = vector.shape_cast %50 : vector<256x4xf32> to vector<4x64x4xf32>
    %52 = arith.addf %33, %51 : vector<4x64x4xf32>
    %c2_54 = arith.constant 2 : index
    %c0_55 = arith.constant 0 : index
    %c1_56 = arith.constant 1 : index
    %c0_57 = arith.constant 0 : index
    %53 = vector.load %arg9[%c2_54, %c0_55, %c1_56, %c0_57] : memref<4x10x10x8xf32, #tpu.memory_space<vmem>>, vector<1x8x8x8xf32>
    %54 = vector.shape_cast %53 : vector<1x8x8x8xf32> to vector<8x8x8xf32>
    %55 = vector.shape_cast %54 : vector<8x8x8xf32> to vector<1x64x8xf32>
    %c3_58 = arith.constant 3 : index
    %c0_59 = arith.constant 0 : index
    %c1_60 = arith.constant 1 : index
    %c0_61 = arith.constant 0 : index
    %56 = vector.load %arg9[%c3_58, %c0_59, %c1_60, %c0_61] : memref<4x10x10x8xf32, #tpu.memory_space<vmem>>, vector<1x8x8x8xf32>
    %57 = vector.shape_cast %56 : vector<1x8x8x8xf32> to vector<8x8x8xf32>
    %58 = vector.shape_cast %57 : vector<8x8x8xf32> to vector<1x64x8xf32>
    %c0_62 = arith.constant 0 : index
    %c1_63 = arith.constant 1 : index
    %c1_64 = arith.constant 1 : index
    %c0_65 = arith.constant 0 : index
    %59 = vector.load %arg9[%c0_62, %c1_63, %c1_64, %c0_65] : memref<4x10x10x8xf32, #tpu.memory_space<vmem>>, vector<1x8x8x8xf32>
    %60 = vector.shape_cast %59 : vector<1x8x8x8xf32> to vector<8x8x8xf32>
    %61 = vector.shape_cast %60 : vector<8x8x8xf32> to vector<1x64x8xf32>
    %c1_66 = arith.constant 1 : index
    %c1_67 = arith.constant 1 : index
    %c1_68 = arith.constant 1 : index
    %c0_69 = arith.constant 0 : index
    %62 = vector.load %arg9[%c1_66, %c1_67, %c1_68, %c0_69] : memref<4x10x10x8xf32, #tpu.memory_space<vmem>>, vector<1x8x8x8xf32>
    %63 = vector.shape_cast %62 : vector<1x8x8x8xf32> to vector<8x8x8xf32>
    %64 = vector.shape_cast %63 : vector<8x8x8xf32> to vector<1x64x8xf32>
    %65 = tpu.concatenate %55, %58, %61, %64 in 0 : vector<1x64x8xf32>, vector<1x64x8xf32>, vector<1x64x8xf32>, vector<1x64x8xf32> -> vector<4x64x8xf32>
    %66 = vector.shape_cast %65 : vector<4x64x8xf32> to vector<256x8xf32>
    %c1_70 = arith.constant 1 : index
    %c0_71 = arith.constant 0 : index
    %c0_72 = arith.constant 0 : index
    %67 = vector.load %arg5[%c1_70, %c0_71, %c0_72] : memref<9x8x4xf32, #tpu.memory_space<vmem>>, vector<1x8x4xf32>
    %68 = vector.shape_cast %67 : vector<1x8x4xf32> to vector<8x4xf32>
    %cst_73 = arith.constant dense<0.000000e+00> : vector<256x4xf32>
    %69 = tpu.matmul %66, %68, %cst_73 {dimension_numbers = #tpu.dot_dimension_numbers<[1], [0], [0], [1], [0, 0, 1, 1], [], []>} : vector<256x8xf32>, vector<8x4xf32>, vector<256x4xf32> -> vector<256x4xf32>
    %70 = vector.shape_cast %69 : vector<256x4xf32> to vector<4x64x4xf32>
    %71 = arith.addf %52, %70 : vector<4x64x4xf32>
    %c3_74 = arith.constant 3 : index
    %c0_75 = arith.constant 0 : index
    %c1_76 = arith.constant 1 : index
    %c0_77 = arith.constant 0 : index
    %72 = vector.load %arg9[%c3_74, %c0_75, %c1_76, %c0_77] : memref<4x10x10x8xf32, #tpu.memory_space<vmem>>, vector<1x8x8x8xf32>
    %73 = vector.shape_cast %72 : vector<1x8x8x8xf32> to vector<8x8x8xf32>
    %74 = vector.shape_cast %73 : vector<8x8x8xf32> to vector<1x64x8xf32>
    %c2_78 = arith.constant 2 : index
    %c0_79 = arith.constant 0 : index
    %c2_80 = arith.constant 2 : index
    %c0_81 = arith.constant 0 : index
    %75 = vector.load %arg9[%c2_78, %c0_79, %c2_80, %c0_81] : memref<4x10x10x8xf32, #tpu.memory_space<vmem>>, vector<1x8x8x8xf32>
    %76 = vector.shape_cast %75 : vector<1x8x8x8xf32> to vector<8x8x8xf32>
    %77 = vector.shape_cast %76 : vector<8x8x8xf32> to vector<1x64x8xf32>
    %c1_82 = arith.constant 1 : index
    %c1_83 = arith.constant 1 : index
    %c1_84 = arith.constant 1 : index
    %c0_85 = arith.constant 0 : index
    %78 = vector.load %arg9[%c1_82, %c1_83, %c1_84, %c0_85] : memref<4x10x10x8xf32, #tpu.memory_space<vmem>>, vector<1x8x8x8xf32>
    %79 = vector.shape_cast %78 : vector<1x8x8x8xf32> to vector<8x8x8xf32>
    %80 = vector.shape_cast %79 : vector<8x8x8xf32> to vector<1x64x8xf32>
    %c0_86 = arith.constant 0 : index
    %c1_87 = arith.constant 1 : index
    %c2_88 = arith.constant 2 : index
    %c0_89 = arith.constant 0 : index
    %81 = vector.load %arg9[%c0_86, %c1_87, %c2_88, %c0_89] : memref<4x10x10x8xf32, #tpu.memory_space<vmem>>, vector<1x8x8x8xf32>
    %82 = vector.shape_cast %81 : vector<1x8x8x8xf32> to vector<8x8x8xf32>
    %83 = vector.shape_cast %82 : vector<8x8x8xf32> to vector<1x64x8xf32>
    %84 = tpu.concatenate %74, %77, %80, %83 in 0 : vector<1x64x8xf32>, vector<1x64x8xf32>, vector<1x64x8xf32>, vector<1x64x8xf32> -> vector<4x64x8xf32>
    %85 = vector.shape_cast %84 : vector<4x64x8xf32> to vector<256x8xf32>
    %c2_90 = arith.constant 2 : index
    %c0_91 = arith.constant 0 : index
    %c0_92 = arith.constant 0 : index
    %86 = vector.load %arg5[%c2_90, %c0_91, %c0_92] : memref<9x8x4xf32, #tpu.memory_space<vmem>>, vector<1x8x4xf32>
    %87 = vector.shape_cast %86 : vector<1x8x4xf32> to vector<8x4xf32>
    %cst_93 = arith.constant dense<0.000000e+00> : vector<256x4xf32>
    %88 = tpu.matmul %85, %87, %cst_93 {dimension_numbers = #tpu.dot_dimension_numbers<[1], [0], [0], [1], [0, 0, 1, 1], [], []>} : vector<256x8xf32>, vector<8x4xf32>, vector<256x4xf32> -> vector<256x4xf32>
    %89 = vector.shape_cast %88 : vector<256x4xf32> to vector<4x64x4xf32>
    %90 = arith.addf %71, %89 : vector<4x64x4xf32>
    %c1_94 = arith.constant 1 : index
    %c1_95 = arith.constant 1 : index
    %c0_96 = arith.constant 0 : index
    %c0_97 = arith.constant 0 : index
    %91 = vector.load %arg9[%c1_94, %c1_95, %c0_96, %c0_97] : memref<4x10x10x8xf32, #tpu.memory_space<vmem>>, vector<1x8x8x8xf32>
    %92 = vector.shape_cast %91 : vector<1x8x8x8xf32> to vector<8x8x8xf32>
    %93 = vector.shape_cast %92 : vector<8x8x8xf32> to vector<1x64x8xf32>
    %c0_98 = arith.constant 0 : index
    %c1_99 = arith.constant 1 : index
    %c1_100 = arith.constant 1 : index
    %c0_101 = arith.constant 0 : index
    %94 = vector.load %arg9[%c0_98, %c1_99, %c1_100, %c0_101] : memref<4x10x10x8xf32, #tpu.memory_space<vmem>>, vector<1x8x8x8xf32>
    %95 = vector.shape_cast %94 : vector<1x8x8x8xf32> to vector<8x8x8xf32>
    %96 = vector.shape_cast %95 : vector<8x8x8xf32> to vector<1x64x8xf32>
    %c3_102 = arith.constant 3 : index
    %c1_103 = arith.constant 1 : index
    %c0_104 = arith.constant 0 : index
    %c0_105 = arith.constant 0 : index
    %97 = vector.load %arg9[%c3_102, %c1_103, %c0_104, %c0_105] : memref<4x10x10x8xf32, #tpu.memory_space<vmem>>, vector<1x8x8x8xf32>
    %98 = vector.shape_cast %97 : vector<1x8x8x8xf32> to vector<8x8x8xf32>
    %99 = vector.shape_cast %98 : vector<8x8x8xf32> to vector<1x64x8xf32>
    %c2_106 = arith.constant 2 : index
    %c1_107 = arith.constant 1 : index
    %c1_108 = arith.constant 1 : index
    %c0_109 = arith.constant 0 : index
    %100 = vector.load %arg9[%c2_106, %c1_107, %c1_108, %c0_109] : memref<4x10x10x8xf32, #tpu.memory_space<vmem>>, vector<1x8x8x8xf32>
    %101 = vector.shape_cast %100 : vector<1x8x8x8xf32> to vector<8x8x8xf32>
    %102 = vector.shape_cast %101 : vector<8x8x8xf32> to vector<1x64x8xf32>
    %103 = tpu.concatenate %93, %96, %99, %102 in 0 : vector<1x64x8xf32>, vector<1x64x8xf32>, vector<1x64x8xf32>, vector<1x64x8xf32> -> vector<4x64x8xf32>
    %104 = vector.shape_cast %103 : vector<4x64x8xf32> to vector<256x8xf32>
    %c3_110 = arith.constant 3 : index
    %c0_111 = arith.constant 0 : index
    %c0_112 = arith.constant 0 : index
    %105 = vector.load %arg5[%c3_110, %c0_111, %c0_112] : memref<9x8x4xf32, #tpu.memory_space<vmem>>, vector<1x8x4xf32>
    %106 = vector.shape_cast %105 : vector<1x8x4xf32> to vector<8x4xf32>
    %cst_113 = arith.constant dense<0.000000e+00> : vector<256x4xf32>
    %107 = tpu.matmul %104, %106, %cst_113 {dimension_numbers = #tpu.dot_dimension_numbers<[1], [0], [0], [1], [0, 0, 1, 1], [], []>} : vector<256x8xf32>, vector<8x4xf32>, vector<256x4xf32> -> vector<256x4xf32>
    %108 = vector.shape_cast %107 : vector<256x4xf32> to vector<4x64x4xf32>
    %109 = arith.addf %90, %108 : vector<4x64x4xf32>
    %c0_114 = arith.constant 0 : index
    %c1_115 = arith.constant 1 : index
    %c1_116 = arith.constant 1 : index
    %c0_117 = arith.constant 0 : index
    %110 = vector.load %arg9[%c0_114, %c1_115, %c1_116, %c0_117] : memref<4x10x10x8xf32, #tpu.memory_space<vmem>>, vector<1x8x8x8xf32>
    %111 = vector.shape_cast %110 : vector<1x8x8x8xf32> to vector<8x8x8xf32>
    %112 = vector.shape_cast %111 : vector<8x8x8xf32> to vector<1x64x8xf32>
    %c1_118 = arith.constant 1 : index
    %c1_119 = arith.constant 1 : index
    %c1_120 = arith.constant 1 : index
    %c0_121 = arith.constant 0 : index
    %113 = vector.load %arg9[%c1_118, %c1_119, %c1_120, %c0_121] : memref<4x10x10x8xf32, #tpu.memory_space<vmem>>, vector<1x8x8x8xf32>
    %114 = vector.shape_cast %113 : vector<1x8x8x8xf32> to vector<8x8x8xf32>
    %115 = vector.shape_cast %114 : vector<8x8x8xf32> to vector<1x64x8xf32>
    %c2_122 = arith.constant 2 : index
    %c1_123 = arith.constant 1 : index
    %c1_124 = arith.constant 1 : index
    %c0_125 = arith.constant 0 : index
    %116 = vector.load %arg9[%c2_122, %c1_123, %c1_124, %c0_125] : memref<4x10x10x8xf32, #tpu.memory_space<vmem>>, vector<1x8x8x8xf32>
    %117 = vector.shape_cast %116 : vector<1x8x8x8xf32> to vector<8x8x8xf32>
    %118 = vector.shape_cast %117 : vector<8x8x8xf32> to vector<1x64x8xf32>
    %c3_126 = arith.constant 3 : index
    %c1_127 = arith.constant 1 : index
    %c1_128 = arith.constant 1 : index
    %c0_129 = arith.constant 0 : index
    %119 = vector.load %arg9[%c3_126, %c1_127, %c1_128, %c0_129] : memref<4x10x10x8xf32, #tpu.memory_space<vmem>>, vector<1x8x8x8xf32>
    %120 = vector.shape_cast %119 : vector<1x8x8x8xf32> to vector<8x8x8xf32>
    %121 = vector.shape_cast %120 : vector<8x8x8xf32> to vector<1x64x8xf32>
    %122 = tpu.concatenate %112, %115, %118, %121 in 0 : vector<1x64x8xf32>, vector<1x64x8xf32>, vector<1x64x8xf32>, vector<1x64x8xf32> -> vector<4x64x8xf32>
    %123 = vector.shape_cast %122 : vector<4x64x8xf32> to vector<256x8xf32>
    %c4_130 = arith.constant 4 : index
    %c0_131 = arith.constant 0 : index
    %c0_132 = arith.constant 0 : index
    %124 = vector.load %arg5[%c4_130, %c0_131, %c0_132] : memref<9x8x4xf32, #tpu.memory_space<vmem>>, vector<1x8x4xf32>
    %125 = vector.shape_cast %124 : vector<1x8x4xf32> to vector<8x4xf32>
    %cst_133 = arith.constant dense<0.000000e+00> : vector<256x4xf32>
    %126 = tpu.matmul %123, %125, %cst_133 {dimension_numbers = #tpu.dot_dimension_numbers<[1], [0], [0], [1], [0, 0, 1, 1], [], []>} : vector<256x8xf32>, vector<8x4xf32>, vector<256x4xf32> -> vector<256x4xf32>
    %127 = vector.shape_cast %126 : vector<256x4xf32> to vector<4x64x4xf32>
    %128 = arith.addf %109, %127 : vector<4x64x4xf32>
    %c1_134 = arith.constant 1 : index
    %c1_135 = arith.constant 1 : index
    %c1_136 = arith.constant 1 : index
    %c0_137 = arith.constant 0 : index
    %129 = vector.load %arg9[%c1_134, %c1_135, %c1_136, %c0_137] : memref<4x10x10x8xf32, #tpu.memory_space<vmem>>, vector<1x8x8x8xf32>
    %130 = vector.shape_cast %129 : vector<1x8x8x8xf32> to vector<8x8x8xf32>
    %131 = vector.shape_cast %130 : vector<8x8x8xf32> to vector<1x64x8xf32>
    %c0_138 = arith.constant 0 : index
    %c1_139 = arith.constant 1 : index
    %c2_140 = arith.constant 2 : index
    %c0_141 = arith.constant 0 : index
    %132 = vector.load %arg9[%c0_138, %c1_139, %c2_140, %c0_141] : memref<4x10x10x8xf32, #tpu.memory_space<vmem>>, vector<1x8x8x8xf32>
    %133 = vector.shape_cast %132 : vector<1x8x8x8xf32> to vector<8x8x8xf32>
    %134 = vector.shape_cast %133 : vector<8x8x8xf32> to vector<1x64x8xf32>
    %c3_142 = arith.constant 3 : index
    %c1_143 = arith.constant 1 : index
    %c1_144 = arith.constant 1 : index
    %c0_145 = arith.constant 0 : index
    %135 = vector.load %arg9[%c3_142, %c1_143, %c1_144, %c0_145] : memref<4x10x10x8xf32, #tpu.memory_space<vmem>>, vector<1x8x8x8xf32>
    %136 = vector.shape_cast %135 : vector<1x8x8x8xf32> to vector<8x8x8xf32>
    %137 = vector.shape_cast %136 : vector<8x8x8xf32> to vector<1x64x8xf32>
    %c2_146 = arith.constant 2 : index
    %c1_147 = arith.constant 1 : index
    %c2_148 = arith.constant 2 : index
    %c0_149 = arith.constant 0 : index
    %138 = vector.load %arg9[%c2_146, %c1_147, %c2_148, %c0_149] : memref<4x10x10x8xf32, #tpu.memory_space<vmem>>, vector<1x8x8x8xf32>
    %139 = vector.shape_cast %138 : vector<1x8x8x8xf32> to vector<8x8x8xf32>
    %140 = vector.shape_cast %139 : vector<8x8x8xf32> to vector<1x64x8xf32>
    %141 = tpu.concatenate %131, %134, %137, %140 in 0 : vector<1x64x8xf32>, vector<1x64x8xf32>, vector<1x64x8xf32>, vector<1x64x8xf32> -> vector<4x64x8xf32>
    %142 = vector.shape_cast %141 : vector<4x64x8xf32> to vector<256x8xf32>
    %c5 = arith.constant 5 : index
    %c0_150 = arith.constant 0 : index
    %c0_151 = arith.constant 0 : index
    %143 = vector.load %arg5[%c5, %c0_150, %c0_151] : memref<9x8x4xf32, #tpu.memory_space<vmem>>, vector<1x8x4xf32>
    %144 = vector.shape_cast %143 : vector<1x8x4xf32> to vector<8x4xf32>
    %cst_152 = arith.constant dense<0.000000e+00> : vector<256x4xf32>
    %145 = tpu.matmul %142, %144, %cst_152 {dimension_numbers = #tpu.dot_dimension_numbers<[1], [0], [0], [1], [0, 0, 1, 1], [], []>} : vector<256x8xf32>, vector<8x4xf32>, vector<256x4xf32> -> vector<256x4xf32>
    %146 = vector.shape_cast %145 : vector<256x4xf32> to vector<4x64x4xf32>
    %147 = arith.addf %128, %146 : vector<4x64x4xf32>
    %c3_153 = arith.constant 3 : index
    %c1_154 = arith.constant 1 : index
    %c0_155 = arith.constant 0 : index
    %c0_156 = arith.constant 0 : index
    %148 = vector.load %arg9[%c3_153, %c1_154, %c0_155, %c0_156] : memref<4x10x10x8xf32, #tpu.memory_space<vmem>>, vector<1x8x8x8xf32>
    %149 = vector.shape_cast %148 : vector<1x8x8x8xf32> to vector<8x8x8xf32>
    %150 = vector.shape_cast %149 : vector<8x8x8xf32> to vector<1x64x8xf32>
    %c2_157 = arith.constant 2 : index
    %c1_158 = arith.constant 1 : index
    %c1_159 = arith.constant 1 : index
    %c0_160 = arith.constant 0 : index
    %151 = vector.load %arg9[%c2_157, %c1_158, %c1_159, %c0_160] : memref<4x10x10x8xf32, #tpu.memory_space<vmem>>, vector<1x8x8x8xf32>
    %152 = vector.shape_cast %151 : vector<1x8x8x8xf32> to vector<8x8x8xf32>
    %153 = vector.shape_cast %152 : vector<8x8x8xf32> to vector<1x64x8xf32>
    %c1_161 = arith.constant 1 : index
    %c2_162 = arith.constant 2 : index
    %c0_163 = arith.constant 0 : index
    %c0_164 = arith.constant 0 : index
    %154 = vector.load %arg9[%c1_161, %c2_162, %c0_163, %c0_164] : memref<4x10x10x8xf32, #tpu.memory_space<vmem>>, vector<1x8x8x8xf32>
    %155 = vector.shape_cast %154 : vector<1x8x8x8xf32> to vector<8x8x8xf32>
    %156 = vector.shape_cast %155 : vector<8x8x8xf32> to vector<1x64x8xf32>
    %c0_165 = arith.constant 0 : index
    %c2_166 = arith.constant 2 : index
    %c1_167 = arith.constant 1 : index
    %c0_168 = arith.constant 0 : index
    %157 = vector.load %arg9[%c0_165, %c2_166, %c1_167, %c0_168] : memref<4x10x10x8xf32, #tpu.memory_space<vmem>>, vector<1x8x8x8xf32>
    %158 = vector.shape_cast %157 : vector<1x8x8x8xf32> to vector<8x8x8xf32>
    %159 = vector.shape_cast %158 : vector<8x8x8xf32> to vector<1x64x8xf32>
    %160 = tpu.concatenate %150, %153, %156, %159 in 0 : vector<1x64x8xf32>, vector<1x64x8xf32>, vector<1x64x8xf32>, vector<1x64x8xf32> -> vector<4x64x8xf32>
    %161 = vector.shape_cast %160 : vector<4x64x8xf32> to vector<256x8xf32>
    %c6 = arith.constant 6 : index
    %c0_169 = arith.constant 0 : index
    %c0_170 = arith.constant 0 : index
    %162 = vector.load %arg5[%c6, %c0_169, %c0_170] : memref<9x8x4xf32, #tpu.memory_space<vmem>>, vector<1x8x4xf32>
    %163 = vector.shape_cast %162 : vector<1x8x4xf32> to vector<8x4xf32>
    %cst_171 = arith.constant dense<0.000000e+00> : vector<256x4xf32>
    %164 = tpu.matmul %161, %163, %cst_171 {dimension_numbers = #tpu.dot_dimension_numbers<[1], [0], [0], [1], [0, 0, 1, 1], [], []>} : vector<256x8xf32>, vector<8x4xf32>, vector<256x4xf32> -> vector<256x4xf32>
    %165 = vector.shape_cast %164 : vector<256x4xf32> to vector<4x64x4xf32>
    %166 = arith.addf %147, %165 : vector<4x64x4xf32>
    %c2_172 = arith.constant 2 : index
    %c1_173 = arith.constant 1 : index
    %c1_174 = arith.constant 1 : index
    %c0_175 = arith.constant 0 : index
    %167 = vector.load %arg9[%c2_172, %c1_173, %c1_174, %c0_175] : memref<4x10x10x8xf32, #tpu.memory_space<vmem>>, vector<1x8x8x8xf32>
    %168 = vector.shape_cast %167 : vector<1x8x8x8xf32> to vector<8x8x8xf32>
    %169 = vector.shape_cast %168 : vector<8x8x8xf32> to vector<1x64x8xf32>
    %c3_176 = arith.constant 3 : index
    %c1_177 = arith.constant 1 : index
    %c1_178 = arith.constant 1 : index
    %c0_179 = arith.constant 0 : index
    %170 = vector.load %arg9[%c3_176, %c1_177, %c1_178, %c0_179] : memref<4x10x10x8xf32, #tpu.memory_space<vmem>>, vector<1x8x8x8xf32>
    %171 = vector.shape_cast %170 : vector<1x8x8x8xf32> to vector<8x8x8xf32>
    %172 = vector.shape_cast %171 : vector<8x8x8xf32> to vector<1x64x8xf32>
    %c0_180 = arith.constant 0 : index
    %c2_181 = arith.constant 2 : index
    %c1_182 = arith.constant 1 : index
    %c0_183 = arith.constant 0 : index
    %173 = vector.load %arg9[%c0_180, %c2_181, %c1_182, %c0_183] : memref<4x10x10x8xf32, #tpu.memory_space<vmem>>, vector<1x8x8x8xf32>
    %174 = vector.shape_cast %173 : vector<1x8x8x8xf32> to vector<8x8x8xf32>
    %175 = vector.shape_cast %174 : vector<8x8x8xf32> to vector<1x64x8xf32>
    %c1_184 = arith.constant 1 : index
    %c2_185 = arith.constant 2 : index
    %c1_186 = arith.constant 1 : index
    %c0_187 = arith.constant 0 : index
    %176 = vector.load %arg9[%c1_184, %c2_185, %c1_186, %c0_187] : memref<4x10x10x8xf32, #tpu.memory_space<vmem>>, vector<1x8x8x8xf32>
    %177 = vector.shape_cast %176 : vector<1x8x8x8xf32> to vector<8x8x8xf32>
    %178 = vector.shape_cast %177 : vector<8x8x8xf32> to vector<1x64x8xf32>
    %179 = tpu.concatenate %169, %172, %175, %178 in 0 : vector<1x64x8xf32>, vector<1x64x8xf32>, vector<1x64x8xf32>, vector<1x64x8xf32> -> vector<4x64x8xf32>
    %180 = vector.shape_cast %179 : vector<4x64x8xf32> to vector<256x8xf32>
    %c7 = arith.constant 7 : index
    %c0_188 = arith.constant 0 : index
    %c0_189 = arith.constant 0 : index
    %181 = vector.load %arg5[%c7, %c0_188, %c0_189] : memref<9x8x4xf32, #tpu.memory_space<vmem>>, vector<1x8x4xf32>
    %182 = vector.shape_cast %181 : vector<1x8x4xf32> to vector<8x4xf32>
    %cst_190 = arith.constant dense<0.000000e+00> : vector<256x4xf32>
    %183 = tpu.matmul %180, %182, %cst_190 {dimension_numbers = #tpu.dot_dimension_numbers<[1], [0], [0], [1], [0, 0, 1, 1], [], []>} : vector<256x8xf32>, vector<8x4xf32>, vector<256x4xf32> -> vector<256x4xf32>
    %184 = vector.shape_cast %183 : vector<256x4xf32> to vector<4x64x4xf32>
    %185 = arith.addf %166, %184 : vector<4x64x4xf32>
    %c3_191 = arith.constant 3 : index
    %c1_192 = arith.constant 1 : index
    %c1_193 = arith.constant 1 : index
    %c0_194 = arith.constant 0 : index
    %186 = vector.load %arg9[%c3_191, %c1_192, %c1_193, %c0_194] : memref<4x10x10x8xf32, #tpu.memory_space<vmem>>, vector<1x8x8x8xf32>
    %187 = vector.shape_cast %186 : vector<1x8x8x8xf32> to vector<8x8x8xf32>
    %188 = vector.shape_cast %187 : vector<8x8x8xf32> to vector<1x64x8xf32>
    %c2_195 = arith.constant 2 : index
    %c1_196 = arith.constant 1 : index
    %c2_197 = arith.constant 2 : index
    %c0_198 = arith.constant 0 : index
    %189 = vector.load %arg9[%c2_195, %c1_196, %c2_197, %c0_198] : memref<4x10x10x8xf32, #tpu.memory_space<vmem>>, vector<1x8x8x8xf32>
    %190 = vector.shape_cast %189 : vector<1x8x8x8xf32> to vector<8x8x8xf32>
    %191 = vector.shape_cast %190 : vector<8x8x8xf32> to vector<1x64x8xf32>
    %c1_199 = arith.constant 1 : index
    %c2_200 = arith.constant 2 : index
    %c1_201 = arith.constant 1 : index
    %c0_202 = arith.constant 0 : index
    %192 = vector.load %arg9[%c1_199, %c2_200, %c1_201, %c0_202] : memref<4x10x10x8xf32, #tpu.memory_space<vmem>>, vector<1x8x8x8xf32>
    %193 = vector.shape_cast %192 : vector<1x8x8x8xf32> to vector<8x8x8xf32>
    %194 = vector.shape_cast %193 : vector<8x8x8xf32> to vector<1x64x8xf32>
    %c0_203 = arith.constant 0 : index
    %c2_204 = arith.constant 2 : index
    %c2_205 = arith.constant 2 : index
    %c0_206 = arith.constant 0 : index
    %195 = vector.load %arg9[%c0_203, %c2_204, %c2_205, %c0_206] : memref<4x10x10x8xf32, #tpu.memory_space<vmem>>, vector<1x8x8x8xf32>
    %196 = vector.shape_cast %195 : vector<1x8x8x8xf32> to vector<8x8x8xf32>
    %197 = vector.shape_cast %196 : vector<8x8x8xf32> to vector<1x64x8xf32>
    %198 = tpu.concatenate %188, %191, %194, %197 in 0 : vector<1x64x8xf32>, vector<1x64x8xf32>, vector<1x64x8xf32>, vector<1x64x8xf32> -> vector<4x64x8xf32>
    %199 = vector.shape_cast %198 : vector<4x64x8xf32> to vector<256x8xf32>
    %c8 = arith.constant 8 : index
    %c0_207 = arith.constant 0 : index
    %c0_208 = arith.constant 0 : index
    %200 = vector.load %arg5[%c8, %c0_207, %c0_208] : memref<9x8x4xf32, #tpu.memory_space<vmem>>, vector<1x8x4xf32>
    %201 = vector.shape_cast %200 : vector<1x8x4xf32> to vector<8x4xf32>
    %cst_209 = arith.constant dense<0.000000e+00> : vector<256x4xf32>
    %202 = tpu.matmul %199, %201, %cst_209 {dimension_numbers = #tpu.dot_dimension_numbers<[1], [0], [0], [1], [0, 0, 1, 1], [], []>} : vector<256x8xf32>, vector<8x4xf32>, vector<256x4xf32> -> vector<256x4xf32>
    %203 = vector.shape_cast %202 : vector<256x4xf32> to vector<4x64x4xf32>
    %204 = arith.addf %185, %203 : vector<4x64x4xf32>
    %205 = vector.shape_cast %204 : vector<4x64x4xf32> to vector<4x8x8x4xf32>
    %c0_210 = arith.constant 0 : index
    %c0_211 = arith.constant 0 : index
    %c0_212 = arith.constant 0 : index
    %c0_213 = arith.constant 0 : index
    %c0_214 = arith.constant 0 : index
    %206 = vector.load %arg6[%c0_210, %c0_211, %c0_212, %c0_213, %c0_214] : memref<1x4x8x8x4xf32, #tpu.memory_space<vmem>>, vector<1x4x8x8x4xf32>
    %207 = vector.shape_cast %206 : vector<1x4x8x8x4xf32> to vector<4x8x8x4xf32>
    %208 = vector.shape_cast %205 : vector<4x8x8x4xf32> to vector<1x4x8x8x4xf32>
    tpu.vector_store %arg6[%c0_210, %c0_211, %c0_212, %c0_213, %c0_214], %208 {strides = array<i32>} : memref<1x4x8x8x4xf32, #tpu.memory_space<vmem>>, vector<1x4x8x8x4xf32>,
    %cst_215 = arith.constant dense<0.000000e+00> : vector<64x4xf32>
    %209 = vector.multi_reduction <add>, %204, %cst_215 [0] : vector<4x64x4xf32> to vector<64x4xf32>
    %cst_216 = arith.constant dense<0.000000e+00> : vector<4xf32>
    %210 = vector.multi_reduction <add>, %209, %cst_216 [0] : vector<64x4xf32> to vector<4xf32>
    %211 = vector.shape_cast %210 : vector<4xf32> to vector<1x4xf32>
    %212 = arith.mulf %204, %204 : vector<4x64x4xf32>
    %cst_217 = arith.constant dense<0.000000e+00> : vector<64x4xf32>
    %213 = vector.multi_reduction <add>, %212, %cst_217 [0] : vector<4x64x4xf32> to vector<64x4xf32>
    %cst_218 = arith.constant dense<0.000000e+00> : vector<4xf32>
    %214 = vector.multi_reduction <add>, %213, %cst_218 [0] : vector<64x4xf32> to vector<4xf32>
    %215 = vector.shape_cast %214 : vector<4xf32> to vector<1x4xf32>
    %c0_219 = arith.constant 0 : index
    %c0_220 = arith.constant 0 : index
    %c0_221 = arith.constant 0 : index
    %216 = vector.load %arg7[%c0_219, %c0_220, %c0_221] : memref<1x1x4xf32, #tpu.memory_space<vmem>>, vector<1x1x4xf32>
    %217 = vector.shape_cast %216 : vector<1x1x4xf32> to vector<1x4xf32>
    %218 = vector.shape_cast %211 : vector<1x4xf32> to vector<1x1x4xf32>
    tpu.vector_store %arg7[%c0_219, %c0_220, %c0_221], %218 {strides = array<i32>} : memref<1x1x4xf32, #tpu.memory_space<vmem>>, vector<1x1x4xf32>,
    %c0_222 = arith.constant 0 : index
    %c0_223 = arith.constant 0 : index
    %c0_224 = arith.constant 0 : index
    %219 = vector.load %arg8[%c0_222, %c0_223, %c0_224] : memref<1x1x4xf32, #tpu.memory_space<vmem>>, vector<1x1x4xf32>
    %220 = vector.shape_cast %219 : vector<1x1x4xf32> to vector<1x4xf32>
    %221 = vector.shape_cast %215 : vector<1x4xf32> to vector<1x1x4xf32>
    tpu.vector_store %arg8[%c0_222, %c0_223, %c0_224], %221 {strides = array<i32>} : memref<1x1x4xf32, #tpu.memory_space<vmem>>, vector<1x1x4xf32>,
    return
  }
  func.func @transform_0(%arg0: i32) -> (i32, i32, i32, i32) {
    %c0_i32 = arith.constant 0 : i32
    %c0_i32_0 = arith.constant 0 : i32
    %c0_i32_1 = arith.constant 0 : i32
    %c0_i32_2 = arith.constant 0 : i32
    return %arg0, %c0_i32, %c0_i32_0, %c0_i32_1 : i32, i32, i32, i32
  }
  func.func @transform_1(%arg0: i32) -> (i32, i32, i32, i32, i32) {
    %c0_i32 = arith.constant 0 : i32
    %c0_i32_0 = arith.constant 0 : i32
    %c0_i32_1 = arith.constant 0 : i32
    %c0_i32_2 = arith.constant 0 : i32
    %c0_i32_3 = arith.constant 0 : i32
    return %arg0, %c0_i32, %c0_i32_0, %c0_i32_1, %c0_i32_2 : i32, i32, i32, i32, i32
  }
  func.func @transform_2(%arg0: i32) -> (i32, i32) {
    %c0_i32 = arith.constant 0 : i32
    %c0_i32_0 = arith.constant 0 : i32
    %c0_i32_1 = arith.constant 0 : i32
    return %c0_i32, %c0_i32_0 : i32, i32
  }
  func.func @transform_3(%arg0: i32) -> (i32, i32) {
    %c0_i32 = arith.constant 0 : i32
    %c0_i32_0 = arith.constant 0 : i32
    %c0_i32_1 = arith.constant 0 : i32
    return %c0_i32, %c0_i32_0 : i32, i32
  }
  func.func @transform_4(%arg0: i32) -> (i32, i32, i32) {
    %c0_i32 = arith.constant 0 : i32
    %c0_i32_0 = arith.constant 0 : i32
    %c0_i32_1 = arith.constant 0 : i32
    %c0_i32_2 = arith.constant 0 : i32
    return %c0_i32, %c0_i32_0, %c0_i32_1 : i32, i32, i32
  }
  func.func @transform_5(%arg0: i32) -> (i32, i32, i32, i32, i32) {
    %c0_i32 = arith.constant 0 : i32
    %c0_i32_0 = arith.constant 0 : i32
    %c0_i32_1 = arith.constant 0 : i32
    %c0_i32_2 = arith.constant 0 : i32
    %c0_i32_3 = arith.constant 0 : i32
    return %arg0, %c0_i32, %c0_i32_0, %c0_i32_1, %c0_i32_2 : i32, i32, i32, i32, i32
  }
  func.func @transform_6(%arg0: i32) -> (i32, i32, i32) {
    %c0_i32 = arith.constant 0 : i32
    %c0_i32_0 = arith.constant 0 : i32
    %c0_i32_1 = arith.constant 0 : i32
    return %arg0, %c0_i32, %c0_i32_0 : i32, i32, i32
  }
  func.func @transform_7(%arg0: i32) -> (i32, i32, i32) {
    %c0_i32 = arith.constant 0 : i32
    %c0_i32_0 = arith.constant 0 : i32
    %c0_i32_1 = arith.constant 0 : i32
    return %arg0, %c0_i32, %c0_i32_0 : i32, i32, i32
  }
}

module attributes {stable_mosaic.version = 11 : i64} {
  func.func @_stage2_kernel(%arg0: i32, %arg1: memref<1x4x8x8x4xf32, #tpu.memory_space<vmem>>, %arg2: memref<1x4xf32, #tpu.memory_space<vmem>>, %arg3: memref<1x4xf32, #tpu.memory_space<vmem>>, %arg4: memref<9x4x4xf32, #tpu.memory_space<vmem>>, %arg5: memref<1x4x8x8x4xf32, #tpu.memory_space<vmem>>, %arg6: memref<1x1x4xf32, #tpu.memory_space<vmem>>, %arg7: memref<1x1x4xf32, #tpu.memory_space<vmem>>, %arg8: memref<4x10x10x4xf32, #tpu.memory_space<vmem>>) attributes {dimension_semantics = [#tpu.dimension_semantics<parallel>], iteration_bounds = array<i64: 2>, scalar_prefetch = 0 : i64, scratch_operands = 1 : i64, tpu.core_type = #tpu.core_type<tc>, window_params = [{transform_indices = @transform_0, window_bounds = array<i64: 1, 4, 8, 8, 4>}, {pipeline_mode = #tpu.pipeline_mode<synchronous>, transform_indices = @transform_1, window_bounds = array<i64: 1, 4>}, {pipeline_mode = #tpu.pipeline_mode<synchronous>, transform_indices = @transform_2, window_bounds = array<i64: 1, 4>}, {pipeline_mode = #tpu.pipeline_mode<synchronous>, transform_indices = @transform_3, window_bounds = array<i64: 9, 4, 4>}, {transform_indices = @transform_4, window_bounds = array<i64: 1, 4, 8, 8, 4>}, {transform_indices = @transform_5, window_bounds = array<i64: 1, 1, 4>}, {transform_indices = @transform_6, window_bounds = array<i64: 1, 1, 4>}]} {
    %cst = arith.constant 0.000000e+00 : f32
    %0 = vector.broadcast %cst : f32 to vector<4x10x10x4xf32>
    %c0 = arith.constant 0 : index
    %c0_0 = arith.constant 0 : index
    %c0_1 = arith.constant 0 : index
    %c0_2 = arith.constant 0 : index
    %1 = vector.load %arg8[%c0, %c0_0, %c0_1, %c0_2] : memref<4x10x10x4xf32, #tpu.memory_space<vmem>>, vector<4x10x10x4xf32>
    tpu.vector_store %arg8[%c0, %c0_0, %c0_1, %c0_2], %0 {strides = array<i32>} : memref<4x10x10x4xf32, #tpu.memory_space<vmem>>, vector<4x10x10x4xf32>,
    %c0_3 = arith.constant 0 : index
    %c0_4 = arith.constant 0 : index
    %2 = vector.load %arg2[%c0_3, %c0_4] : memref<1x4xf32, #tpu.memory_space<vmem>>, vector<1x4xf32>
    %3 = vector.shape_cast %2 : vector<1x4xf32> to vector<1x1x1x4xf32>
    %c0_5 = arith.constant 0 : index
    %c0_6 = arith.constant 0 : index
    %4 = vector.load %arg3[%c0_5, %c0_6] : memref<1x4xf32, #tpu.memory_space<vmem>>, vector<1x4xf32>
    %5 = vector.shape_cast %4 : vector<1x4xf32> to vector<1x1x1x4xf32>
    %c0_7 = arith.constant 0 : index
    %c0_8 = arith.constant 0 : index
    %c0_9 = arith.constant 0 : index
    %c0_10 = arith.constant 0 : index
    %c0_11 = arith.constant 0 : index
    %6 = vector.load %arg1[%c0_7, %c0_8, %c0_9, %c0_10, %c0_11] : memref<1x4x8x8x4xf32, #tpu.memory_space<vmem>>, vector<1x4x8x8x4xf32>
    %7 = vector.shape_cast %6 : vector<1x4x8x8x4xf32> to vector<4x8x8x4xf32>
    %8 = vector.broadcast %3 : vector<1x1x1x4xf32> to vector<4x8x8x4xf32>
    %9 = arith.mulf %7, %8 : vector<4x8x8x4xf32>
    %10 = vector.broadcast %5 : vector<1x1x1x4xf32> to vector<4x8x8x4xf32>
    %11 = arith.addf %9, %10 : vector<4x8x8x4xf32>
    %cst_12 = arith.constant 0.000000e+00 : f32
    %12 = vector.broadcast %cst_12 : f32 to vector<4x8x8x4xf32>
    %13 = arith.maximumf %11, %12 : vector<4x8x8x4xf32>
    %c0_13 = arith.constant 0 : index
    %c1 = arith.constant 1 : index
    %c1_14 = arith.constant 1 : index
    %c0_15 = arith.constant 0 : index
    %14 = vector.load %arg8[%c0_13, %c1, %c1_14, %c0_15] : memref<4x10x10x4xf32, #tpu.memory_space<vmem>>, vector<4x8x8x4xf32>
    tpu.vector_store %arg8[%c0_13, %c1, %c1_14, %c0_15], %13 {strides = array<i32>} : memref<4x10x10x4xf32, #tpu.memory_space<vmem>>, vector<4x8x8x4xf32>,
    %cst_16 = arith.constant 0.000000e+00 : f32
    %15 = vector.broadcast %cst_16 : f32 to vector<4x64x4xf32>
    %c3 = arith.constant 3 : index
    %c0_17 = arith.constant 0 : index
    %c0_18 = arith.constant 0 : index
    %c0_19 = arith.constant 0 : index
    %16 = vector.load %arg8[%c3, %c0_17, %c0_18, %c0_19] : memref<4x10x10x4xf32, #tpu.memory_space<vmem>>, vector<1x8x8x4xf32>
    %17 = vector.shape_cast %16 : vector<1x8x8x4xf32> to vector<8x8x4xf32>
    %18 = vector.shape_cast %17 : vector<8x8x4xf32> to vector<1x64x4xf32>
    %c2 = arith.constant 2 : index
    %c0_20 = arith.constant 0 : index
    %c1_21 = arith.constant 1 : index
    %c0_22 = arith.constant 0 : index
    %19 = vector.load %arg8[%c2, %c0_20, %c1_21, %c0_22] : memref<4x10x10x4xf32, #tpu.memory_space<vmem>>, vector<1x8x8x4xf32>
    %20 = vector.shape_cast %19 : vector<1x8x8x4xf32> to vector<8x8x4xf32>
    %21 = vector.shape_cast %20 : vector<8x8x4xf32> to vector<1x64x4xf32>
    %c1_23 = arith.constant 1 : index
    %c1_24 = arith.constant 1 : index
    %c0_25 = arith.constant 0 : index
    %c0_26 = arith.constant 0 : index
    %22 = vector.load %arg8[%c1_23, %c1_24, %c0_25, %c0_26] : memref<4x10x10x4xf32, #tpu.memory_space<vmem>>, vector<1x8x8x4xf32>
    %23 = vector.shape_cast %22 : vector<1x8x8x4xf32> to vector<8x8x4xf32>
    %24 = vector.shape_cast %23 : vector<8x8x4xf32> to vector<1x64x4xf32>
    %c0_27 = arith.constant 0 : index
    %c1_28 = arith.constant 1 : index
    %c1_29 = arith.constant 1 : index
    %c0_30 = arith.constant 0 : index
    %25 = vector.load %arg8[%c0_27, %c1_28, %c1_29, %c0_30] : memref<4x10x10x4xf32, #tpu.memory_space<vmem>>, vector<1x8x8x4xf32>
    %26 = vector.shape_cast %25 : vector<1x8x8x4xf32> to vector<8x8x4xf32>
    %27 = vector.shape_cast %26 : vector<8x8x4xf32> to vector<1x64x4xf32>
    %28 = tpu.concatenate %18, %21, %24, %27 in 0 : vector<1x64x4xf32>, vector<1x64x4xf32>, vector<1x64x4xf32>, vector<1x64x4xf32> -> vector<4x64x4xf32>
    %29 = vector.shape_cast %28 : vector<4x64x4xf32> to vector<256x4xf32>
    %c0_31 = arith.constant 0 : index
    %c0_32 = arith.constant 0 : index
    %c0_33 = arith.constant 0 : index
    %30 = vector.load %arg4[%c0_31, %c0_32, %c0_33] : memref<9x4x4xf32, #tpu.memory_space<vmem>>, vector<1x4x4xf32>
    %31 = vector.shape_cast %30 : vector<1x4x4xf32> to vector<4x4xf32>
    %cst_34 = arith.constant dense<0.000000e+00> : vector<256x4xf32>
    %32 = tpu.matmul %29, %31, %cst_34 {dimension_numbers = #tpu.dot_dimension_numbers<[1], [0], [0], [1], [0, 0, 1, 1], [], []>} : vector<256x4xf32>, vector<4x4xf32>, vector<256x4xf32> -> vector<256x4xf32>
    %33 = vector.shape_cast %32 : vector<256x4xf32> to vector<4x64x4xf32>
    %34 = arith.addf %15, %33 : vector<4x64x4xf32>
    %c2_35 = arith.constant 2 : index
    %c0_36 = arith.constant 0 : index
    %c1_37 = arith.constant 1 : index
    %c0_38 = arith.constant 0 : index
    %35 = vector.load %arg8[%c2_35, %c0_36, %c1_37, %c0_38] : memref<4x10x10x4xf32, #tpu.memory_space<vmem>>, vector<1x8x8x4xf32>
    %36 = vector.shape_cast %35 : vector<1x8x8x4xf32> to vector<8x8x4xf32>
    %37 = vector.shape_cast %36 : vector<8x8x4xf32> to vector<1x64x4xf32>
    %c3_39 = arith.constant 3 : index
    %c0_40 = arith.constant 0 : index
    %c1_41 = arith.constant 1 : index
    %c0_42 = arith.constant 0 : index
    %38 = vector.load %arg8[%c3_39, %c0_40, %c1_41, %c0_42] : memref<4x10x10x4xf32, #tpu.memory_space<vmem>>, vector<1x8x8x4xf32>
    %39 = vector.shape_cast %38 : vector<1x8x8x4xf32> to vector<8x8x4xf32>
    %40 = vector.shape_cast %39 : vector<8x8x4xf32> to vector<1x64x4xf32>
    %c0_43 = arith.constant 0 : index
    %c1_44 = arith.constant 1 : index
    %c1_45 = arith.constant 1 : index
    %c0_46 = arith.constant 0 : index
    %41 = vector.load %arg8[%c0_43, %c1_44, %c1_45, %c0_46] : memref<4x10x10x4xf32, #tpu.memory_space<vmem>>, vector<1x8x8x4xf32>
    %42 = vector.shape_cast %41 : vector<1x8x8x4xf32> to vector<8x8x4xf32>
    %43 = vector.shape_cast %42 : vector<8x8x4xf32> to vector<1x64x4xf32>
    %c1_47 = arith.constant 1 : index
    %c1_48 = arith.constant 1 : index
    %c1_49 = arith.constant 1 : index
    %c0_50 = arith.constant 0 : index
    %44 = vector.load %arg8[%c1_47, %c1_48, %c1_49, %c0_50] : memref<4x10x10x4xf32, #tpu.memory_space<vmem>>, vector<1x8x8x4xf32>
    %45 = vector.shape_cast %44 : vector<1x8x8x4xf32> to vector<8x8x4xf32>
    %46 = vector.shape_cast %45 : vector<8x8x4xf32> to vector<1x64x4xf32>
    %47 = tpu.concatenate %37, %40, %43, %46 in 0 : vector<1x64x4xf32>, vector<1x64x4xf32>, vector<1x64x4xf32>, vector<1x64x4xf32> -> vector<4x64x4xf32>
    %48 = vector.shape_cast %47 : vector<4x64x4xf32> to vector<256x4xf32>
    %c1_51 = arith.constant 1 : index
    %c0_52 = arith.constant 0 : index
    %c0_53 = arith.constant 0 : index
    %49 = vector.load %arg4[%c1_51, %c0_52, %c0_53] : memref<9x4x4xf32, #tpu.memory_space<vmem>>, vector<1x4x4xf32>
    %50 = vector.shape_cast %49 : vector<1x4x4xf32> to vector<4x4xf32>
    %cst_54 = arith.constant dense<0.000000e+00> : vector<256x4xf32>
    %51 = tpu.matmul %48, %50, %cst_54 {dimension_numbers = #tpu.dot_dimension_numbers<[1], [0], [0], [1], [0, 0, 1, 1], [], []>} : vector<256x4xf32>, vector<4x4xf32>, vector<256x4xf32> -> vector<256x4xf32>
    %52 = vector.shape_cast %51 : vector<256x4xf32> to vector<4x64x4xf32>
    %53 = arith.addf %34, %52 : vector<4x64x4xf32>
    %c3_55 = arith.constant 3 : index
    %c0_56 = arith.constant 0 : index
    %c1_57 = arith.constant 1 : index
    %c0_58 = arith.constant 0 : index
    %54 = vector.load %arg8[%c3_55, %c0_56, %c1_57, %c0_58] : memref<4x10x10x4xf32, #tpu.memory_space<vmem>>, vector<1x8x8x4xf32>
    %55 = vector.shape_cast %54 : vector<1x8x8x4xf32> to vector<8x8x4xf32>
    %56 = vector.shape_cast %55 : vector<8x8x4xf32> to vector<1x64x4xf32>
    %c2_59 = arith.constant 2 : index
    %c0_60 = arith.constant 0 : index
    %c2_61 = arith.constant 2 : index
    %c0_62 = arith.constant 0 : index
    %57 = vector.load %arg8[%c2_59, %c0_60, %c2_61, %c0_62] : memref<4x10x10x4xf32, #tpu.memory_space<vmem>>, vector<1x8x8x4xf32>
    %58 = vector.shape_cast %57 : vector<1x8x8x4xf32> to vector<8x8x4xf32>
    %59 = vector.shape_cast %58 : vector<8x8x4xf32> to vector<1x64x4xf32>
    %c1_63 = arith.constant 1 : index
    %c1_64 = arith.constant 1 : index
    %c1_65 = arith.constant 1 : index
    %c0_66 = arith.constant 0 : index
    %60 = vector.load %arg8[%c1_63, %c1_64, %c1_65, %c0_66] : memref<4x10x10x4xf32, #tpu.memory_space<vmem>>, vector<1x8x8x4xf32>
    %61 = vector.shape_cast %60 : vector<1x8x8x4xf32> to vector<8x8x4xf32>
    %62 = vector.shape_cast %61 : vector<8x8x4xf32> to vector<1x64x4xf32>
    %c0_67 = arith.constant 0 : index
    %c1_68 = arith.constant 1 : index
    %c2_69 = arith.constant 2 : index
    %c0_70 = arith.constant 0 : index
    %63 = vector.load %arg8[%c0_67, %c1_68, %c2_69, %c0_70] : memref<4x10x10x4xf32, #tpu.memory_space<vmem>>, vector<1x8x8x4xf32>
    %64 = vector.shape_cast %63 : vector<1x8x8x4xf32> to vector<8x8x4xf32>
    %65 = vector.shape_cast %64 : vector<8x8x4xf32> to vector<1x64x4xf32>
    %66 = tpu.concatenate %56, %59, %62, %65 in 0 : vector<1x64x4xf32>, vector<1x64x4xf32>, vector<1x64x4xf32>, vector<1x64x4xf32> -> vector<4x64x4xf32>
    %67 = vector.shape_cast %66 : vector<4x64x4xf32> to vector<256x4xf32>
    %c2_71 = arith.constant 2 : index
    %c0_72 = arith.constant 0 : index
    %c0_73 = arith.constant 0 : index
    %68 = vector.load %arg4[%c2_71, %c0_72, %c0_73] : memref<9x4x4xf32, #tpu.memory_space<vmem>>, vector<1x4x4xf32>
    %69 = vector.shape_cast %68 : vector<1x4x4xf32> to vector<4x4xf32>
    %cst_74 = arith.constant dense<0.000000e+00> : vector<256x4xf32>
    %70 = tpu.matmul %67, %69, %cst_74 {dimension_numbers = #tpu.dot_dimension_numbers<[1], [0], [0], [1], [0, 0, 1, 1], [], []>} : vector<256x4xf32>, vector<4x4xf32>, vector<256x4xf32> -> vector<256x4xf32>
    %71 = vector.shape_cast %70 : vector<256x4xf32> to vector<4x64x4xf32>
    %72 = arith.addf %53, %71 : vector<4x64x4xf32>
    %c1_75 = arith.constant 1 : index
    %c1_76 = arith.constant 1 : index
    %c0_77 = arith.constant 0 : index
    %c0_78 = arith.constant 0 : index
    %73 = vector.load %arg8[%c1_75, %c1_76, %c0_77, %c0_78] : memref<4x10x10x4xf32, #tpu.memory_space<vmem>>, vector<1x8x8x4xf32>
    %74 = vector.shape_cast %73 : vector<1x8x8x4xf32> to vector<8x8x4xf32>
    %75 = vector.shape_cast %74 : vector<8x8x4xf32> to vector<1x64x4xf32>
    %c0_79 = arith.constant 0 : index
    %c1_80 = arith.constant 1 : index
    %c1_81 = arith.constant 1 : index
    %c0_82 = arith.constant 0 : index
    %76 = vector.load %arg8[%c0_79, %c1_80, %c1_81, %c0_82] : memref<4x10x10x4xf32, #tpu.memory_space<vmem>>, vector<1x8x8x4xf32>
    %77 = vector.shape_cast %76 : vector<1x8x8x4xf32> to vector<8x8x4xf32>
    %78 = vector.shape_cast %77 : vector<8x8x4xf32> to vector<1x64x4xf32>
    %c3_83 = arith.constant 3 : index
    %c1_84 = arith.constant 1 : index
    %c0_85 = arith.constant 0 : index
    %c0_86 = arith.constant 0 : index
    %79 = vector.load %arg8[%c3_83, %c1_84, %c0_85, %c0_86] : memref<4x10x10x4xf32, #tpu.memory_space<vmem>>, vector<1x8x8x4xf32>
    %80 = vector.shape_cast %79 : vector<1x8x8x4xf32> to vector<8x8x4xf32>
    %81 = vector.shape_cast %80 : vector<8x8x4xf32> to vector<1x64x4xf32>
    %c2_87 = arith.constant 2 : index
    %c1_88 = arith.constant 1 : index
    %c1_89 = arith.constant 1 : index
    %c0_90 = arith.constant 0 : index
    %82 = vector.load %arg8[%c2_87, %c1_88, %c1_89, %c0_90] : memref<4x10x10x4xf32, #tpu.memory_space<vmem>>, vector<1x8x8x4xf32>
    %83 = vector.shape_cast %82 : vector<1x8x8x4xf32> to vector<8x8x4xf32>
    %84 = vector.shape_cast %83 : vector<8x8x4xf32> to vector<1x64x4xf32>
    %85 = tpu.concatenate %75, %78, %81, %84 in 0 : vector<1x64x4xf32>, vector<1x64x4xf32>, vector<1x64x4xf32>, vector<1x64x4xf32> -> vector<4x64x4xf32>
    %86 = vector.shape_cast %85 : vector<4x64x4xf32> to vector<256x4xf32>
    %c3_91 = arith.constant 3 : index
    %c0_92 = arith.constant 0 : index
    %c0_93 = arith.constant 0 : index
    %87 = vector.load %arg4[%c3_91, %c0_92, %c0_93] : memref<9x4x4xf32, #tpu.memory_space<vmem>>, vector<1x4x4xf32>
    %88 = vector.shape_cast %87 : vector<1x4x4xf32> to vector<4x4xf32>
    %cst_94 = arith.constant dense<0.000000e+00> : vector<256x4xf32>
    %89 = tpu.matmul %86, %88, %cst_94 {dimension_numbers = #tpu.dot_dimension_numbers<[1], [0], [0], [1], [0, 0, 1, 1], [], []>} : vector<256x4xf32>, vector<4x4xf32>, vector<256x4xf32> -> vector<256x4xf32>
    %90 = vector.shape_cast %89 : vector<256x4xf32> to vector<4x64x4xf32>
    %91 = arith.addf %72, %90 : vector<4x64x4xf32>
    %c0_95 = arith.constant 0 : index
    %c1_96 = arith.constant 1 : index
    %c1_97 = arith.constant 1 : index
    %c0_98 = arith.constant 0 : index
    %92 = vector.load %arg8[%c0_95, %c1_96, %c1_97, %c0_98] : memref<4x10x10x4xf32, #tpu.memory_space<vmem>>, vector<1x8x8x4xf32>
    %93 = vector.shape_cast %92 : vector<1x8x8x4xf32> to vector<8x8x4xf32>
    %94 = vector.shape_cast %93 : vector<8x8x4xf32> to vector<1x64x4xf32>
    %c1_99 = arith.constant 1 : index
    %c1_100 = arith.constant 1 : index
    %c1_101 = arith.constant 1 : index
    %c0_102 = arith.constant 0 : index
    %95 = vector.load %arg8[%c1_99, %c1_100, %c1_101, %c0_102] : memref<4x10x10x4xf32, #tpu.memory_space<vmem>>, vector<1x8x8x4xf32>
    %96 = vector.shape_cast %95 : vector<1x8x8x4xf32> to vector<8x8x4xf32>
    %97 = vector.shape_cast %96 : vector<8x8x4xf32> to vector<1x64x4xf32>
    %c2_103 = arith.constant 2 : index
    %c1_104 = arith.constant 1 : index
    %c1_105 = arith.constant 1 : index
    %c0_106 = arith.constant 0 : index
    %98 = vector.load %arg8[%c2_103, %c1_104, %c1_105, %c0_106] : memref<4x10x10x4xf32, #tpu.memory_space<vmem>>, vector<1x8x8x4xf32>
    %99 = vector.shape_cast %98 : vector<1x8x8x4xf32> to vector<8x8x4xf32>
    %100 = vector.shape_cast %99 : vector<8x8x4xf32> to vector<1x64x4xf32>
    %c3_107 = arith.constant 3 : index
    %c1_108 = arith.constant 1 : index
    %c1_109 = arith.constant 1 : index
    %c0_110 = arith.constant 0 : index
    %101 = vector.load %arg8[%c3_107, %c1_108, %c1_109, %c0_110] : memref<4x10x10x4xf32, #tpu.memory_space<vmem>>, vector<1x8x8x4xf32>
    %102 = vector.shape_cast %101 : vector<1x8x8x4xf32> to vector<8x8x4xf32>
    %103 = vector.shape_cast %102 : vector<8x8x4xf32> to vector<1x64x4xf32>
    %104 = tpu.concatenate %94, %97, %100, %103 in 0 : vector<1x64x4xf32>, vector<1x64x4xf32>, vector<1x64x4xf32>, vector<1x64x4xf32> -> vector<4x64x4xf32>
    %105 = vector.shape_cast %104 : vector<4x64x4xf32> to vector<256x4xf32>
    %c4 = arith.constant 4 : index
    %c0_111 = arith.constant 0 : index
    %c0_112 = arith.constant 0 : index
    %106 = vector.load %arg4[%c4, %c0_111, %c0_112] : memref<9x4x4xf32, #tpu.memory_space<vmem>>, vector<1x4x4xf32>
    %107 = vector.shape_cast %106 : vector<1x4x4xf32> to vector<4x4xf32>
    %cst_113 = arith.constant dense<0.000000e+00> : vector<256x4xf32>
    %108 = tpu.matmul %105, %107, %cst_113 {dimension_numbers = #tpu.dot_dimension_numbers<[1], [0], [0], [1], [0, 0, 1, 1], [], []>} : vector<256x4xf32>, vector<4x4xf32>, vector<256x4xf32> -> vector<256x4xf32>
    %109 = vector.shape_cast %108 : vector<256x4xf32> to vector<4x64x4xf32>
    %110 = arith.addf %91, %109 : vector<4x64x4xf32>
    %c1_114 = arith.constant 1 : index
    %c1_115 = arith.constant 1 : index
    %c1_116 = arith.constant 1 : index
    %c0_117 = arith.constant 0 : index
    %111 = vector.load %arg8[%c1_114, %c1_115, %c1_116, %c0_117] : memref<4x10x10x4xf32, #tpu.memory_space<vmem>>, vector<1x8x8x4xf32>
    %112 = vector.shape_cast %111 : vector<1x8x8x4xf32> to vector<8x8x4xf32>
    %113 = vector.shape_cast %112 : vector<8x8x4xf32> to vector<1x64x4xf32>
    %c0_118 = arith.constant 0 : index
    %c1_119 = arith.constant 1 : index
    %c2_120 = arith.constant 2 : index
    %c0_121 = arith.constant 0 : index
    %114 = vector.load %arg8[%c0_118, %c1_119, %c2_120, %c0_121] : memref<4x10x10x4xf32, #tpu.memory_space<vmem>>, vector<1x8x8x4xf32>
    %115 = vector.shape_cast %114 : vector<1x8x8x4xf32> to vector<8x8x4xf32>
    %116 = vector.shape_cast %115 : vector<8x8x4xf32> to vector<1x64x4xf32>
    %c3_122 = arith.constant 3 : index
    %c1_123 = arith.constant 1 : index
    %c1_124 = arith.constant 1 : index
    %c0_125 = arith.constant 0 : index
    %117 = vector.load %arg8[%c3_122, %c1_123, %c1_124, %c0_125] : memref<4x10x10x4xf32, #tpu.memory_space<vmem>>, vector<1x8x8x4xf32>
    %118 = vector.shape_cast %117 : vector<1x8x8x4xf32> to vector<8x8x4xf32>
    %119 = vector.shape_cast %118 : vector<8x8x4xf32> to vector<1x64x4xf32>
    %c2_126 = arith.constant 2 : index
    %c1_127 = arith.constant 1 : index
    %c2_128 = arith.constant 2 : index
    %c0_129 = arith.constant 0 : index
    %120 = vector.load %arg8[%c2_126, %c1_127, %c2_128, %c0_129] : memref<4x10x10x4xf32, #tpu.memory_space<vmem>>, vector<1x8x8x4xf32>
    %121 = vector.shape_cast %120 : vector<1x8x8x4xf32> to vector<8x8x4xf32>
    %122 = vector.shape_cast %121 : vector<8x8x4xf32> to vector<1x64x4xf32>
    %123 = tpu.concatenate %113, %116, %119, %122 in 0 : vector<1x64x4xf32>, vector<1x64x4xf32>, vector<1x64x4xf32>, vector<1x64x4xf32> -> vector<4x64x4xf32>
    %124 = vector.shape_cast %123 : vector<4x64x4xf32> to vector<256x4xf32>
    %c5 = arith.constant 5 : index
    %c0_130 = arith.constant 0 : index
    %c0_131 = arith.constant 0 : index
    %125 = vector.load %arg4[%c5, %c0_130, %c0_131] : memref<9x4x4xf32, #tpu.memory_space<vmem>>, vector<1x4x4xf32>
    %126 = vector.shape_cast %125 : vector<1x4x4xf32> to vector<4x4xf32>
    %cst_132 = arith.constant dense<0.000000e+00> : vector<256x4xf32>
    %127 = tpu.matmul %124, %126, %cst_132 {dimension_numbers = #tpu.dot_dimension_numbers<[1], [0], [0], [1], [0, 0, 1, 1], [], []>} : vector<256x4xf32>, vector<4x4xf32>, vector<256x4xf32> -> vector<256x4xf32>
    %128 = vector.shape_cast %127 : vector<256x4xf32> to vector<4x64x4xf32>
    %129 = arith.addf %110, %128 : vector<4x64x4xf32>
    %c3_133 = arith.constant 3 : index
    %c1_134 = arith.constant 1 : index
    %c0_135 = arith.constant 0 : index
    %c0_136 = arith.constant 0 : index
    %130 = vector.load %arg8[%c3_133, %c1_134, %c0_135, %c0_136] : memref<4x10x10x4xf32, #tpu.memory_space<vmem>>, vector<1x8x8x4xf32>
    %131 = vector.shape_cast %130 : vector<1x8x8x4xf32> to vector<8x8x4xf32>
    %132 = vector.shape_cast %131 : vector<8x8x4xf32> to vector<1x64x4xf32>
    %c2_137 = arith.constant 2 : index
    %c1_138 = arith.constant 1 : index
    %c1_139 = arith.constant 1 : index
    %c0_140 = arith.constant 0 : index
    %133 = vector.load %arg8[%c2_137, %c1_138, %c1_139, %c0_140] : memref<4x10x10x4xf32, #tpu.memory_space<vmem>>, vector<1x8x8x4xf32>
    %134 = vector.shape_cast %133 : vector<1x8x8x4xf32> to vector<8x8x4xf32>
    %135 = vector.shape_cast %134 : vector<8x8x4xf32> to vector<1x64x4xf32>
    %c1_141 = arith.constant 1 : index
    %c2_142 = arith.constant 2 : index
    %c0_143 = arith.constant 0 : index
    %c0_144 = arith.constant 0 : index
    %136 = vector.load %arg8[%c1_141, %c2_142, %c0_143, %c0_144] : memref<4x10x10x4xf32, #tpu.memory_space<vmem>>, vector<1x8x8x4xf32>
    %137 = vector.shape_cast %136 : vector<1x8x8x4xf32> to vector<8x8x4xf32>
    %138 = vector.shape_cast %137 : vector<8x8x4xf32> to vector<1x64x4xf32>
    %c0_145 = arith.constant 0 : index
    %c2_146 = arith.constant 2 : index
    %c1_147 = arith.constant 1 : index
    %c0_148 = arith.constant 0 : index
    %139 = vector.load %arg8[%c0_145, %c2_146, %c1_147, %c0_148] : memref<4x10x10x4xf32, #tpu.memory_space<vmem>>, vector<1x8x8x4xf32>
    %140 = vector.shape_cast %139 : vector<1x8x8x4xf32> to vector<8x8x4xf32>
    %141 = vector.shape_cast %140 : vector<8x8x4xf32> to vector<1x64x4xf32>
    %142 = tpu.concatenate %132, %135, %138, %141 in 0 : vector<1x64x4xf32>, vector<1x64x4xf32>, vector<1x64x4xf32>, vector<1x64x4xf32> -> vector<4x64x4xf32>
    %143 = vector.shape_cast %142 : vector<4x64x4xf32> to vector<256x4xf32>
    %c6 = arith.constant 6 : index
    %c0_149 = arith.constant 0 : index
    %c0_150 = arith.constant 0 : index
    %144 = vector.load %arg4[%c6, %c0_149, %c0_150] : memref<9x4x4xf32, #tpu.memory_space<vmem>>, vector<1x4x4xf32>
    %145 = vector.shape_cast %144 : vector<1x4x4xf32> to vector<4x4xf32>
    %cst_151 = arith.constant dense<0.000000e+00> : vector<256x4xf32>
    %146 = tpu.matmul %143, %145, %cst_151 {dimension_numbers = #tpu.dot_dimension_numbers<[1], [0], [0], [1], [0, 0, 1, 1], [], []>} : vector<256x4xf32>, vector<4x4xf32>, vector<256x4xf32> -> vector<256x4xf32>
    %147 = vector.shape_cast %146 : vector<256x4xf32> to vector<4x64x4xf32>
    %148 = arith.addf %129, %147 : vector<4x64x4xf32>
    %c2_152 = arith.constant 2 : index
    %c1_153 = arith.constant 1 : index
    %c1_154 = arith.constant 1 : index
    %c0_155 = arith.constant 0 : index
    %149 = vector.load %arg8[%c2_152, %c1_153, %c1_154, %c0_155] : memref<4x10x10x4xf32, #tpu.memory_space<vmem>>, vector<1x8x8x4xf32>
    %150 = vector.shape_cast %149 : vector<1x8x8x4xf32> to vector<8x8x4xf32>
    %151 = vector.shape_cast %150 : vector<8x8x4xf32> to vector<1x64x4xf32>
    %c3_156 = arith.constant 3 : index
    %c1_157 = arith.constant 1 : index
    %c1_158 = arith.constant 1 : index
    %c0_159 = arith.constant 0 : index
    %152 = vector.load %arg8[%c3_156, %c1_157, %c1_158, %c0_159] : memref<4x10x10x4xf32, #tpu.memory_space<vmem>>, vector<1x8x8x4xf32>
    %153 = vector.shape_cast %152 : vector<1x8x8x4xf32> to vector<8x8x4xf32>
    %154 = vector.shape_cast %153 : vector<8x8x4xf32> to vector<1x64x4xf32>
    %c0_160 = arith.constant 0 : index
    %c2_161 = arith.constant 2 : index
    %c1_162 = arith.constant 1 : index
    %c0_163 = arith.constant 0 : index
    %155 = vector.load %arg8[%c0_160, %c2_161, %c1_162, %c0_163] : memref<4x10x10x4xf32, #tpu.memory_space<vmem>>, vector<1x8x8x4xf32>
    %156 = vector.shape_cast %155 : vector<1x8x8x4xf32> to vector<8x8x4xf32>
    %157 = vector.shape_cast %156 : vector<8x8x4xf32> to vector<1x64x4xf32>
    %c1_164 = arith.constant 1 : index
    %c2_165 = arith.constant 2 : index
    %c1_166 = arith.constant 1 : index
    %c0_167 = arith.constant 0 : index
    %158 = vector.load %arg8[%c1_164, %c2_165, %c1_166, %c0_167] : memref<4x10x10x4xf32, #tpu.memory_space<vmem>>, vector<1x8x8x4xf32>
    %159 = vector.shape_cast %158 : vector<1x8x8x4xf32> to vector<8x8x4xf32>
    %160 = vector.shape_cast %159 : vector<8x8x4xf32> to vector<1x64x4xf32>
    %161 = tpu.concatenate %151, %154, %157, %160 in 0 : vector<1x64x4xf32>, vector<1x64x4xf32>, vector<1x64x4xf32>, vector<1x64x4xf32> -> vector<4x64x4xf32>
    %162 = vector.shape_cast %161 : vector<4x64x4xf32> to vector<256x4xf32>
    %c7 = arith.constant 7 : index
    %c0_168 = arith.constant 0 : index
    %c0_169 = arith.constant 0 : index
    %163 = vector.load %arg4[%c7, %c0_168, %c0_169] : memref<9x4x4xf32, #tpu.memory_space<vmem>>, vector<1x4x4xf32>
    %164 = vector.shape_cast %163 : vector<1x4x4xf32> to vector<4x4xf32>
    %cst_170 = arith.constant dense<0.000000e+00> : vector<256x4xf32>
    %165 = tpu.matmul %162, %164, %cst_170 {dimension_numbers = #tpu.dot_dimension_numbers<[1], [0], [0], [1], [0, 0, 1, 1], [], []>} : vector<256x4xf32>, vector<4x4xf32>, vector<256x4xf32> -> vector<256x4xf32>
    %166 = vector.shape_cast %165 : vector<256x4xf32> to vector<4x64x4xf32>
    %167 = arith.addf %148, %166 : vector<4x64x4xf32>
    %c3_171 = arith.constant 3 : index
    %c1_172 = arith.constant 1 : index
    %c1_173 = arith.constant 1 : index
    %c0_174 = arith.constant 0 : index
    %168 = vector.load %arg8[%c3_171, %c1_172, %c1_173, %c0_174] : memref<4x10x10x4xf32, #tpu.memory_space<vmem>>, vector<1x8x8x4xf32>
    %169 = vector.shape_cast %168 : vector<1x8x8x4xf32> to vector<8x8x4xf32>
    %170 = vector.shape_cast %169 : vector<8x8x4xf32> to vector<1x64x4xf32>
    %c2_175 = arith.constant 2 : index
    %c1_176 = arith.constant 1 : index
    %c2_177 = arith.constant 2 : index
    %c0_178 = arith.constant 0 : index
    %171 = vector.load %arg8[%c2_175, %c1_176, %c2_177, %c0_178] : memref<4x10x10x4xf32, #tpu.memory_space<vmem>>, vector<1x8x8x4xf32>
    %172 = vector.shape_cast %171 : vector<1x8x8x4xf32> to vector<8x8x4xf32>
    %173 = vector.shape_cast %172 : vector<8x8x4xf32> to vector<1x64x4xf32>
    %c1_179 = arith.constant 1 : index
    %c2_180 = arith.constant 2 : index
    %c1_181 = arith.constant 1 : index
    %c0_182 = arith.constant 0 : index
    %174 = vector.load %arg8[%c1_179, %c2_180, %c1_181, %c0_182] : memref<4x10x10x4xf32, #tpu.memory_space<vmem>>, vector<1x8x8x4xf32>
    %175 = vector.shape_cast %174 : vector<1x8x8x4xf32> to vector<8x8x4xf32>
    %176 = vector.shape_cast %175 : vector<8x8x4xf32> to vector<1x64x4xf32>
    %c0_183 = arith.constant 0 : index
    %c2_184 = arith.constant 2 : index
    %c2_185 = arith.constant 2 : index
    %c0_186 = arith.constant 0 : index
    %177 = vector.load %arg8[%c0_183, %c2_184, %c2_185, %c0_186] : memref<4x10x10x4xf32, #tpu.memory_space<vmem>>, vector<1x8x8x4xf32>
    %178 = vector.shape_cast %177 : vector<1x8x8x4xf32> to vector<8x8x4xf32>
    %179 = vector.shape_cast %178 : vector<8x8x4xf32> to vector<1x64x4xf32>
    %180 = tpu.concatenate %170, %173, %176, %179 in 0 : vector<1x64x4xf32>, vector<1x64x4xf32>, vector<1x64x4xf32>, vector<1x64x4xf32> -> vector<4x64x4xf32>
    %181 = vector.shape_cast %180 : vector<4x64x4xf32> to vector<256x4xf32>
    %c8 = arith.constant 8 : index
    %c0_187 = arith.constant 0 : index
    %c0_188 = arith.constant 0 : index
    %182 = vector.load %arg4[%c8, %c0_187, %c0_188] : memref<9x4x4xf32, #tpu.memory_space<vmem>>, vector<1x4x4xf32>
    %183 = vector.shape_cast %182 : vector<1x4x4xf32> to vector<4x4xf32>
    %cst_189 = arith.constant dense<0.000000e+00> : vector<256x4xf32>
    %184 = tpu.matmul %181, %183, %cst_189 {dimension_numbers = #tpu.dot_dimension_numbers<[1], [0], [0], [1], [0, 0, 1, 1], [], []>} : vector<256x4xf32>, vector<4x4xf32>, vector<256x4xf32> -> vector<256x4xf32>
    %185 = vector.shape_cast %184 : vector<256x4xf32> to vector<4x64x4xf32>
    %186 = arith.addf %167, %185 : vector<4x64x4xf32>
    %187 = vector.shape_cast %186 : vector<4x64x4xf32> to vector<4x8x8x4xf32>
    %c0_190 = arith.constant 0 : index
    %c0_191 = arith.constant 0 : index
    %c0_192 = arith.constant 0 : index
    %c0_193 = arith.constant 0 : index
    %c0_194 = arith.constant 0 : index
    %188 = vector.load %arg5[%c0_190, %c0_191, %c0_192, %c0_193, %c0_194] : memref<1x4x8x8x4xf32, #tpu.memory_space<vmem>>, vector<1x4x8x8x4xf32>
    %189 = vector.shape_cast %188 : vector<1x4x8x8x4xf32> to vector<4x8x8x4xf32>
    %190 = vector.shape_cast %187 : vector<4x8x8x4xf32> to vector<1x4x8x8x4xf32>
    tpu.vector_store %arg5[%c0_190, %c0_191, %c0_192, %c0_193, %c0_194], %190 {strides = array<i32>} : memref<1x4x8x8x4xf32, #tpu.memory_space<vmem>>, vector<1x4x8x8x4xf32>,
    %cst_195 = arith.constant dense<0.000000e+00> : vector<64x4xf32>
    %191 = vector.multi_reduction <add>, %186, %cst_195 [0] : vector<4x64x4xf32> to vector<64x4xf32>
    %cst_196 = arith.constant dense<0.000000e+00> : vector<4xf32>
    %192 = vector.multi_reduction <add>, %191, %cst_196 [0] : vector<64x4xf32> to vector<4xf32>
    %193 = vector.shape_cast %192 : vector<4xf32> to vector<1x4xf32>
    %194 = arith.mulf %186, %186 : vector<4x64x4xf32>
    %cst_197 = arith.constant dense<0.000000e+00> : vector<64x4xf32>
    %195 = vector.multi_reduction <add>, %194, %cst_197 [0] : vector<4x64x4xf32> to vector<64x4xf32>
    %cst_198 = arith.constant dense<0.000000e+00> : vector<4xf32>
    %196 = vector.multi_reduction <add>, %195, %cst_198 [0] : vector<64x4xf32> to vector<4xf32>
    %197 = vector.shape_cast %196 : vector<4xf32> to vector<1x4xf32>
    %c0_199 = arith.constant 0 : index
    %c0_200 = arith.constant 0 : index
    %c0_201 = arith.constant 0 : index
    %198 = vector.load %arg6[%c0_199, %c0_200, %c0_201] : memref<1x1x4xf32, #tpu.memory_space<vmem>>, vector<1x1x4xf32>
    %199 = vector.shape_cast %198 : vector<1x1x4xf32> to vector<1x4xf32>
    %200 = vector.shape_cast %193 : vector<1x4xf32> to vector<1x1x4xf32>
    tpu.vector_store %arg6[%c0_199, %c0_200, %c0_201], %200 {strides = array<i32>} : memref<1x1x4xf32, #tpu.memory_space<vmem>>, vector<1x1x4xf32>,
    %c0_202 = arith.constant 0 : index
    %c0_203 = arith.constant 0 : index
    %c0_204 = arith.constant 0 : index
    %201 = vector.load %arg7[%c0_202, %c0_203, %c0_204] : memref<1x1x4xf32, #tpu.memory_space<vmem>>, vector<1x1x4xf32>
    %202 = vector.shape_cast %201 : vector<1x1x4xf32> to vector<1x4xf32>
    %203 = vector.shape_cast %197 : vector<1x4xf32> to vector<1x1x4xf32>
    tpu.vector_store %arg7[%c0_202, %c0_203, %c0_204], %203 {strides = array<i32>} : memref<1x1x4xf32, #tpu.memory_space<vmem>>, vector<1x1x4xf32>,
    return
  }
  func.func @transform_0(%arg0: i32) -> (i32, i32, i32, i32, i32) {
    %c0_i32 = arith.constant 0 : i32
    %c0_i32_0 = arith.constant 0 : i32
    %c0_i32_1 = arith.constant 0 : i32
    %c0_i32_2 = arith.constant 0 : i32
    %c0_i32_3 = arith.constant 0 : i32
    return %arg0, %c0_i32, %c0_i32_0, %c0_i32_1, %c0_i32_2 : i32, i32, i32, i32, i32
  }
  func.func @transform_1(%arg0: i32) -> (i32, i32) {
    %c0_i32 = arith.constant 0 : i32
    %c0_i32_0 = arith.constant 0 : i32
    %c0_i32_1 = arith.constant 0 : i32
    return %c0_i32, %c0_i32_0 : i32, i32
  }
  func.func @transform_2(%arg0: i32) -> (i32, i32) {
    %c0_i32 = arith.constant 0 : i32
    %c0_i32_0 = arith.constant 0 : i32
    %c0_i32_1 = arith.constant 0 : i32
    return %c0_i32, %c0_i32_0 : i32, i32
  }
  func.func @transform_3(%arg0: i32) -> (i32, i32, i32) {
    %c0_i32 = arith.constant 0 : i32
    %c0_i32_0 = arith.constant 0 : i32
    %c0_i32_1 = arith.constant 0 : i32
    %c0_i32_2 = arith.constant 0 : i32
    return %c0_i32, %c0_i32_0, %c0_i32_1 : i32, i32, i32
  }
  func.func @transform_4(%arg0: i32) -> (i32, i32, i32, i32, i32) {
    %c0_i32 = arith.constant 0 : i32
    %c0_i32_0 = arith.constant 0 : i32
    %c0_i32_1 = arith.constant 0 : i32
    %c0_i32_2 = arith.constant 0 : i32
    %c0_i32_3 = arith.constant 0 : i32
    return %arg0, %c0_i32, %c0_i32_0, %c0_i32_1, %c0_i32_2 : i32, i32, i32, i32, i32
  }
  func.func @transform_5(%arg0: i32) -> (i32, i32, i32) {
    %c0_i32 = arith.constant 0 : i32
    %c0_i32_0 = arith.constant 0 : i32
    %c0_i32_1 = arith.constant 0 : i32
    return %arg0, %c0_i32, %c0_i32_0 : i32, i32, i32
  }
  func.func @transform_6(%arg0: i32) -> (i32, i32, i32) {
    %c0_i32 = arith.constant 0 : i32
    %c0_i32_0 = arith.constant 0 : i32
    %c0_i32_1 = arith.constant 0 : i32
    return %arg0, %c0_i32, %c0_i32_0 : i32, i32, i32
  }
}

module attributes {stable_mosaic.version = 11 : i64} {
  func.func @_stage3_kernel(%arg0: i32, %arg1: memref<1x4x8x8x4xf32, #tpu.memory_space<vmem>>, %arg2: memref<1x4xf32, #tpu.memory_space<vmem>>, %arg3: memref<1x4xf32, #tpu.memory_space<vmem>>, %arg4: memref<1x4x8x8x4xf32, #tpu.memory_space<vmem>>) attributes {dimension_semantics = [#tpu.dimension_semantics<parallel>], iteration_bounds = array<i64: 2>, scalar_prefetch = 0 : i64, scratch_operands = 0 : i64, tpu.core_type = #tpu.core_type<tc>, window_params = [{transform_indices = @transform_0, window_bounds = array<i64: 1, 4, 8, 8, 4>}, {pipeline_mode = #tpu.pipeline_mode<synchronous>, transform_indices = @transform_1, window_bounds = array<i64: 1, 4>}, {pipeline_mode = #tpu.pipeline_mode<synchronous>, transform_indices = @transform_2, window_bounds = array<i64: 1, 4>}, {transform_indices = @transform_3, window_bounds = array<i64: 1, 4, 8, 8, 4>}]} {
    %c0 = arith.constant 0 : index
    %c0_0 = arith.constant 0 : index
    %0 = vector.load %arg2[%c0, %c0_0] : memref<1x4xf32, #tpu.memory_space<vmem>>, vector<1x4xf32>
    %1 = vector.shape_cast %0 : vector<1x4xf32> to vector<1x1x1x4xf32>
    %c0_1 = arith.constant 0 : index
    %c0_2 = arith.constant 0 : index
    %2 = vector.load %arg3[%c0_1, %c0_2] : memref<1x4xf32, #tpu.memory_space<vmem>>, vector<1x4xf32>
    %3 = vector.shape_cast %2 : vector<1x4xf32> to vector<1x1x1x4xf32>
    %c0_3 = arith.constant 0 : index
    %c0_4 = arith.constant 0 : index
    %c0_5 = arith.constant 0 : index
    %c0_6 = arith.constant 0 : index
    %c0_7 = arith.constant 0 : index
    %4 = vector.load %arg1[%c0_3, %c0_4, %c0_5, %c0_6, %c0_7] : memref<1x4x8x8x4xf32, #tpu.memory_space<vmem>>, vector<1x4x8x8x4xf32>
    %5 = vector.shape_cast %4 : vector<1x4x8x8x4xf32> to vector<4x8x8x4xf32>
    %6 = vector.broadcast %1 : vector<1x1x1x4xf32> to vector<4x8x8x4xf32>
    %7 = arith.mulf %5, %6 : vector<4x8x8x4xf32>
    %8 = vector.broadcast %3 : vector<1x1x1x4xf32> to vector<4x8x8x4xf32>
    %9 = arith.addf %7, %8 : vector<4x8x8x4xf32>
    %cst = arith.constant 0.000000e+00 : f32
    %10 = vector.broadcast %cst : f32 to vector<4x8x8x4xf32>
    %11 = arith.maximumf %9, %10 : vector<4x8x8x4xf32>
    %c0_8 = arith.constant 0 : index
    %c0_9 = arith.constant 0 : index
    %c0_10 = arith.constant 0 : index
    %c0_11 = arith.constant 0 : index
    %c0_12 = arith.constant 0 : index
    %12 = vector.load %arg4[%c0_8, %c0_9, %c0_10, %c0_11, %c0_12] : memref<1x4x8x8x4xf32, #tpu.memory_space<vmem>>, vector<1x4x8x8x4xf32>
    %13 = vector.shape_cast %12 : vector<1x4x8x8x4xf32> to vector<4x8x8x4xf32>
    %14 = vector.shape_cast %11 : vector<4x8x8x4xf32> to vector<1x4x8x8x4xf32>
    tpu.vector_store %arg4[%c0_8, %c0_9, %c0_10, %c0_11, %c0_12], %14 {strides = array<i32>} : memref<1x4x8x8x4xf32, #tpu.memory_space<vmem>>, vector<1x4x8x8x4xf32>,
    return
  }
  func.func @transform_0(%arg0: i32) -> (i32, i32, i32, i32, i32) {
    %c0_i32 = arith.constant 0 : i32
    %c0_i32_0 = arith.constant 0 : i32
    %c0_i32_1 = arith.constant 0 : i32
    %c0_i32_2 = arith.constant 0 : i32
    %c0_i32_3 = arith.constant 0 : i32
    return %arg0, %c0_i32, %c0_i32_0, %c0_i32_1, %c0_i32_2 : i32, i32, i32, i32, i32
  }
  func.func @transform_1(%arg0: i32) -> (i32, i32) {
    %c0_i32 = arith.constant 0 : i32
    %c0_i32_0 = arith.constant 0 : i32
    %c0_i32_1 = arith.constant 0 : i32
    return %c0_i32, %c0_i32_0 : i32, i32
  }
  func.func @transform_2(%arg0: i32) -> (i32, i32) {
    %c0_i32 = arith.constant 0 : i32
    %c0_i32_0 = arith.constant 0 : i32
    %c0_i32_1 = arith.constant 0 : i32
    return %c0_i32, %c0_i32_0 : i32, i32
  }
  func.func @transform_3(%arg0: i32) -> (i32, i32, i32, i32, i32) {
    %c0_i32 = arith.constant 0 : i32
    %c0_i32_0 = arith.constant 0 : i32
    %c0_i32_1 = arith.constant 0 : i32
    %c0_i32_2 = arith.constant 0 : i32
    %c0_i32_3 = arith.constant 0 : i32
    return %arg0, %c0_i32, %c0_i32_0, %c0_i32_1, %c0_i32_2 : i32, i32, i32, i32, i32
  }
}

</mosaic_0001>

<bundles_post_ra>
// kernel: tile.9
= control target key start
LH: loop header
LB: loop body
LE: loop exit
PB: predicated region body
PF: predicated region fallthrough
CT: control target
= control target key end

     0   :  { %vm7_vm0 = vcmask 31744   ;;  %s37_s8 = smov 4   ;;  %s38_s9 = smov 8   ;;  %vm13_vm1 = vcmask 130144   ;;  %vm19_vm2 = vcmask 97344   ;;  %vm25_vm3 = vcmask 64544   ;;  %s55_s0 = inlined_call_operand.vmem [shape: f32[4,4], index: 0, kind: input, shape index: {}]   ;;  %s56_s1 = inlined_call_operand.vmem [shape: f32[1,16], index: 1, kind: output, shape index: {}]  }
   0x1   :  { %v4_v0 = vld [vmem:[%s55_s0] sm:$0xf]  ;;  %s36_s0 = smov 12  }
   0x2   :  { %5 = vst [vmem:[#allocation1] sm:$0xf] %v4_v0 }
   0x9   :  { %v10_v1 = vld [vmem:[#allocation1 + $0x3] sm:$0x1]   ;;  %v22_v2 = vld [vmem:[#allocation1 + $0x1] sm:$0x1]   ;;  %v6_v3 = vld [vmem:[#allocation1] sm:$0x1]  }
   0xa   :  { %11 = vrot.lane.b32.xlu0 %v10_v1, %s36_s0  ;;  %23 = vrot.lane.b32.xlu1 %v22_v2, %s37_s8  ;;  %v16_v4 = vld [vmem:[#allocation1 + $0x2] sm:$0x1]   ;;  %8 = vst.msk [vmem:[#allocation0] sm:$0x1] %vm7_vm0, %v6_v3  }
   0xe   :  { %17 = vrot.lane.b32.xlu0 %v16_v4, %s38_s9 }
  0x7c   :  { %v12_v5 = vpop.permute.xlu0 %11   ;;  %v24_v6 = vpop.permute.xlu1 %23  }
  0x7d   :  { %14 = vst.msk [vmem:[#allocation0] sm:$0x1] %vm13_vm1, %v12_v5  }
  0x80   :  { %v18_v7 = vpop.permute.xlu0 %17  }
  0x81   :  { %20 = vst.msk [vmem:[#allocation0] sm:$0x1] %vm19_vm2, %v18_v7  }
  0x82   :  { %26 = vst.msk [vmem:[#allocation0] sm:$0x1] %vm25_vm3, %v24_v6  }
  0x89   :  { %v30_v8 = vld [vmem:[#allocation0] sm:$0x1] }
  0x8a   :  { %32 = vst [vmem:[%s56_s1] sm:$0x1] %v30_v8 }

// kernel: tile.8
= control target key start
LH: loop header
LB: loop body
LE: loop exit
PB: predicated region body
PF: predicated region fallthrough
CT: control target
= control target key end

     0   :  { %s22_s0 = inlined_call_operand.vmem [shape: f32[4], index: 0, kind: input, shape index: {}]   ;;  %s23_s1 = inlined_call_operand.vmem [shape: f32[4,4], index: 1, kind: output, shape index: {}]  }
   0x1   :  { %v4_v0 = vld [vmem:[%s22_s0] ss:$0 sm:$0xff] }
   0x2   :  { %5 = vst [vmem:[%s23_s1] sm:$0xf] %v4_v0 }

// kernel: decoder_layer_forward.5
= control target key start
LH: loop header
LB: loop body
LE: loop exit
PB: predicated region body
PF: predicated region fallthrough
CT: control target
= control target key end

     0   :  { %s452_s12 = smov 0   ;;  %s643_s0 = inlined_call_operand.vmem [shape: f32[2,4,8,8,4], index: 0, kind: input, shape index: {}]   ;;  %s644_s1 = inlined_call_operand.vmem [shape: f32[1,4], index: 1, kind: input, shape index: {}]   ;;  %s645_s2 = inlined_call_operand.vmem [shape: f32[1,4], index: 2, kind: input, shape index: {}]   ;;  %s646_s3 = inlined_call_operand.vmem [shape: f32[2,4,8,8,4], index: 3, kind: output, shape index: {}]  }
   0x1 LB: > { %s401_s13 = sadd.s32 4294967295, %s430_s12   ;;  %p405_p0 = scmp.ge.s32.totalorder %s430_s12, 1  ;;  %s430_s12 = sphi %s452_s12, %s13_s12  }
   0x2   : > { %p137_p1 = scmp.lt.s32.totalorder %s430_s12, 3 }
   0x4   : > { %p138_p2 = pnand %p405_p0, %p137_p1 }
   0x5   : > { %p161_p3 = scmp.lt.s32.totalorder (!%p138_p2), %s401_s13, 1  ;;  %v463_v0 = vld [vmem:[%s644_s1] ss:$0 sm:$0xff] (!%p138_p2)  ;;  %vm313_vm0 = vcmask (!%p138_p2), 31744  }
   0x6   : > { %141 = sbr.rel (%p138_p2) target bundleno = 46 (0x2e), region = 32  ;;  %v473_v1 = vld [vmem:[%s645_s2] ss:$0 sm:$0xff] (!%p138_p2) }
   0xd   : > { %s648_s13 = smov (!%p161_p3, %s401_s13), 1 }
   0xe   : > { %s414_s14 = sshll.u32 %s648_s13, 8 }
   0xf   : > { %s468_s19 = scalar_lea.vmem %s643_s0, %s414_s14  ;;  %s496_s24 = scalar_lea.vmem %s646_s3, %s414_s14 }
  0x10   : > { %v173_v2 = vld [vmem:[%s468_s19] sm:$0xff]  ;;  %v174_v3 = vld [vmem:[%s468_s19 + $0x8] sm:$0xff]  ;;  %v175_v4 = vld [vmem:[%s468_s19 + $0x10] sm:$0xff] }
  0x11   : > { %v211_v5 = vmul.f32 %v463_v0, %v173_v2  ;;  %v212_v6 = vmul.f32 %v463_v0, %v174_v3  ;;  %v213_v7 = vmul.f32 %v463_v0, %v175_v4  ;;  %v176_v8 = vld [vmem:[%s468_s19 + $0x18] sm:$0xff]  ;;  %v177_v9 = vld [vmem:[%s468_s19 + $0x20] sm:$0xff]  ;;  %v178_v10 = vld [vmem:[%s468_s19 + $0x28] sm:$0xff] }
  0x12   : > { %v214_v11 = vmul.f32 %v463_v0, %v176_v8  ;;  %v215_v12 = vmul.f32 %v463_v0, %v177_v9  ;;  %v216_v13 = vmul.f32 %v463_v0, %v178_v10  ;;  %v179_v14 = vld [vmem:[%s468_s19 + $0x30] sm:$0xff]  ;;  %v180_v15 = vld [vmem:[%s468_s19 + $0x38] sm:$0xff]  ;;  %v181_v24 = vld [vmem:[%s468_s19 + $0x40] sm:$0xff] }
  0x13   : > { %v249_v16 = vadd.f32 %v473_v1, %v211_v5  ;;  %v250_v17 = vadd.f32 %v473_v1, %v212_v6  ;;  %v251_v18 = vadd.f32 %v473_v1, %v213_v7  ;;  %v217_v19 = vmul.f32 %v463_v0, %v179_v14  ;;  %v182_v25 = vld [vmem:[%s468_s19 + $0x48] sm:$0xff]  ;;  %v183_v26 = vld [vmem:[%s468_s19 + $0x50] sm:$0xff]  ;;  %v184_v31 = vld [vmem:[%s468_s19 + $0x58] sm:$0xff] }
  0x14   : > { %v252_v20 = vadd.f32 %v473_v1, %v214_v11  ;;  %v253_v21 = vadd.f32 %v473_v1, %v215_v12  ;;  %v254_v22 = vadd.f32 %v473_v1, %v216_v13  ;;  %v218_v23 = vmul.f32 %v463_v0, %v180_v15  ;;  %v185_v32 = vld [vmem:[%s468_s19 + $0x60] sm:$0xff]  ;;  %v186_v33 = vld [vmem:[%s468_s19 + $0x68] sm:$0xff]  ;;  %v187_v38 = vld [vmem:[%s468_s19 + $0x70] sm:$0xff] }
  0x15   : > { %v281_v27 = vmax.f32 %v249_v16, 0.0  ;;  %v282_v28 = vmax.f32 %v250_v17, 0.0  ;;  %v283_v29 = vmax.f32 %v251_v18, 0.0  ;;  %v255_v30 = vadd.f32 %v473_v1, %v217_v19  ;;  %v188_v43 = vld [vmem:[%s468_s19 + $0x78] sm:$0xff]  ;;  %v189_v56 = vld [vmem:[%s468_s19 + $0x80] sm:$0xff]  ;;  %v190_v57 = vld [vmem:[%s468_s19 + $0x88] sm:$0xff] }
  0x16   : > { %v284_v34 = vmax.f32 %v252_v20, 0.0  ;;  %v285_v35 = vmax.f32 %v253_v21, 0.0  ;;  %v286_v36 = vmax.f32 %v254_v22, 0.0  ;;  %v256_v37 = vadd.f32 %v473_v1, %v218_v23  ;;  %v191_v58 = vld [vmem:[%s468_s19 + $0x90] sm:$0xff]  ;;  %v192_v63 = vld [vmem:[%s468_s19 + $0x98] sm:$0xff]  ;;  %v193_v2 = vld [vmem:[%s468_s19 + $0xa0] sm:$0xff] }
  0x17   : > { %314 = vst.msk [vmem:[%s496_s24] sm:$0xff] %vm313_vm0, %v281_v27  ;;  %315 = vst.msk [vmem:[%s496_s24 + $0x8] sm:$0xff] %vm313_vm0, %v282_v28  ;;  %v287_v39 = vmax.f32 %v255_v30, 0.0  ;;  %v219_v40 = vmul.f32 %v463_v0, %v181_v24  ;;  %v220_v41 = vmul.f32 %v463_v0, %v182_v25  ;;  %v221_v42 = vmul.f32 %v463_v0, %v183_v26  ;;  %v194_v3 = vld [vmem:[%s468_s19 + $0xa8] sm:$0xff]  ;;  %v195_v8 = vld [vmem:[%s468_s19 + $0xb0] sm:$0xff] }
  0x18   : > { %316 = vst.msk [vmem:[%s496_s24 + $0x10] sm:$0xff] %vm313_vm0, %v283_v29  ;;  %317 = vst.msk [vmem:[%s496_s24 + $0x18] sm:$0xff] %vm313_vm0, %v284_v34  ;;  %v288_v44 = vmax.f32 %v256_v37, 0.0  ;;  %v222_v45 = vmul.f32 %v463_v0, %v184_v31  ;;  %v223_v46 = vmul.f32 %v463_v0, %v185_v32  ;;  %v224_v47 = vmul.f32 %v463_v0, %v186_v33  ;;  %v196_v13 = vld [vmem:[%s468_s19 + $0xb8] sm:$0xff]  ;;  %v197_v26 = vld [vmem:[%s468_s19 + $0xc0] sm:$0xff] }
  0x19   : > { %318 = vst.msk [vmem:[%s496_s24 + $0x20] sm:$0xff] %vm313_vm0, %v285_v35  ;;  %319 = vst.msk [vmem:[%s496_s24 + $0x28] sm:$0xff] %vm313_vm0, %v286_v36  ;;  %v257_v48 = vadd.f32 %v473_v1, %v219_v40  ;;  %v258_v49 = vadd.f32 %v473_v1, %v220_v41  ;;  %v259_v50 = vadd.f32 %v473_v1, %v221_v42  ;;  %v198_v27 = vld [vmem:[%s468_s19 + $0xc8] sm:$0xff]  ;;  %v199_v28 = vld [vmem:[%s468_s19 + $0xd0] sm:$0xff] }
  0x1a   : > { %320 = vst.msk [vmem:[%s496_s24 + $0x30] sm:$0xff] %vm313_vm0, %v287_v39  ;;  %v225_v51 = vmul.f32 %v463_v0, %v187_v38  ;;  %321 = vst.msk [vmem:[%s496_s24 + $0x38] sm:$0xff] %vm313_vm0, %v288_v44  ;;  %v260_v52 = vadd.f32 %v473_v1, %v222_v45  ;;  %v261_v53 = vadd.f32 %v473_v1, %v223_v46  ;;  %v200_v33 = vld [vmem:[%s468_s19 + $0xd8] sm:$0xff]  ;;  %v201_v34 = vld [vmem:[%s468_s19 + $0xe0] sm:$0xff] }
  0x1b   : > { %v262_v54 = vadd.f32 %v473_v1, %v224_v47  ;;  %v226_v55 = vmul.f32 %v463_v0, %v188_v43  ;;  %v289_v59 = vmax.f32 %v257_v48, 0.0  ;;  %v290_v60 = vmax.f32 %v258_v49, 0.0  ;;  %v202_v35 = vld [vmem:[%s468_s19 + $0xe8] sm:$0xff]  ;;  %v203_v40 = vld [vmem:[%s468_s19 + $0xf0] sm:$0xff]  ;;  %v204_v45 = vld [vmem:[%s468_s19 + $0xf8] sm:$0xff] }
  0x1c   : > { %v291_v61 = vmax.f32 %v259_v50, 0.0  ;;  %v263_v62 = vadd.f32 %v473_v1, %v225_v51  ;;  %v292_v4 = vmax.f32 %v260_v52, 0.0  ;;  %v293_v5 = vmax.f32 %v261_v53, 0.0 }
  0x1d   : > { %v294_v6 = vmax.f32 %v262_v54, 0.0  ;;  %v264_v7 = vadd.f32 %v473_v1, %v226_v55  ;;  %322 = vst.msk [vmem:[%s496_s24 + $0x40] sm:$0xff] %vm313_vm0, %v289_v59  ;;  %323 = vst.msk [vmem:[%s496_s24 + $0x48] sm:$0xff] %vm313_vm0, %v290_v60  ;;  %v227_v10 = vmul.f32 %v463_v0, %v189_v56  ;;  %v228_v11 = vmul.f32 %v463_v0, %v190_v57 }
  0x1e   : > { %324 = vst.msk [vmem:[%s496_s24 + $0x50] sm:$0xff] %vm313_vm0, %v291_v61  ;;  %v295_v9 = vmax.f32 %v263_v62, 0.0  ;;  %v229_v12 = vmul.f32 %v463_v0, %v191_v58  ;;  %325 = vst.msk [vmem:[%s496_s24 + $0x58] sm:$0xff] %vm313_vm0, %v292_v4  ;;  %v230_v15 = vmul.f32 %v463_v0, %v192_v63  ;;  %v231_v16 = vmul.f32 %v463_v0, %v193_v2 }
  0x1f   : > { %326 = vst.msk [vmem:[%s496_s24 + $0x60] sm:$0xff] %vm313_vm0, %v293_v5  ;;  %327 = vst.msk [vmem:[%s496_s24 + $0x68] sm:$0xff] %vm313_vm0, %v294_v6  ;;  %v296_v14 = vmax.f32 %v264_v7, 0.0  ;;  %v232_v17 = vmul.f32 %v463_v0, %v194_v3  ;;  %v265_v18 = vadd.f32 %v473_v1, %v227_v10  ;;  %v266_v19 = vadd.f32 %v473_v1, %v228_v11 }
  0x20   : > { %328 = vst.msk [vmem:[%s496_s24 + $0x70] sm:$0xff] %vm313_vm0, %v295_v9  ;;  %v267_v20 = vadd.f32 %v473_v1, %v229_v12  ;;  %v233_v21 = vmul.f32 %v463_v0, %v195_v8  ;;  %v268_v22 = vadd.f32 %v473_v1, %v230_v15  ;;  %v269_v23 = vadd.f32 %v473_v1, %v231_v16 }
  0x21   : > { %329 = vst.msk [vmem:[%s496_s24 + $0x78] sm:$0xff] %vm313_vm0, %v296_v14  ;;  %v270_v24 = vadd.f32 %v473_v1, %v232_v17  ;;  %v234_v25 = vmul.f32 %v463_v0, %v196_v13  ;;  %v297_v29 = vmax.f32 %v265_v18, 0.0  ;;  %v298_v30 = vmax.f32 %v266_v19, 0.0 }
  0x22   : > { %v299_v31 = vmax.f32 %v267_v20, 0.0  ;;  %v271_v32 = vadd.f32 %v473_v1, %v233_v21  ;;  %v300_v36 = vmax.f32 %v268_v22, 0.0  ;;  %v301_v37 = vmax.f32 %v269_v23, 0.0 }
  0x23   : > { %v302_v38 = vmax.f32 %v270_v24, 0.0  ;;  %v272_v39 = vadd.f32 %v473_v1, %v234_v25  ;;  %330 = vst.msk [vmem:[%s496_s24 + $0x80] sm:$0xff] %vm313_vm0, %v297_v29  ;;  %331 = vst.msk [vmem:[%s496_s24 + $0x88] sm:$0xff] %vm313_vm0, %v298_v30  ;;  %v235_v42 = vmul.f32 %v463_v0, %v197_v26  ;;  %v236_v43 = vmul.f32 %v463_v0, %v198_v27 }
  0x24   : > { %332 = vst.msk [vmem:[%s496_s24 + $0x90] sm:$0xff] %vm313_vm0, %v299_v31  ;;  %v303_v41 = vmax.f32 %v271_v32, 0.0  ;;  %v237_v44 = vmul.f32 %v463_v0, %v199_v28  ;;  %333 = vst.msk [vmem:[%s496_s24 + $0x98] sm:$0xff] %vm313_vm0, %v300_v36  ;;  %v238_v47 = vmul.f32 %v463_v0, %v200_v33  ;;  %v239_v48 = vmul.f32 %v463_v0, %v201_v34 }
  0x25   : > { %334 = vst.msk [vmem:[%s496_s24 + $0xa0] sm:$0xff] %vm313_vm0, %v301_v37  ;;  %335 = vst.msk [vmem:[%s496_s24 + $0xa8] sm:$0xff] %vm313_vm0, %v302_v38  ;;  %v304_v46 = vmax.f32 %v272_v39, 0.0  ;;  %v240_v49 = vmul.f32 %v463_v0, %v202_v35  ;;  %v273_v50 = vadd.f32 %v473_v1, %v235_v42  ;;  %v274_v51 = vadd.f32 %v473_v1, %v236_v43 }
  0x26   : > { %336 = vst.msk [vmem:[%s496_s24 + $0xb0] sm:$0xff] %vm313_vm0, %v303_v41  ;;  %v275_v52 = vadd.f32 %v473_v1, %v237_v44  ;;  %v241_v53 = vmul.f32 %v463_v0, %v203_v40  ;;  %v276_v54 = vadd.f32 %v473_v1, %v238_v47  ;;  %v277_v55 = vadd.f32 %v473_v1, %v239_v48 }
  0x27   : > { %337 = vst.msk [vmem:[%s496_s24 + $0xb8] sm:$0xff] %vm313_vm0, %v304_v46  ;;  %v278_v56 = vadd.f32 %v473_v1, %v240_v49  ;;  %v242_v57 = vmul.f32 %v463_v0, %v204_v45  ;;  %v305_v58 = vmax.f32 %v273_v50, 0.0  ;;  %v306_v59 = vmax.f32 %v274_v51, 0.0 }
  0x28   : > { %v307_v60 = vmax.f32 %v275_v52, 0.0  ;;  %v279_v61 = vadd.f32 %v473_v1, %v241_v53  ;;  %v308_v62 = vmax.f32 %v276_v54, 0.0  ;;  %v309_v63 = vmax.f32 %v277_v55, 0.0 }
  0x29   : > { %v310_v2 = vmax.f32 %v278_v56, 0.0  ;;  %v280_v3 = vadd.f32 %v473_v1, %v242_v57  ;;  %338 = vst.msk [vmem:[%s496_s24 + $0xc0] sm:$0xff] %vm313_vm0, %v305_v58  ;;  %339 = vst.msk [vmem:[%s496_s24 + $0xc8] sm:$0xff] %vm313_vm0, %v306_v59 }
  0x2a   : > { %340 = vst.msk [vmem:[%s496_s24 + $0xd0] sm:$0xff] %vm313_vm0, %v307_v60  ;;  %v311_v4 = vmax.f32 %v279_v61, 0.0  ;;  %341 = vst.msk [vmem:[%s496_s24 + $0xd8] sm:$0xff] %vm313_vm0, %v308_v62 }
  0x2b   : > { %342 = vst.msk [vmem:[%s496_s24 + $0xe0] sm:$0xff] %vm313_vm0, %v309_v63  ;;  %343 = vst.msk [vmem:[%s496_s24 + $0xe8] sm:$0xff] %vm313_vm0, %v310_v2  ;;  %v312_v0 = vmax.f32 %v280_v3, 0.0 }
  0x2c   : > { %344 = vst.msk [vmem:[%s496_s24 + $0xf0] sm:$0xff] %vm313_vm0, %v311_v4 }
  0x2d   : > { %345 = vst.msk [vmem:[%s496_s24 + $0xf8] sm:$0xff] %vm313_vm0, %v312_v0 }
  0x2e PF: > { %s13_s12 = sadd.s32 1, %s430_s12  }
  0x2f   : > { %p10_p4 = scmp.ge.s32.totalorder %s13_s12, 4  }
  0x31   :  { %12 = sbr.rel (!%p10_p4) target bundleno = 1 (0x1), region = 62 }

// kernel: decoder_layer_forward.4
= control target key start
LH: loop header
LB: loop body
LE: loop exit
PB: predicated region body
PF: predicated region fallthrough
CT: control target
= control target key end

     0   :  { %s5108_s21 = smov 0   ;;  %s6483_s0 = inlined_call_operand.vmem [shape: f32[2,4,8,8,4], index: 0, kind: input, shape index: {}]   ;;  %s6484_s1 = inlined_call_operand.vmem [shape: f32[1,4], index: 1, kind: input, shape index: {}]   ;;  %s6485_s2 = inlined_call_operand.vmem [shape: f32[1,4], index: 2, kind: input, shape index: {}]   ;;  %s6486_s3 = inlined_call_operand.vmem [shape: f32[9,4,4], index: 3, kind: input, shape index: {}]   ;;  %s6487_s4 = inlined_call_operand.vmem [shape: f32[2,4,8,8,4], index: 4, kind: output, shape index: {0}]   ;;  %s6488_s5 = inlined_call_operand.vmem [shape: f32[2,1,4], index: 5, kind: output, shape index: {1}]   ;;  %s6489_s6 = inlined_call_operand.vmem [shape: f32[2,1,4], index: 6, kind: output, shape index: {2}]  }
   0x1 LB: > { %s3729_s22 = sadd.s32 4294967295, %s5070_s21   ;;  %p3733_p0 = scmp.ge.s32.totalorder %s5070_s21, 1  ;;  %s5070_s21 = sphi %s5108_s21, %s17_s21  }
   0x2   : > { %p217_p1 = scmp.lt.s32.totalorder %s5070_s21, 3 }
   0x4   : > { %p218_p2 = pnand %p3733_p0, %p217_p1 }
   0x6   : > { %221 = sbr.rel (%p218_p2) target bundleno = 587 (0x24b), region = 36 }
   0xd   : > { %v561_v0 = vld [vmem:[%s6486_s3] sm:$0xf]  ;;  %vm658_vm0 = vcmask 1043456   ;;  %v5122_v1 = vld [vmem:[%s6486_s3 + $0x10] sm:$0xf]  ;;  %vm269_vm1 = vcmask 31744  }
   0xe   : > { %4346 = vmatprep.subr.msk.mxu1 %vm658_vm0, %v561_v0  ;;  %4546 = vmatprep.subr.msk.mxu0 %vm658_vm0, %v5122_v1  ;;  %p5129_p3 = scmp.lt.s32.totalorder %s3729_s22, 1  ;;  %vm271_vm2 = vcmask 25600   ;;  %v5072_v2 = vmov 0.0   ;;  %v5283_v3 = vld [vmem:[%s6486_s3 + $0x4] sm:$0xf]  ;;  %vm3621_vm3 = vcmask 24576  }
   0xf   : > { %4347 = vmatpush3.msk.msra.mxu1 %vm658_vm0, %v561_v0  ;;  %331 = vst.msk [vmem:[#allocation2 + $0x1e0] sm:$0xff] %vm269_vm1, %v5072_v2  ;;  %273 = vst.msk [vmem:[#allocation2 + $0x10] sm:$0xff] %vm269_vm1, %v5072_v2  ;;  %4547 = vmatpush3.msk.msra.mxu0 %vm658_vm0, %v5122_v1  ;;  %v5288_v4 = vld [vmem:[%s6486_s3 + $0x14] sm:$0xf]  ;;  %v5304_v5 = vld [vmem:[%s6484_s1] ss:$0 sm:$0xff] }
  0x10   : > { %275 = vst.msk [vmem:[#allocation2 + $0x20] sm:$0xff] %vm269_vm1, %v5072_v2  ;;  %277 = vst.msk [vmem:[#allocation2 + $0x30] sm:$0xff] %vm269_vm1, %v5072_v2  ;;  %s6506_s22 = smov (!%p5129_p3, %s3729_s22), 1  ;;  %4396 = vmatprep.subr.msk.mxu1 %vm658_vm0, %v5283_v3  ;;  %4596 = vmatprep.subr.msk.mxu0 %vm658_vm0, %v5288_v4  ;;  %v5316_v6 = vld [vmem:[%s6485_s2] ss:$0 sm:$0xff] }
  0x11   : > { %279 = vst.msk [vmem:[#allocation2 + $0x40] sm:$0xff] %vm269_vm1, %v5072_v2  ;;  %281 = vst.msk [vmem:[#allocation2 + $0x50] sm:$0xff] %vm269_vm1, %v5072_v2  ;;  %s4047_s8 = sshll.u32 %s6506_s22, 8  ;;  %s265_s11 = scalar_lea.vmem %s6488_s5, %s6506_s22 }
  0x12   : > { %283 = vst.msk [vmem:[#allocation2 + $0x60] sm:$0xff] %vm269_vm1, %v5072_v2  ;;  %285 = vst.msk [vmem:[#allocation2 + $0x70] sm:$0xff] %vm269_vm1, %v5072_v2  ;;  %s5311_s13 = scalar_lea.vmem %s6483_s0, %s4047_s8  ;;  %s6214_s9 = scalar_lea.vmem %s6487_s4, %s4047_s8 }
  0x13   : > { %287 = vst.msk [vmem:[#allocation2 + $0x80] sm:$0xff] %vm269_vm1, %v5072_v2  ;;  %289 = vst.msk [vmem:[#allocation2 + $0x90] sm:$0xff] %vm269_vm1, %v5072_v2  ;;  %v377_v7 = vld [vmem:[%s5311_s13 + $0xc0] sm:$0xff]  ;;  %v354_v9 = vld [vmem:[%s5311_s13 + $0x8] sm:$0xff]  ;;  %s268_s14 = scalar_lea.vmem %s6489_s6, %s6506_s22 }
  0x14   : > { %293 = vst.msk [vmem:[#allocation2 + $0xb0] sm:$0xff] %vm269_vm1, %v5072_v2  ;;  %295 = vst.msk [vmem:[#allocation2 + $0xc0] sm:$0xff] %vm269_vm1, %v5072_v2  ;;  %v353_v8 = vld [vmem:[%s5311_s13] sm:$0xff]  ;;  %v415_v10 = vmul.f32 %v5304_v5, %v377_v7  ;;  %v392_v12 = vmul.f32 %v5304_v5, %v354_v9  ;;  %v378_v13 = vld [vmem:[%s5311_s13 + $0xc8] sm:$0xff] }
  0x15   : > { %297 = vst.msk [vmem:[#allocation2 + $0xd0] sm:$0xff] %vm269_vm1, %v5072_v2  ;;  %299 = vst.msk [vmem:[#allocation2 + $0xe0] sm:$0xff] %vm269_vm1, %v5072_v2  ;;  %v391_v11 = vmul.f32 %v5304_v5, %v353_v8  ;;  %v379_v14 = vld [vmem:[%s5311_s13 + $0xd0] sm:$0xff]  ;;  %v416_v17 = vmul.f32 %v5304_v5, %v378_v13  ;;  %v356_v20 = vld [vmem:[%s5311_s13 + $0x18] sm:$0xff] }
  0x16   : > { %301 = vst.msk [vmem:[#allocation2 + $0xf0] sm:$0xff] %vm269_vm1, %v5072_v2  ;;  %303 = vst.msk [vmem:[#allocation2 + $0x100] sm:$0xff] %vm269_vm1, %v5072_v2  ;;  %v355_v15 = vld [vmem:[%s5311_s13 + $0x10] sm:$0xff]  ;;  %v527_v16 = vld [vmem:[#allocation2 + $0x1e0] sm:$0xff]  ;;  %v417_v18 = vmul.f32 %v5304_v5, %v379_v14  ;;  %v453_v22 = vadd.f32 %v5316_v6, %v415_v10  ;;  %v430_v24 = vadd.f32 %v5316_v6, %v392_v12 }
  0x17   : > { %305 = vst.msk [vmem:[#allocation2 + $0x110] sm:$0xff] %vm269_vm1, %v5072_v2  ;;  %307 = vst.msk [vmem:[#allocation2 + $0x120] sm:$0xff] %vm269_vm1, %v5072_v2  ;;  %v393_v19 = vmul.f32 %v5304_v5, %v355_v15  ;;  %v380_v21 = vld [vmem:[%s5311_s13 + $0xd8] sm:$0xff]  ;;  %4348 = vmatprep.mubr.msk.f32.mxu1 %vm269_vm1, %v527_v16  ;;  %v429_v23 = vadd.f32 %v5316_v6, %v391_v11  ;;  %v394_v25 = vmul.f32 %v5304_v5, %v356_v20  ;;  %v381_v30 = vld [vmem:[%s5311_s13 + $0xe0] sm:$0xff] }
  0x18   : > { %309 = vst.msk [vmem:[#allocation2 + $0x130] sm:$0xff] %vm269_vm1, %v5072_v2  ;;  %311 = vst.msk [vmem:[#allocation2 + $0x140] sm:$0xff] %vm269_vm1, %v5072_v2  ;;  %v454_v26 = vadd.f32 %v5316_v6, %v416_v17  ;;  %v455_v27 = vadd.f32 %v5316_v6, %v417_v18  ;;  %v418_v29 = vmul.f32 %v5304_v5, %v380_v21  ;;  %v357_v31 = vld [vmem:[%s5311_s13 + $0x20] sm:$0xff]  ;;  %v358_v32 = vld [vmem:[%s5311_s13 + $0x28] sm:$0xff]  ;;  %v485_v33 = vmax.f32 %v453_v22, 0.0 }
  0x19   : > { %313 = vst.msk [vmem:[#allocation2 + $0x150] sm:$0xff] %vm269_vm1, %v5072_v2  ;;  %315 = vst.msk [vmem:[#allocation2 + $0x160] sm:$0xff] %vm269_vm1, %v5072_v2  ;;  %v431_v28 = vadd.f32 %v5316_v6, %v393_v19  ;;  %v461_v34 = vmax.f32 %v429_v23, 0.0  ;;  %v462_v35 = vmax.f32 %v430_v24, 0.0  ;;  %v432_v36 = vadd.f32 %v5316_v6, %v394_v25  ;;  %v382_v37 = vld [vmem:[%s5311_s13 + $0xe8] sm:$0xff]  ;;  %v383_v38 = vld [vmem:[%s5311_s13 + $0xf0] sm:$0xff] }
  0x1a   : > { %317 = vst.msk [vmem:[#allocation2 + $0x170] sm:$0xff] %vm269_vm1, %v5072_v2  ;;  %319 = vst.msk [vmem:[#allocation2 + $0x180] sm:$0xff] %vm269_vm1, %v5072_v2  ;;  %v359_v39 = vld [vmem:[%s5311_s13 + $0x30] sm:$0xff]  ;;  %v486_v40 = vmax.f32 %v454_v26, 0.0  ;;  %v487_v41 = vmax.f32 %v455_v27, 0.0  ;;  %v456_v43 = vadd.f32 %v5316_v6, %v418_v29  ;;  %v360_v44 = vld [vmem:[%s5311_s13 + $0x38] sm:$0xff]  ;;  %v419_v46 = vmul.f32 %v5304_v5, %v381_v30 }
  0x1b   : > { %321 = vst.msk [vmem:[#allocation2 + $0x190] sm:$0xff] %vm269_vm1, %v5072_v2  ;;  %323 = vst.msk [vmem:[#allocation2 + $0x1a0] sm:$0xff] %vm269_vm1, %v5072_v2  ;;  %v463_v42 = vmax.f32 %v431_v28, 0.0  ;;  %v464_v45 = vmax.f32 %v432_v36, 0.0  ;;  %v395_v47 = vmul.f32 %v5304_v5, %v357_v31  ;;  %v396_v48 = vmul.f32 %v5304_v5, %v358_v32  ;;  %v369_v49 = vld [vmem:[%s5311_s13 + $0x80] sm:$0xff]  ;;  %v362_v63 = vld [vmem:[%s5311_s13 + $0x48] sm:$0xff] }
  0x1c   : > { %325 = vst.msk [vmem:[#allocation2 + $0x1b0] sm:$0xff] %vm269_vm1, %v5072_v2  ;;  %327 = vst.msk [vmem:[#allocation2 + $0x1c0] sm:$0xff] %vm269_vm1, %v5072_v2  ;;  %v488_v50 = vmax.f32 %v456_v43, 0.0  ;;  %v420_v51 = vmul.f32 %v5304_v5, %v382_v37  ;;  %v421_v52 = vmul.f32 %v5304_v5, %v383_v38  ;;  %v397_v53 = vmul.f32 %v5304_v5, %v359_v39  ;;  %v361_v62 = vld [vmem:[%s5311_s13 + $0x40] sm:$0xff]  ;;  %v370_v0 = vld [vmem:[%s5311_s13 + $0x88] sm:$0xff] }
  0x1d   : > { %333 = vst.msk [vmem:[#allocation2 + $0x1f0] sm:$0xff] %vm269_vm1, %v5072_v2  ;;  %335 = vst.msk [vmem:[#allocation2 + $0x200] sm:$0xff] %vm269_vm1, %v5072_v2  ;;  %v457_v54 = vadd.f32 %v5316_v6, %v419_v46  ;;  %v433_v55 = vadd.f32 %v5316_v6, %v395_v47  ;;  %v434_v56 = vadd.f32 %v5316_v6, %v396_v48  ;;  %v371_v10 = vld [vmem:[%s5311_s13 + $0x90] sm:$0xff]  ;;  %v364_v12 = vld [vmem:[%s5311_s13 + $0x58] sm:$0xff] }
  0x1e   : > { %337 = vst.msk [vmem:[#allocation2 + $0x210] sm:$0xff] %vm269_vm1, %v5072_v2  ;;  %339 = vst.msk [vmem:[#allocation2 + $0x220] sm:$0xff] %vm269_vm1, %v5072_v2  ;;  %v398_v57 = vmul.f32 %v5304_v5, %v360_v44  ;;  %v458_v58 = vadd.f32 %v5316_v6, %v420_v51  ;;  %v459_v59 = vadd.f32 %v5316_v6, %v421_v52  ;;  %v363_v11 = vld [vmem:[%s5311_s13 + $0x50] sm:$0xff]  ;;  %v372_v21 = vld [vmem:[%s5311_s13 + $0x98] sm:$0xff] }
  0x1f   : > { %341 = vst.msk [vmem:[#allocation2 + $0x230] sm:$0xff] %vm269_vm1, %v5072_v2  ;;  %343 = vst.msk [vmem:[#allocation2 + $0x240] sm:$0xff] %vm269_vm1, %v5072_v2  ;;  %v435_v60 = vadd.f32 %v5316_v6, %v397_v53  ;;  %v407_v61 = vmul.f32 %v5304_v5, %v369_v49  ;;  %v465_v7 = vmax.f32 %v433_v55, 0.0  ;;  %v466_v8 = vmax.f32 %v434_v56, 0.0  ;;  %v373_v22 = vld [vmem:[%s5311_s13 + $0xa0] sm:$0xff]  ;;  %v366_v37 = vld [vmem:[%s5311_s13 + $0x68] sm:$0xff] }
  0x20   : > { %345 = vst.msk [vmem:[#allocation2 + $0x250] sm:$0xff] %vm269_vm1, %v5072_v2  ;;  %347 = vst.msk [vmem:[#allocation2 + $0x260] sm:$0xff] %vm269_vm1, %v5072_v2  ;;  %v436_v9 = vadd.f32 %v5316_v6, %v398_v57  ;;  %v490_v13 = vmax.f32 %v458_v58, 0.0  ;;  %v491_v14 = vmax.f32 %v459_v59, 0.0  ;;  %v399_v18 = vmul.f32 %v5304_v5, %v361_v62  ;;  %v5392_v23 = vld [vmem:[%s6486_s3 + $0x18] sm:$0xf] }
  0x21   : > { %334 = vst.msk [vmem:[#allocation2 + $0x1f8] sm:$0x3] %vm271_vm2, %v5072_v2  ;;  %274 = vst.msk [vmem:[#allocation2 + $0x18] sm:$0x3] %vm271_vm2, %v5072_v2  ;;  %v467_v15 = vmax.f32 %v435_v60, 0.0  ;;  %v445_v16 = vadd.f32 %v5316_v6, %v407_v61  ;;  %v400_v19 = vmul.f32 %v5304_v5, %v362_v63  ;;  %v408_v20 = vmul.f32 %v5304_v5, %v370_v0  ;;  %v365_v31 = vld [vmem:[%s5311_s13 + $0x60] sm:$0xff] }
  0x22   : > { %276 = vst.msk [vmem:[#allocation2 + $0x28] sm:$0x3] %vm271_vm2, %v5072_v2  ;;  %278 = vst.msk [vmem:[#allocation2 + $0x38] sm:$0x3] %vm271_vm2, %v5072_v2  ;;  %v468_v17 = vmax.f32 %v436_v9, 0.0  ;;  %v409_v28 = vmul.f32 %v5304_v5, %v371_v10  ;;  %v401_v29 = vmul.f32 %v5304_v5, %v363_v11  ;;  %v402_v30 = vmul.f32 %v5304_v5, %v364_v12  ;;  %v375_v43 = vld [vmem:[%s5311_s13 + $0xb0] sm:$0xff] }
  0x23   : > { %280 = vst.msk [vmem:[#allocation2 + $0x48] sm:$0x3] %vm271_vm2, %v5072_v2  ;;  %282 = vst.msk [vmem:[#allocation2 + $0x58] sm:$0x3] %vm271_vm2, %v5072_v2  ;;  %v477_v27 = vmax.f32 %v445_v16, 0.0  ;;  %v446_v36 = vadd.f32 %v5316_v6, %v408_v20  ;;  %v410_v48 = vmul.f32 %v5304_v5, %v372_v21  ;;  %v367_v49 = vld [vmem:[%s5311_s13 + $0x70] sm:$0xff]  ;;  %v411_v52 = vmul.f32 %v5304_v5, %v373_v22 }
  0x24   : > { %284 = vst.msk [vmem:[#allocation2 + $0x68] sm:$0x3] %vm271_vm2, %v5072_v2  ;;  %286 = vst.msk [vmem:[#allocation2 + $0x78] sm:$0x3] %vm271_vm2, %v5072_v2  ;;  %v447_v39 = vadd.f32 %v5316_v6, %v409_v28  ;;  %v5450_v53 = vld [vmem:[%s6486_s3 + $0x8] sm:$0xf]  ;;  %v403_v55 = vmul.f32 %v5304_v5, %v365_v31  ;;  %v404_v56 = vmul.f32 %v5304_v5, %v366_v37 }
  0x25   : > { %288 = vst.msk [vmem:[#allocation2 + $0x88] sm:$0x3] %vm271_vm2, %v5072_v2  ;;  %290 = vst.msk [vmem:[#allocation2 + $0x98] sm:$0x3] %vm271_vm2, %v5072_v2  ;;  %v478_v47 = vmax.f32 %v446_v36, 0.0  ;;  %v368_v58 = vld [vmem:[%s5311_s13 + $0x78] sm:$0xff]  ;;  %v449_v61 = vadd.f32 %v5316_v6, %v411_v52  ;;  %v413_v62 = vmul.f32 %v5304_v5, %v375_v43  ;;  %v405_v63 = vmul.f32 %v5304_v5, %v367_v49 }
  0x26   : > { %294 = vst.msk [vmem:[#allocation2 + $0xb8] sm:$0x3] %vm271_vm2, %v5072_v2  ;;  %296 = vst.msk [vmem:[#allocation2 + $0xc8] sm:$0x3] %vm271_vm2, %v5072_v2  ;;  %v384_v0 = vld [vmem:[%s5311_s13 + $0xf8] sm:$0xff]  ;;  %v441_v9 = vadd.f32 %v5316_v6, %v403_v55  ;;  %v442_v10 = vadd.f32 %v5316_v6, %v404_v56 }
  0x27   : > { %298 = vst.msk [vmem:[#allocation2 + $0xd8] sm:$0x3] %vm271_vm2, %v5072_v2  ;;  %300 = vst.msk [vmem:[#allocation2 + $0xe8] sm:$0x3] %vm271_vm2, %v5072_v2  ;;  %v376_v12 = vld [vmem:[%s5311_s13 + $0xb8] sm:$0xff]  ;;  %v443_v16 = vadd.f32 %v5316_v6, %v405_v63  ;;  %v422_v21 = vmul.f32 %v5304_v5, %v384_v0 }
  0x28   : > { %302 = vst.msk [vmem:[#allocation2 + $0xf8] sm:$0x3] %vm271_vm2, %v5072_v2  ;;  %304 = vst.msk [vmem:[#allocation2 + $0x108] sm:$0x3] %vm271_vm2, %v5072_v2 }
  0x29   : > { %306 = vst.msk [vmem:[#allocation2 + $0x118] sm:$0x3] %vm271_vm2, %v5072_v2  ;;  %308 = vst.msk [vmem:[#allocation2 + $0x128] sm:$0x3] %vm271_vm2, %v5072_v2  ;;  %v475_v28 = vmax.f32 %v443_v16, 0.0 }
  0x2a   : > { %310 = vst.msk [vmem:[#allocation2 + $0x138] sm:$0x3] %vm271_vm2, %v5072_v2  ;;  %312 = vst.msk [vmem:[#allocation2 + $0x148] sm:$0x3] %vm271_vm2, %v5072_v2 }
  0x2b   : > { %314 = vst.msk [vmem:[#allocation2 + $0x158] sm:$0x3] %vm271_vm2, %v5072_v2  ;;  %316 = vst.msk [vmem:[#allocation2 + $0x168] sm:$0x3] %vm271_vm2, %v5072_v2 }
  0x2c   : > { %318 = vst.msk [vmem:[#allocation2 + $0x178] sm:$0x3] %vm271_vm2, %v5072_v2  ;;  %320 = vst.msk [vmem:[#allocation2 + $0x188] sm:$0x3] %vm271_vm2, %v5072_v2 }
  0x2d   : > { %322 = vst.msk [vmem:[#allocation2 + $0x198] sm:$0x3] %vm271_vm2, %v5072_v2  ;;  %324 = vst.msk [vmem:[#allocation2 + $0x1a8] sm:$0x3] %vm271_vm2, %v5072_v2 }
  0x2e   : > { %326 = vst.msk [vmem:[#allocation2 + $0x1b8] sm:$0x3] %vm271_vm2, %v5072_v2  ;;  %328 = vst.msk [vmem:[#allocation2 + $0x1c8] sm:$0x3] %vm271_vm2, %v5072_v2 }
  0x2f   : > { %332 = vst.msk [vmem:[#allocation2 + $0x1e8] sm:$0x3] %vm271_vm2, %v5072_v2  ;;  %336 = vst.msk [vmem:[#allocation2 + $0x208] sm:$0x3] %vm271_vm2, %v5072_v2 }
  0x30   : > { %338 = vst.msk [vmem:[#allocation2 + $0x218] sm:$0x3] %vm271_vm2, %v5072_v2  ;;  %340 = vst.msk [vmem:[#allocation2 + $0x228] sm:$0x3] %vm271_vm2, %v5072_v2 }
  0x31   : > { %342 = vst.msk [vmem:[#allocation2 + $0x238] sm:$0x3] %vm271_vm2, %v5072_v2  ;;  %344 = vst.msk [vmem:[#allocation2 + $0x248] sm:$0x3] %vm271_vm2, %v5072_v2 }
  0x32   : > { %346 = vst.msk [vmem:[#allocation2 + $0x258] sm:$0x3] %vm271_vm2, %v5072_v2  ;;  %348 = vst.msk [vmem:[#allocation2 + $0x268] sm:$0x3] %vm271_vm2, %v5072_v2  ;;  %v489_v2 = vmax.f32 %v457_v54, 0.0  ;;  %v448_v54 = vadd.f32 %v5316_v6, %v410_v48 }
  0x33   : > { %518 = vst.msk [vmem:[#allocation2 + $0x1f1] sm:$0xff] %vm269_vm1, %v485_v33  ;;  %494 = vst.msk [vmem:[#allocation2 + $0x11] sm:$0xff] %vm269_vm1, %v461_v34  ;;  %v437_v34 = vadd.f32 %v5316_v6, %v399_v18  ;;  %v473_v18 = vmax.f32 %v441_v9, 0.0 }
  0x34   : > { %495 = vst.msk [vmem:[#allocation2 + $0x21] sm:$0xff] %vm269_vm1, %v462_v35  ;;  %519 = vst.msk [vmem:[#allocation2 + $0x201] sm:$0xff] %vm269_vm1, %v486_v40  ;;  %v438_v35 = vadd.f32 %v5316_v6, %v400_v19  ;;  %v439_v40 = vadd.f32 %v5316_v6, %v401_v29  ;;  %v474_v19 = vmax.f32 %v442_v10, 0.0 }
  0x35   : > { %520 = vst.msk [vmem:[#allocation2 + $0x211] sm:$0xff] %vm269_vm1, %v487_v41  ;;  %496 = vst.msk [vmem:[#allocation2 + $0x31] sm:$0xff] %vm269_vm1, %v463_v42  ;;  %v440_v41 = vadd.f32 %v5316_v6, %v402_v30  ;;  %v374_v42 = vld [vmem:[%s5311_s13 + $0xa8] sm:$0xff]  ;;  %v414_v30 = vmul.f32 %v5304_v5, %v376_v12 }
  0x36   : > { %497 = vst.msk [vmem:[#allocation2 + $0x41] sm:$0xff] %vm269_vm1, %v464_v45  ;;  %521 = vst.msk [vmem:[#allocation2 + $0x221] sm:$0xff] %vm269_vm1, %v488_v50  ;;  %v469_v45 = vmax.f32 %v437_v34, 0.0  ;;  %v470_v46 = vmax.f32 %v438_v35, 0.0  ;;  %v479_v50 = vmax.f32 %v447_v39, 0.0  ;;  %v471_v51 = vmax.f32 %v439_v40, 0.0 }
  0x37   : > { %522 = vst.msk [vmem:[#allocation2 + $0x231] sm:$0xff] %vm269_vm1, %v489_v2  ;;  %498 = vst.msk [vmem:[#allocation2 + $0x51] sm:$0xff] %vm269_vm1, %v465_v7  ;;  %v412_v57 = vmul.f32 %v5304_v5, %v374_v42  ;;  %v5511_v34 = vld [vmem:[#allocation2 + $0x141] sm:$0xff]  ;;  %v460_v35 = vadd.f32 %v5316_v6, %v422_v21  ;;  %v452_v37 = vadd.f32 %v5316_v6, %v414_v30 }
  0x38   : > { %499 = vst.msk [vmem:[#allocation2 + $0x61] sm:$0xff] %vm269_vm1, %v466_v8  ;;  %523 = vst.msk [vmem:[#allocation2 + $0x241] sm:$0xff] %vm269_vm1, %v490_v13  ;;  %v480_v8 = vmax.f32 %v448_v54, 0.0  ;;  %v5747_v30 = vld [vmem:[#allocation2 + $0x1e1] sm:$0xff] }
  0x39   : > { %524 = vst.msk [vmem:[#allocation2 + $0x251] sm:$0xff] %vm269_vm1, %v491_v14  ;;  %500 = vst.msk [vmem:[#allocation2 + $0x71] sm:$0xff] %vm269_vm1, %v467_v15  ;;  %v450_v11 = vadd.f32 %v5316_v6, %v412_v57  ;;  %v481_v14 = vmax.f32 %v449_v61, 0.0  ;;  %v451_v15 = vadd.f32 %v5316_v6, %v413_v62  ;;  %v492_v39 = vmax.f32 %v460_v35, 0.0 }
  0x3a   : > { %v5394_v24 = vld [vmem:[#allocation2 + $0x1f0] sm:$0xff]  ;;  %501 = vst.msk [vmem:[#allocation2 + $0x81] sm:$0xff] %vm269_vm1, %v468_v17  ;;  %510 = vst.msk [vmem:[#allocation2 + $0x151] sm:$0xff] %vm269_vm1, %v477_v27  ;;  %v406_v17 = vmul.f32 %v5304_v5, %v368_v58  ;;  %v5604_v58 = vld [vmem:[%s6486_s3 + $0x1c] sm:$0xf] }
  0x3b   : > { %v5396_v25 = vld [vmem:[#allocation2 + $0x11] sm:$0xff]  ;;  %v5398_v26 = vld [vmem:[#allocation2 + $0x21] sm:$0xff]  ;;  %4349 = vmatmul.mubr.msk.f32.vlgmr.msra.gmra.mrb[0].mxu1 %vm269_vm1, %v5394_v24  ;;  %502 = vst.msk [vmem:[#allocation2 + $0xb1] sm:$0xff] %vm269_vm1, %v469_v45  ;;  %503 = vst.msk [vmem:[#allocation2 + $0xc1] sm:$0xff] %vm269_vm1, %v470_v46  ;;  %v482_v20 = vmax.f32 %v450_v11, 0.0  ;;  %v483_v27 = vmax.f32 %v451_v15, 0.0 }
  0x3c   : > { %4548 = vmatprep.mubr.msk.f32.mxu0 %vm269_vm1, %v5396_v25  ;;  %v5411_v32 = vld [vmem:[#allocation2 + $0x200] sm:$0xff]  ;;  %v5413_v33 = vld [vmem:[#allocation2 + $0x31] sm:$0xff]  ;;  %4397 = vmatpush3.msk.msra.mxu1 %vm658_vm0, %v5283_v3  ;;  %511 = vst.msk [vmem:[#allocation2 + $0x161] sm:$0xff] %vm269_vm1, %v478_v47  ;;  %512 = vst.msk [vmem:[#allocation2 + $0x171] sm:$0xff] %vm269_vm1, %v479_v50  ;;  %v444_v29 = vadd.f32 %v5316_v6, %v406_v17 }
  0x3d   : > { %4549 = vmatmul.mubr.msk.f32.vlgmr.msra.gmra.mrb[0].mxu0 %vm269_vm1, %v5398_v26  ;;  %v5424_v38 = vld [vmem:[#allocation2 + $0x210] sm:$0xff]  ;;  %4351 = vmatprep.mubr.msk.f32.mxu1 %vm269_vm1, %v5411_v32  ;;  %v5436_v3 = vld [vmem:[#allocation2 + $0x41] sm:$0xff]  ;;  %504 = vst.msk [vmem:[#allocation2 + $0xd1] sm:$0xff] %vm269_vm1, %v471_v51  ;;  %513 = vst.msk [vmem:[#allocation2 + $0x181] sm:$0xff] %vm269_vm1, %v480_v8 }
  0x3e   : > { %4597 = vmatpush3.msk.msra.mxu0 %vm658_vm0, %v5288_v4  ;;  %v5438_v44 = vld [vmem:[#allocation2 + $0x220] sm:$0xff]  ;;  %4551 = vmatprep.mubr.msk.f32.mxu0 %vm269_vm1, %v5413_v33  ;;  %v472_v4 = vmax.f32 %v440_v41, 0.0  ;;  %v5466_v59 = vld [vmem:[#allocation2 + $0x230] sm:$0xff]  ;;  %514 = vst.msk [vmem:[#allocation2 + $0x191] sm:$0xff] %vm269_vm1, %v481_v14  ;;  %506 = vst.msk [vmem:[#allocation2 + $0xf1] sm:$0xff] %vm269_vm1, %v473_v18  ;;  %v476_v5 = vmax.f32 %v444_v29, 0.0 }
  0x3f   : > { %4646 = vmatprep.subr.msk.mxu0 %vm658_vm0, %v5392_v23  ;;  %4352 = vmatmul.mubr.msk.f32.gmra.mrb[2].mxu1 %vm269_vm1, %v5424_v38  ;;  %v5468_v60 = vld [vmem:[#allocation2 + $0x51] sm:$0xff]  ;;  %v5479_v2 = vld [vmem:[#allocation2 + $0x61] sm:$0xff]  ;;  %507 = vst.msk [vmem:[#allocation2 + $0x101] sm:$0xff] %vm269_vm1, %v474_v19  ;;  %515 = vst.msk [vmem:[#allocation2 + $0x1a1] sm:$0xff] %vm269_vm1, %v482_v20  ;;  %v484_v41 = vmax.f32 %v452_v37, 0.0 }
  0x40   : > { %4354 = vmatprep.mubr.msk.f32.mxu1 %vm269_vm1, %v5438_v44  ;;  %505 = vst.msk [vmem:[#allocation2 + $0xe1] sm:$0xff] %vm269_vm1, %v472_v4  ;;  %v5481_v7 = vld [vmem:[#allocation2 + $0x240] sm:$0xff]  ;;  %4446 = vmatprep.subr.msk.mxu1 %vm658_vm0, %v5450_v53  ;;  %v5489_v13 = vld [vmem:[#allocation2 + $0x71] sm:$0xff]  ;;  %516 = vst.msk [vmem:[#allocation2 + $0x1b1] sm:$0xff] %vm269_vm1, %v483_v27 }
  0x41   : > { %4552 = vmatmul.mubr.msk.f32.gmra.mrb[2].mxu0 %vm269_vm1, %v5436_v3  ;;  %v5502_v22 = vld [vmem:[#allocation2 + $0x250] sm:$0xff]  ;;  %v5509_v31 = vld [vmem:[#allocation2 + $0x81] sm:$0xff]  ;;  %508 = vst.msk [vmem:[#allocation2 + $0x111] sm:$0xff] %vm269_vm1, %v475_v28  ;;  %509 = vst.msk [vmem:[#allocation2 + $0x121] sm:$0xff] %vm269_vm1, %v476_v5 }
  0x42   : > { %4554 = vmatprep.mubr.msk.f32.mxu0 %vm269_vm1, %v5468_v60  ;;  %v5517_v36 = vld [vmem:[#allocation2 + $0xb1] sm:$0xff]  ;;  %v5533_v42 = vld [vmem:[#allocation2 + $0xc1] sm:$0xff]  ;;  %525 = vst.msk [vmem:[#allocation2 + $0x261] sm:$0xff] %vm269_vm1, %v492_v39  ;;  %517 = vst.msk [vmem:[#allocation2 + $0x1c1] sm:$0xff] %vm269_vm1, %v484_v41 }
  0x43   : > { %4355 = vmatmul.mubr.msk.f32.gmra.mrb[4].mxu1 %vm269_vm1, %v5466_v59  ;;  %v5528_v40 = vld [vmem:[#allocation2 + $0x151] sm:$0xff]  ;;  %v5535_v6 = vld [vmem:[#allocation2 + $0x161] sm:$0xff]  ;;  %v5709_v20 = vld [vmem:[%s6486_s3 + $0xc] sm:$0xf] }
  0x44   : > { %4357 = vmatprep.mubr.msk.f32.mxu1 %vm269_vm1, %v5481_v7  ;;  %v5538_v43 = vld [vmem:[#allocation2 + $0xd1] sm:$0xff]  ;;  %v5553_v47 = vld [vmem:[#allocation2 + $0x181] sm:$0xff] }
  0x45   : > { %4555 = vmatmul.mubr.msk.f32.gmra.mrb[4].mxu0 %vm269_vm1, %v5479_v2  ;;  %v5547_v45 = vld [vmem:[#allocation2 + $0x171] sm:$0xff]  ;;  %v5593_v56 = vld [vmem:[#allocation2 + $0xc0] sm:$0xff] }
  0x46   : > { %4557 = vmatprep.mubr.msk.f32.mxu0 %vm269_vm1, %v5489_v13  ;;  %v5555_v48 = vld [vmem:[#allocation2 + $0xf1] sm:$0xff]  ;;  %v5567_v50 = vld [vmem:[#allocation2 + $0x101] sm:$0xff] }
  0x47   : > { %4358 = vmatmul.mubr.msk.f32.gmra.mrb[6].mxu1 %vm269_vm1, %v5502_v22  ;;  %v5551_v46 = vld [vmem:[#allocation2 + $0xe1] sm:$0xff]  ;;  %v5563_v49 = vld [vmem:[#allocation2 + $0x191] sm:$0xff] }
  0x48   : > { %4360 = vmatprep.mubr.msk.f32.mxu1 %vm269_vm1, %v5511_v34  ;;  %v5569_v51 = vld [vmem:[#allocation2 + $0x1a1] sm:$0xff]  ;;  %v5571_v4 = vld [vmem:[#allocation2 + $0x111] sm:$0xff] }
  0x49   : > { %4558 = vmatmul.mubr.msk.f32.gmra.mrb[6].mxu0 %vm269_vm1, %v5509_v31  ;;  %v5579_v52 = vld [vmem:[#allocation2 + $0x1b1] sm:$0xff]  ;;  %v5583_v54 = vld [vmem:[#allocation2 + $0x121] sm:$0xff] }
  0x4a   : > { %4560 = vmatprep.mubr.msk.f32.mxu0 %vm269_vm1, %v5517_v36  ;;  %v5585_v55 = vld [vmem:[#allocation2 + $0xb0] sm:$0xff]  ;;  %v5610_v61 = vld [vmem:[#allocation2 + $0xe0] sm:$0xff] }
  0x4b   : > { %4361 = vmatmul.mubr.msk.f32.gmra.mrb[8].mxu1 %vm269_vm1, %v5528_v40  ;;  %6497 = vst [vmem:[#allocation3_spill] sm:$0xff] %v5585_v55  ;;  %v5597_v57 = vld [vmem:[#allocation2 + $0xd0] sm:$0xff]  ;;  %v5626_v63 = vld [vmem:[#allocation2 + $0x100] sm:$0xff] }
  0x4c   : > { %4363 = vmatprep.mubr.msk.f32.mxu1 %vm269_vm1, %v5535_v6  ;;  %v5616_v62 = vld [vmem:[#allocation2 + $0xf0] sm:$0xff]  ;;  %v5638_v0 = vld [vmem:[#allocation2 + $0x120] sm:$0xff] }
  0x4d   : > { %4561 = vmatmul.mubr.msk.f32.gmra.mrb[8].mxu0 %vm269_vm1, %v5533_v42  ;;  %v5642_v8 = vld [vmem:[#allocation2 + $0x12] sm:$0xff]  ;;  %v5652_v9 = vld [vmem:[#allocation2 + $0x22] sm:$0xff] }
  0x4e   : > { %4563 = vmatprep.mubr.msk.f32.mxu0 %vm269_vm1, %v5538_v43  ;;  %v5654_v10 = vld [vmem:[#allocation2 + $0x32] sm:$0xff]  ;;  %v5664_v11 = vld [vmem:[#allocation2 + $0x42] sm:$0xff] }
  0x4f   : > { %4364 = vmatmul.mubr.msk.f32.gmra.mrb[10].mxu1 %vm269_vm1, %v5547_v45  ;;  %v5666_v12 = vld [vmem:[#allocation2 + $0x52] sm:$0xff]  ;;  %v5676_v14 = vld [vmem:[#allocation2 + $0x62] sm:$0xff] }
  0x50   : > { %4366 = vmatprep.mubr.msk.f32.mxu1 %vm269_vm1, %v5553_v47  ;;  %v5678_v15 = vld [vmem:[#allocation2 + $0x72] sm:$0xff]  ;;  %v5688_v16 = vld [vmem:[#allocation2 + $0x82] sm:$0xff] }
  0x51   : > { %4564 = vmatmul.mubr.msk.f32.gmra.mrb[10].mxu0 %vm269_vm1, %v5551_v46  ;;  %6498 = vst [vmem:[#allocation4_spill] sm:$0xff] %v5688_v16  ;;  %v5690_v17 = vld [vmem:[#allocation2 + $0x1f1] sm:$0xff]  ;;  %v5700_v18 = vld [vmem:[#allocation2 + $0x201] sm:$0xff] }
  0x52   : > { %4566 = vmatprep.mubr.msk.f32.mxu0 %vm269_vm1, %v5555_v48  ;;  %v5702_v19 = vld [vmem:[#allocation2 + $0x211] sm:$0xff]  ;;  %v5719_v21 = vld [vmem:[#allocation2 + $0x221] sm:$0xff] }
  0x53   : > { %4367 = vmatmul.mubr.msk.f32.gmra.mrb[12].mxu1 %vm269_vm1, %v5563_v49  ;;  %v5721_v27 = vld [vmem:[#allocation2 + $0x231] sm:$0xff]  ;;  %v5745_v29 = vld [vmem:[#allocation2 + $0x261] sm:$0xff] }
  0x54   : > { %4369 = vmatprep.mubr.msk.f32.mxu1 %vm269_vm1, %v5569_v51  ;;  %v5735_v28 = vld [vmem:[#allocation2 + $0x251] sm:$0xff]  ;;  %6499 = vst [vmem:[#allocation5_spill] sm:$0xff] %v5745_v29  ;;  %v5759_v35 = vld [vmem:[#allocation2 + $0x162] sm:$0xff] }
  0x55   : > { %4567 = vmatmul.mubr.msk.f32.gmra.mrb[12].mxu0 %vm269_vm1, %v5567_v50  ;;  %v5761_v5 = vld [vmem:[#allocation2 + $0x172] sm:$0xff]  ;;  %v5771_v37 = vld [vmem:[#allocation2 + $0x182] sm:$0xff] }
  0x56   : > { %4569 = vmatprep.mubr.msk.f32.mxu0 %vm269_vm1, %v5571_v4  ;;  %v5773_v39 = vld [vmem:[#allocation2 + $0x192] sm:$0xff]  ;;  %v5783_v41 = vld [vmem:[#allocation2 + $0x1a2] sm:$0xff] }
  0x57   : > { %4370 = vmatmul.mubr.msk.f32.gmra.mrb[14].mxu1 %vm269_vm1, %v5579_v52 }
  0x58   : > { %4372 = vmatprep.mubr.msk.f32.mxu1 %vm269_vm1, %v5585_v55  ;;  %v5785_v55 = vld [vmem:[#allocation2 + $0x1b2] sm:$0xff] }
  0x59   : > { %4570 = vmatmul.mubr.msk.f32.gmra.mrb[14].mxu0 %vm269_vm1, %v5583_v54 }
  0x5a   : > { %4598 = vmatprep.mubr.msk.f32.mxu0 %vm269_vm1, %v5517_v36 }
  0x5b   : > { %4373 = vmatmul.mubr.msk.f32.gmra.mrb[16].mxu1 %vm269_vm1, %v5593_v56 }
  0x5c   : > { %4375 = vmatprep.mubr.msk.f32.mxu1 %vm269_vm1, %v5597_v57 }
  0x5d   : > { %4599 = vmatmul.mubr.msk.f32.vlgmr.msra.gmra.mrb[0].mxu0 %vm269_vm1, %v5533_v42 }
  0x5e   : > { %4647 = vmatpush3.msk.msra.mxu0 %vm658_vm0, %v5392_v23  ;;  %4601 = vmatprep.mubr.msk.f32.mxu0 %vm269_vm1, %v5538_v43  ;;  %v5630_v23 = vld [vmem:[#allocation2 + $0x110] sm:$0xff] }
  0x5f   : > { %4696 = vmatprep.subr.msk.mxu0 %vm658_vm0, %v5604_v58  ;;  %4376 = vmatmul.mubr.msk.f32.gmra.mrb[18].mxu1 %vm269_vm1, %v5610_v61 }
  0x60   : > { %4378 = vmatprep.mubr.msk.f32.mxu1 %vm269_vm1, %v5616_v62 }
  0x61   : > { %4602 = vmatmul.mubr.msk.f32.gmra.mrb[2].mxu0 %vm269_vm1, %v5551_v46 }
  0x62   : > { %4604 = vmatprep.mubr.msk.f32.mxu0 %vm269_vm1, %v5555_v48 }
  0x63   : > { %4379 = vmatmul.mubr.msk.f32.gmra.mrb[20].mxu1 %vm269_vm1, %v5626_v63 }
  0x64   : > { %4381 = vmatprep.mubr.msk.f32.mxu1 %vm269_vm1, %v5630_v23 }
  0x65   : > { %4605 = vmatmul.mubr.msk.f32.gmra.mrb[4].mxu0 %vm269_vm1, %v5567_v50 }
  0x66   : > { %4607 = vmatprep.mubr.msk.f32.mxu0 %vm269_vm1, %v5571_v4 }
  0x67   : > { %4382 = vmatmul.mubr.msk.f32.gmra.mrb[22].mxu1 %vm269_vm1, %v5638_v0 }
  0x68   : > { %4384 = vmatprep.mubr.msk.f32.mxu1 %vm269_vm1, %v5396_v25 }
  0x69   : > { %4608 = vmatmul.mubr.msk.f32.gmra.mrb[6].mxu0 %vm269_vm1, %v5583_v54 }
  0x6a   : > { %4610 = vmatprep.mubr.msk.f32.mxu0 %vm269_vm1, %v5642_v8 }
  0x6b   : > { %4385 = vmatmul.mubr.msk.f32.gmra.mrb[24].mxu1 %vm269_vm1, %v5398_v26 }
  0x6c   : > { %4387 = vmatprep.mubr.msk.f32.mxu1 %vm269_vm1, %v5413_v33 }
  0x6d   : > { %4611 = vmatmul.mubr.msk.f32.gmra.mrb[8].mxu0 %vm269_vm1, %v5652_v9 }
  0x6e   : > { %4613 = vmatprep.mubr.msk.f32.mxu0 %vm269_vm1, %v5654_v10 }
  0x6f   : > { %4388 = vmatmul.mubr.msk.f32.gmra.mrb[26].mxu1 %vm269_vm1, %v5436_v3 }
  0x70   : > { %4390 = vmatprep.mubr.msk.f32.mxu1 %vm269_vm1, %v5468_v60 }
  0x71   : > { %4614 = vmatmul.mubr.msk.f32.gmra.mrb[10].mxu0 %vm269_vm1, %v5664_v11 }
  0x72   : > { %4616 = vmatprep.mubr.msk.f32.mxu0 %vm269_vm1, %v5666_v12 }
  0x73   : > { %4391 = vmatmul.mubr.msk.f32.gmra.mrb[28].mxu1 %vm269_vm1, %v5479_v2 }
  0x74   : > { %4393 = vmatprep.mubr.msk.f32.mxu1 %vm269_vm1, %v5489_v13 }
  0x75   : > { %4617 = vmatmul.mubr.msk.f32.gmra.mrb[12].mxu0 %vm269_vm1, %v5676_v14 }
  0x76   : > { %4619 = vmatprep.mubr.msk.f32.mxu0 %vm269_vm1, %v5678_v15 }
  0x77   : > { %4394 = vmatmul.mubr.msk.f32.gmra.mrb[30].mxu1 %vm269_vm1, %v5509_v31 }
  0x78   : > { %4398 = vmatprep.mubr.msk.f32.mxu1 %vm269_vm1, %v5511_v34  ;;  %v5749_v34 = vld [vmem:[#allocation2 + $0x152] sm:$0xff] }
  0x79   : > { %4620 = vmatmul.mubr.msk.f32.gmra.mrb[14].mxu0 %vm269_vm1, %v5688_v16  ;;  %v5810_v16 = vld [vmem:[%s6486_s3 + $0x20] sm:$0xf] }
  0x7a   : > { %4622 = vmatprep.mubr.msk.f32.mxu0 %vm269_vm1, %v5690_v17 }
  0x7b   : > { %4399 = vmatmul.mubr.msk.f32.vlgmr.msra.gmra.mrb[0].mxu1 %vm269_vm1, %v5528_v40 }
  0x7c   : > { %4447 = vmatpush3.msk.msra.mxu1 %vm658_vm0, %v5450_v53  ;;  %4401 = vmatprep.mubr.msk.f32.mxu1 %vm269_vm1, %v5535_v6  ;;  %v5733_v53 = vld [vmem:[#allocation2 + $0x241] sm:$0xff] }
  0x7d   : > { %4623 = vmatmul.mubr.msk.f32.gmra.mrb[16].mxu0 %vm269_vm1, %v5700_v18  ;;  %4496 = vmatprep.subr.msk.mxu1 %vm658_vm0, %v5709_v20 }
  0x7e   : > { %4625 = vmatprep.mubr.msk.f32.mxu0 %vm269_vm1, %v5702_v19 }
  0x7f   : > { %4402 = vmatmul.mubr.msk.f32.gmra.mrb[2].mxu1 %vm269_vm1, %v5547_v45 }
  0x80   : > { %4404 = vmatprep.mubr.msk.f32.mxu1 %vm269_vm1, %v5553_v47 }
  0x81   : > { %4626 = vmatmul.mubr.msk.f32.gmra.mrb[18].mxu0 %vm269_vm1, %v5719_v21 }
  0x82   : > { %4628 = vmatprep.mubr.msk.f32.mxu0 %vm269_vm1, %v5721_v27 }
  0x83   : > { %4405 = vmatmul.mubr.msk.f32.gmra.mrb[4].mxu1 %vm269_vm1, %v5563_v49 }
  0x84   : > { %4407 = vmatprep.mubr.msk.f32.mxu1 %vm269_vm1, %v5569_v51 }
  0x85   : > { %4629 = vmatmul.mubr.msk.f32.gmra.mrb[20].mxu0 %vm269_vm1, %v5733_v53 }
  0x86   : > { %4631 = vmatprep.mubr.msk.f32.mxu0 %vm269_vm1, %v5735_v28 }
  0x87   : > { %4408 = vmatmul.mubr.msk.f32.gmra.mrb[6].mxu1 %vm269_vm1, %v5579_v52 }
  0x88   : > { %4410 = vmatprep.mubr.msk.f32.mxu1 %vm269_vm1, %v5747_v30 }
  0x89   : > { %4632 = vmatmul.mubr.msk.f32.gmra.mrb[22].mxu0 %vm269_vm1, %v5745_v29  ;;  %v5795_v29 = vld [vmem:[#allocation2 + $0x1c2] sm:$0xff] }
  0x8a   : > { %4634 = vmatprep.mubr.msk.f32.mxu0 %vm269_vm1, %v5749_v34  ;;  %6500 = vst [vmem:[#allocation6_spill] sm:$0xff] %v5795_v29 }
  0x8b   : > { %4411 = vmatmul.mubr.msk.f32.gmra.mrb[8].mxu1 %vm269_vm1, %v5690_v17 }
  0x8c   : > { %4413 = vmatprep.mubr.msk.f32.mxu1 %vm269_vm1, %v5700_v18 }
  0x8d   : > { %4635 = vmatmul.mubr.msk.f32.gmra.mrb[24].mxu0 %vm269_vm1, %v5759_v35 }
  0x8e   : > { %4637 = vmatprep.mubr.msk.f32.mxu0 %vm269_vm1, %v5761_v5 }
  0x8f   : > { %4414 = vmatmul.mubr.msk.f32.gmra.mrb[10].mxu1 %vm269_vm1, %v5702_v19 }
  0x90   : > { %4416 = vmatprep.mubr.msk.f32.mxu1 %vm269_vm1, %v5719_v21 }
  0x91   : > { %4638 = vmatmul.mubr.msk.f32.gmra.mrb[26].mxu0 %vm269_vm1, %v5771_v37 }
  0x92   : > { %4640 = vmatprep.mubr.msk.f32.mxu0 %vm269_vm1, %v5773_v39 }
  0x93   : > { %4417 = vmatmul.mubr.msk.f32.gmra.mrb[12].mxu1 %vm269_vm1, %v5721_v27 }
  0x94   : > { %4419 = vmatprep.mubr.msk.f32.mxu1 %vm269_vm1, %v5733_v53 }
  0x95   : > { %4641 = vmatmul.mubr.msk.f32.gmra.mrb[28].mxu0 %vm269_vm1, %v5783_v41 }
  0x96   : > { %4643 = vmatprep.mubr.msk.f32.mxu0 %vm269_vm1, %v5785_v55 }
  0x97   : > { %4420 = vmatmul.mubr.msk.f32.gmra.mrb[14].mxu1 %vm269_vm1, %v5735_v28 }
  0x98   : > { %4422 = vmatprep.mubr.msk.f32.mxu1 %vm269_vm1, %v5396_v25 }
  0x99   : > { %4644 = vmatmul.mubr.msk.f32.gmra.mrb[30].mxu0 %vm269_vm1, %v5795_v29  ;;  %v5872_v29 = vld [vmem:[#allocation2 + $0x1c1] sm:$0xff] }
  0x9a   : > { %4648 = vmatprep.mubr.msk.f32.mxu0 %vm269_vm1, %v5394_v24 }
  0x9b   : > { %4423 = vmatmul.mubr.msk.f32.gmra.mrb[16].mxu1 %vm269_vm1, %v5398_v26 }
  0x9c   : > { %4425 = vmatprep.mubr.msk.f32.mxu1 %vm269_vm1, %v5413_v33 }
  0x9d   : > { %4649 = vmatmul.mubr.msk.f32.vlgmr.msra.gmra.mrb[0].mxu0 %vm269_vm1, %v5411_v32 }
  0x9e   : > { %4697 = vmatpush3.msk.msra.mxu0 %vm658_vm0, %v5604_v58  ;;  %4651 = vmatprep.mubr.msk.f32.mxu0 %vm269_vm1, %v5424_v38  ;;  %v5838_v58 = vld [vmem:[#allocation2 + $0x260] sm:$0xff] }
  0x9f   : > { %4746 = vmatprep.subr.msk.mxu0 %vm658_vm0, %v5810_v16  ;;  %4426 = vmatmul.mubr.msk.f32.gmra.mrb[18].mxu1 %vm269_vm1, %v5436_v3 }
  0xa0   : > { %4428 = vmatprep.mubr.msk.f32.mxu1 %vm269_vm1, %v5468_v60 }
  0xa1   : > { %4652 = vmatmul.mubr.msk.f32.gmra.mrb[2].mxu0 %vm269_vm1, %v5438_v44 }
  0xa2   : > { %4654 = vmatprep.mubr.msk.f32.mxu0 %vm269_vm1, %v5466_v59 }
  0xa3   : > { %4429 = vmatmul.mubr.msk.f32.gmra.mrb[20].mxu1 %vm269_vm1, %v5479_v2 }
  0xa4   : > { %4431 = vmatprep.mubr.msk.f32.mxu1 %vm269_vm1, %v5489_v13 }
  0xa5   : > { %4655 = vmatmul.mubr.msk.f32.gmra.mrb[4].mxu0 %vm269_vm1, %v5481_v7 }
  0xa6   : > { %4657 = vmatprep.mubr.msk.f32.mxu0 %vm269_vm1, %v5502_v22 }
  0xa7   : > { %4432 = vmatmul.mubr.msk.f32.gmra.mrb[22].mxu1 %vm269_vm1, %v5509_v31 }
  0xa8   : > { %4434 = vmatprep.mubr.msk.f32.mxu1 %vm269_vm1, %v5517_v36 }
  0xa9   : > { %4658 = vmatmul.mubr.msk.f32.gmra.mrb[6].mxu0 %vm269_vm1, %v5838_v58 }
  0xaa   : > { %4660 = vmatprep.mubr.msk.f32.mxu0 %vm269_vm1, %v5528_v40 }
  0xab   : > { %4435 = vmatmul.mubr.msk.f32.gmra.mrb[24].mxu1 %vm269_vm1, %v5533_v42 }
  0xac   : > { %4437 = vmatprep.mubr.msk.f32.mxu1 %vm269_vm1, %v5538_v43 }
  0xad   : > { %4661 = vmatmul.mubr.msk.f32.gmra.mrb[8].mxu0 %vm269_vm1, %v5535_v6 }
  0xae   : > { %4663 = vmatprep.mubr.msk.f32.mxu0 %vm269_vm1, %v5547_v45 }
  0xaf   : > { %4438 = vmatmul.mubr.msk.f32.gmra.mrb[26].mxu1 %vm269_vm1, %v5551_v46 }
  0xb0   : > { %4440 = vmatprep.mubr.msk.f32.mxu1 %vm269_vm1, %v5555_v48 }
  0xb1   : > { %4664 = vmatmul.mubr.msk.f32.gmra.mrb[10].mxu0 %vm269_vm1, %v5553_v47 }
  0xb2   : > { %4666 = vmatprep.mubr.msk.f32.mxu0 %vm269_vm1, %v5563_v49 }
  0xb3   : > { %4441 = vmatmul.mubr.msk.f32.gmra.mrb[28].mxu1 %vm269_vm1, %v5567_v50 }
  0xb4   : > { %4443 = vmatprep.mubr.msk.f32.mxu1 %vm269_vm1, %v5571_v4 }
  0xb5   : > { %4667 = vmatmul.mubr.msk.f32.gmra.mrb[12].mxu0 %vm269_vm1, %v5569_v51 }
  0xb6   : > { %4669 = vmatprep.mubr.msk.f32.mxu0 %vm269_vm1, %v5579_v52 }
  0xb7   : > { %4444 = vmatmul.mubr.msk.f32.gmra.mrb[30].mxu1 %vm269_vm1, %v5583_v54 }
  0xb8   : > { %4448 = vmatprep.mubr.msk.f32.mxu1 %vm269_vm1, %v5747_v30  ;;  %v2504_v30 = vld [vmem:[#allocation2 + $0x91] sm:$0xff] }
  0xb9   : > { %4670 = vmatmul.mubr.msk.f32.gmra.mrb[14].mxu0 %vm269_vm1, %v5872_v29 }
  0xba   : > { %4672 = vmatprep.mubr.msk.f32.mxu0 %vm269_vm1, %v5593_v56 }
  0xbb   : > { %4449 = vmatmul.mubr.msk.f32.vlgmr.msra.gmra.mrb[0].mxu1 %vm269_vm1, %v5690_v17 }
  0xbc   : > { %4497 = vmatpush3.msk.msra.mxu1 %vm658_vm0, %v5709_v20  ;;  %4451 = vmatprep.mubr.msk.f32.mxu1 %vm269_vm1, %v5700_v18  ;;  %v1245_v20 = vld [vmem:[#allocation2 + $0x142] sm:$0xff] }
  0xbd   : > { %4673 = vmatmul.mubr.msk.f32.gmra.mrb[16].mxu0 %vm269_vm1, %v5597_v57  ;;  %4796 = vmatprep.subr.msk.mxu1 %vm658_vm0, %v5122_v1  ;;  %v2495_v1 = vld [vmem:[#allocation2 + $0x130] sm:$0xff] }
  0xbe   : > { %4675 = vmatprep.mubr.msk.f32.mxu0 %vm269_vm1, %v5610_v61 }
  0xbf   : > { %4452 = vmatmul.mubr.msk.f32.gmra.mrb[2].mxu1 %vm269_vm1, %v5702_v19 }
  0xc0   : > { %4454 = vmatprep.mubr.msk.f32.mxu1 %vm269_vm1, %v5719_v21 }
  0xc1   : > { %4676 = vmatmul.mubr.msk.f32.gmra.mrb[18].mxu0 %vm269_vm1, %v5616_v62 }
  0xc2   : > { %4678 = vmatprep.mubr.msk.f32.mxu0 %vm269_vm1, %v5626_v63 }
  0xc3   : > { %4455 = vmatmul.mubr.msk.f32.gmra.mrb[4].mxu1 %vm269_vm1, %v5721_v27 }
  0xc4   : > { %4457 = vmatprep.mubr.msk.f32.mxu1 %vm269_vm1, %v5733_v53 }
  0xc5   : > { %4679 = vmatmul.mubr.msk.f32.gmra.mrb[20].mxu0 %vm269_vm1, %v5630_v23 }
  0xc6   : > { %4681 = vmatprep.mubr.msk.f32.mxu0 %vm269_vm1, %v5638_v0 }
  0xc7   : > { %4458 = vmatmul.mubr.msk.f32.gmra.mrb[6].mxu1 %vm269_vm1, %v5735_v28 }
  0xc8   : > { %4460 = vmatprep.mubr.msk.f32.mxu1 %vm269_vm1, %v1245_v20 }
  0xc9   : > { %4682 = vmatmul.mubr.msk.f32.gmra.mrb[22].mxu0 %vm269_vm1, %v2495_v1  ;;  %v5063_v1 = vld [vmem:[%s6486_s3 + $0x10] sm:$0xf] }
  0xca   : > { %4684 = vmatprep.mubr.msk.f32.mxu0 %vm269_vm1, %v5398_v26 }
  0xcb   : > { %4461 = vmatmul.mubr.msk.f32.gmra.mrb[8].mxu1 %vm269_vm1, %v5749_v34 }
  0xcc   : > { %4463 = vmatprep.mubr.msk.f32.mxu1 %vm269_vm1, %v5759_v35 }
  0xcd   : > { %4685 = vmatmul.mubr.msk.f32.gmra.mrb[24].mxu0 %vm269_vm1, %v5413_v33 }
  0xce   : > { %4687 = vmatprep.mubr.msk.f32.mxu0 %vm269_vm1, %v5436_v3 }
  0xcf   : > { %4464 = vmatmul.mubr.msk.f32.gmra.mrb[10].mxu1 %vm269_vm1, %v5761_v5 }
  0xd0   : > { %4466 = vmatprep.mubr.msk.f32.mxu1 %vm269_vm1, %v5771_v37 }
  0xd1   : > { %4688 = vmatmul.mubr.msk.f32.gmra.mrb[26].mxu0 %vm269_vm1, %v5468_v60 }
  0xd2   : > { %4690 = vmatprep.mubr.msk.f32.mxu0 %vm269_vm1, %v5479_v2 }
  0xd3   : > { %4467 = vmatmul.mubr.msk.f32.gmra.mrb[12].mxu1 %vm269_vm1, %v5773_v39 }
  0xd4   : > { %4469 = vmatprep.mubr.msk.f32.mxu1 %vm269_vm1, %v5783_v41 }
  0xd5   : > { %4691 = vmatmul.mubr.msk.f32.gmra.mrb[28].mxu0 %vm269_vm1, %v5489_v13 }
  0xd6   : > { %4693 = vmatprep.mubr.msk.f32.mxu0 %vm269_vm1, %v5509_v31 }
  0xd7   : > { %4470 = vmatmul.mubr.msk.f32.gmra.mrb[14].mxu1 %vm269_vm1, %v5785_v55 }
  0xd8   : > { %4472 = vmatprep.mubr.msk.f32.mxu1 %vm269_vm1, %v5517_v36  ;;  %v6501_v36 = vld [vmem:[#allocation4_spill] sm:$0xff] }
  0xd9   : > { %4694 = vmatmul.mubr.msk.f32.gmra.mrb[30].mxu0 %vm269_vm1, %v2504_v30 }
  0xda   : > { %4698 = vmatprep.mubr.msk.f32.mxu0 %vm269_vm1, %v5528_v40 }
  0xdb   : > { %4473 = vmatmul.mubr.msk.f32.gmra.mrb[16].mxu1 %vm269_vm1, %v5533_v42 }
  0xdc   : > { %4475 = vmatprep.mubr.msk.f32.mxu1 %vm269_vm1, %v5538_v43 }
  0xdd   : > { %4699 = vmatmul.mubr.msk.f32.vlgmr.msra.gmra.mrb[0].mxu0 %vm269_vm1, %v5535_v6 }
  0xde   : > { %4747 = vmatpush3.msk.msra.mxu0 %vm658_vm0, %v5810_v16  ;;  %4701 = vmatprep.mubr.msk.f32.mxu0 %vm269_vm1, %v5547_v45  ;;  %v6503_v16 = vld [vmem:[#allocation3_spill] sm:$0xff] }
  0xdf   : > { %4476 = vmatmul.mubr.msk.f32.gmra.mrb[18].mxu1 %vm269_vm1, %v5551_v46 }
  0xe0   : > { %4478 = vmatprep.mubr.msk.f32.mxu1 %vm269_vm1, %v5555_v48 }
  0xe1   : > { %4702 = vmatmul.mubr.msk.f32.gmra.mrb[2].mxu0 %vm269_vm1, %v5553_v47 }
  0xe2   : > { %4704 = vmatprep.mubr.msk.f32.mxu0 %vm269_vm1, %v5563_v49 }
  0xe3   : > { %4479 = vmatmul.mubr.msk.f32.gmra.mrb[20].mxu1 %vm269_vm1, %v5567_v50 }
  0xe4   : > { %4481 = vmatprep.mubr.msk.f32.mxu1 %vm269_vm1, %v5571_v4 }
  0xe5   : > { %4705 = vmatmul.mubr.msk.f32.gmra.mrb[4].mxu0 %vm269_vm1, %v5569_v51 }
  0xe6   : > { %4707 = vmatprep.mubr.msk.f32.mxu0 %vm269_vm1, %v5579_v52 }
  0xe7   : > { %4482 = vmatmul.mubr.msk.f32.gmra.mrb[22].mxu1 %vm269_vm1, %v5583_v54 }
  0xe8   : > { %4484 = vmatprep.mubr.msk.f32.mxu1 %vm269_vm1, %v5642_v8  ;;  %v6502_v8 = vld [vmem:[#allocation5_spill] sm:$0xff] }
  0xe9   : > { %4708 = vmatmul.mubr.msk.f32.gmra.mrb[6].mxu0 %vm269_vm1, %v5872_v29 }
  0xea   : > { %4710 = vmatprep.mubr.msk.f32.mxu0 %vm269_vm1, %v5690_v17 }
  0xeb   : > { %4485 = vmatmul.mubr.msk.f32.gmra.mrb[24].mxu1 %vm269_vm1, %v5652_v9 }
  0xec   : > { %4487 = vmatprep.mubr.msk.f32.mxu1 %vm269_vm1, %v5654_v10 }
  0xed   : > { %4711 = vmatmul.mubr.msk.f32.gmra.mrb[8].mxu0 %vm269_vm1, %v5700_v18 }
  0xee   : > { %4713 = vmatprep.mubr.msk.f32.mxu0 %vm269_vm1, %v5702_v19 }
  0xef   : > { %4488 = vmatmul.mubr.msk.f32.gmra.mrb[26].mxu1 %vm269_vm1, %v5664_v11 }
  0xf0   : > { %4490 = vmatprep.mubr.msk.f32.mxu1 %vm269_vm1, %v5666_v12 }
  0xf1   : > { %4714 = vmatmul.mubr.msk.f32.gmra.mrb[10].mxu0 %vm269_vm1, %v5719_v21 }
  0xf2   : > { %4716 = vmatprep.mubr.msk.f32.mxu0 %vm269_vm1, %v5721_v27 }
  0xf3   : > { %4491 = vmatmul.mubr.msk.f32.gmra.mrb[28].mxu1 %vm269_vm1, %v5676_v14 }
  0xf4   : > { %4493 = vmatprep.mubr.msk.f32.mxu1 %vm269_vm1, %v5678_v15 }
  0xf5   : > { %4717 = vmatmul.mubr.msk.f32.gmra.mrb[12].mxu0 %vm269_vm1, %v5733_v53 }
  0xf6   : > { %4719 = vmatprep.mubr.msk.f32.mxu0 %vm269_vm1, %v5735_v28 }
  0xf7   : > { %4494 = vmatmul.mubr.msk.f32.gmra.mrb[30].mxu1 %vm269_vm1, %v6501_v36 }
  0xf8   : > { %4498 = vmatprep.mubr.msk.f32.mxu1 %vm269_vm1, %v6503_v16 }
  0xf9   : > { %4720 = vmatmul.mubr.msk.f32.gmra.mrb[14].mxu0 %vm269_vm1, %v6502_v8 }
  0xfa   : > { %4722 = vmatprep.mubr.msk.f32.mxu0 %vm269_vm1, %v5398_v26 }
  0xfb   : > { %4499 = vmatmul.mubr.msk.f32.vlgmr.msra.gmra.mrb[0].mxu1 %vm269_vm1, %v5593_v56 }
  0xfc   : > { %4797 = vmatpush3.msk.msra.mxu1 %vm658_vm0, %v5063_v1  ;;  %4501 = vmatprep.mubr.msk.f32.mxu1 %vm269_vm1, %v5597_v57 }
  0xfd   : > { %4723 = vmatmul.mubr.msk.f32.gmra.mrb[16].mxu0 %vm269_vm1, %v5413_v33 }
  0xfe   : > { %4725 = vmatprep.mubr.msk.f32.mxu0 %vm269_vm1, %v5436_v3 }
  0xff   : > { %4502 = vmatmul.mubr.msk.f32.gmra.mrb[2].mxu1 %vm269_vm1, %v5610_v61 }
 0x100   : > { %4504 = vmatprep.mubr.msk.f32.mxu1 %vm269_vm1, %v5616_v62 }
 0x101   : > { %4726 = vmatmul.mubr.msk.f32.gmra.mrb[18].mxu0 %vm269_vm1, %v5468_v60 }
 0x102   : > { %4728 = vmatprep.mubr.msk.f32.mxu0 %vm269_vm1, %v5479_v2 }
 0x103   : > { %4505 = vmatmul.mubr.msk.f32.gmra.mrb[4].mxu1 %vm269_vm1, %v5626_v63 }
 0x104   : > { %4507 = vmatprep.mubr.msk.f32.mxu1 %vm269_vm1, %v5630_v23 }
 0x105   : > { %4729 = vmatmul.mubr.msk.f32.gmra.mrb[20].mxu0 %vm269_vm1, %v5489_v13 }
 0x106   : > { %4731 = vmatprep.mubr.msk.f32.mxu0 %vm269_vm1, %v5509_v31 }
 0x107   : > { %4508 = vmatmul.mubr.msk.f32.gmra.mrb[6].mxu1 %vm269_vm1, %v5638_v0 }
 0x108   : > { %4510 = vmatprep.mubr.msk.f32.mxu1 %vm269_vm1, %v5396_v25  ;;  %v2822_v25 = vld [vmem:[#allocation2 + $0x131] sm:$0xff] }
 0x109   : > { %4732 = vmatmul.mubr.msk.f32.gmra.mrb[22].mxu0 %vm269_vm1, %v2504_v30 }
 0x10a   : > { %4734 = vmatprep.mubr.msk.f32.mxu0 %vm269_vm1, %v5533_v42 }
 0x10b   : > { %4511 = vmatmul.mubr.msk.f32.gmra.mrb[8].mxu1 %vm269_vm1, %v5398_v26  ;;  %v3116_v26 = vld [vmem:[#allocation2 + $0x92] sm:$0xff] }
 0x10c   : > { %4513 = vmatprep.mubr.msk.f32.mxu1 %vm269_vm1, %v5413_v33 }
 0x10d   : > { %4735 = vmatmul.mubr.msk.f32.gmra.mrb[24].mxu0 %vm269_vm1, %v5538_v43 }
 0x10e   : > { %4737 = vmatprep.mubr.msk.f32.mxu0 %vm269_vm1, %v5551_v46 }
 0x10f   : > { %4514 = vmatmul.mubr.msk.f32.gmra.mrb[10].mxu1 %vm269_vm1, %v5436_v3 }
 0x110   : > { %4516 = vmatprep.mubr.msk.f32.mxu1 %vm269_vm1, %v5468_v60 }
 0x111   : > { %4738 = vmatmul.mubr.msk.f32.gmra.mrb[26].mxu0 %vm269_vm1, %v5555_v48 }
 0x112   : > { %4740 = vmatprep.mubr.msk.f32.mxu0 %vm269_vm1, %v5567_v50 }
 0x113   : > { %4517 = vmatmul.mubr.msk.f32.gmra.mrb[12].mxu1 %vm269_vm1, %v5479_v2 }
 0x114   : > { %4519 = vmatprep.mubr.msk.f32.mxu1 %vm269_vm1, %v5489_v13 }
 0x115   : > { %4741 = vmatmul.mubr.msk.f32.gmra.mrb[28].mxu0 %vm269_vm1, %v5571_v4 }
 0x116   : > { %4743 = vmatprep.mubr.msk.f32.mxu0 %vm269_vm1, %v5583_v54 }
 0x117   : > { %4520 = vmatmul.mubr.msk.f32.gmra.mrb[14].mxu1 %vm269_vm1, %v5509_v31 }
 0x118   : > { %4522 = vmatprep.mubr.msk.f32.mxu1 %vm269_vm1, %v5394_v24  ;;  %v6504_v24 = vld [vmem:[#allocation6_spill] sm:$0xff] }
 0x119   : > { %4744 = vmatmul.mubr.msk.f32.gmra.mrb[30].mxu0 %vm269_vm1, %v2822_v25 }
 0x11a   : > { %4748 = vmatprep.mubr.msk.f32.mxu0 %vm269_vm1, %v5690_v17 }
 0x11b   : > { %4523 = vmatmul.mubr.msk.f32.gmra.mrb[16].mxu1 %vm269_vm1, %v5411_v32 }
 0x11c   : > { %4525 = vmatprep.mubr.msk.f32.mxu1 %vm269_vm1, %v5424_v38 }
 0x11d   : > { %4749 = vmatmul.mubr.msk.f32.vlgmr.msra.gmra.mrb[0].mxu0 %vm269_vm1, %v5700_v18 }
 0x11e   : > { %4751 = vmatprep.mubr.msk.f32.mxu0 %vm269_vm1, %v5702_v19 }
 0x11f   : > { %4526 = vmatmul.mubr.msk.f32.gmra.mrb[18].mxu1 %vm269_vm1, %v5438_v44 }
 0x120   : > { %4528 = vmatprep.mubr.msk.f32.mxu1 %vm269_vm1, %v5466_v59 }
 0x121   : > { %4752 = vmatmul.mubr.msk.f32.gmra.mrb[2].mxu0 %vm269_vm1, %v5719_v21 }
 0x122   : > { %4754 = vmatprep.mubr.msk.f32.mxu0 %vm269_vm1, %v5721_v27 }
 0x123   : > { %4529 = vmatmul.mubr.msk.f32.gmra.mrb[20].mxu1 %vm269_vm1, %v5481_v7 }
 0x124   : > { %4531 = vmatprep.mubr.msk.f32.mxu1 %vm269_vm1, %v5502_v22 }
 0x125   : > { %4755 = vmatmul.mubr.msk.f32.gmra.mrb[4].mxu0 %vm269_vm1, %v5733_v53 }
 0x126   : > { %4757 = vmatprep.mubr.msk.f32.mxu0 %vm269_vm1, %v5735_v28 }
 0x127   : > { %4532 = vmatmul.mubr.msk.f32.gmra.mrb[22].mxu1 %vm269_vm1, %v5838_v58 }
 0x128   : > { %4534 = vmatprep.mubr.msk.f32.mxu1 %vm269_vm1, %v5528_v40 }
 0x129   : > { %4758 = vmatmul.mubr.msk.f32.gmra.mrb[6].mxu0 %vm269_vm1, %v6502_v8 }
 0x12a   : > { %4760 = vmatprep.mubr.msk.f32.mxu0 %vm269_vm1, %v5749_v34 }
 0x12b   : > { %4535 = vmatmul.mubr.msk.f32.gmra.mrb[24].mxu1 %vm269_vm1, %v5535_v6 }
 0x12c   : > { %4537 = vmatprep.mubr.msk.f32.mxu1 %vm269_vm1, %v5547_v45 }
 0x12d   : > { %4761 = vmatmul.mubr.msk.f32.gmra.mrb[8].mxu0 %vm269_vm1, %v5759_v35 }
 0x12e   : > { %4763 = vmatprep.mubr.msk.f32.mxu0 %vm269_vm1, %v5761_v5 }
 0x12f   : > { %4538 = vmatmul.mubr.msk.f32.gmra.mrb[26].mxu1 %vm269_vm1, %v5553_v47 }
 0x130   : > { %4540 = vmatprep.mubr.msk.f32.mxu1 %vm269_vm1, %v5563_v49 }
 0x131   : > { %4764 = vmatmul.mubr.msk.f32.gmra.mrb[10].mxu0 %vm269_vm1, %v5771_v37 }
 0x132   : > { %4766 = vmatprep.mubr.msk.f32.mxu0 %vm269_vm1, %v5773_v39 }
 0x133   : > { %4541 = vmatmul.mubr.msk.f32.gmra.mrb[28].mxu1 %vm269_vm1, %v5569_v51 }
 0x134   : > { %4543 = vmatprep.mubr.msk.f32.mxu1 %vm269_vm1, %v5579_v52 }
 0x135   : > { %4767 = vmatmul.mubr.msk.f32.gmra.mrb[12].mxu0 %vm269_vm1, %v5783_v41 }
 0x136   : > { %4769 = vmatprep.mubr.msk.f32.mxu0 %vm269_vm1, %v5785_v55 }
 0x137   : > { %4544 = vmatmul.mubr.msk.f32.gmra.mrb[30].mxu1 %vm269_vm1, %v5872_v29 }
 0x138   : > { %4572 = vmatprep.mubr.msk.f32.mxu1 %vm269_vm1, %v5528_v40 }
 0x139   : > { %4770 = vmatmul.mubr.msk.f32.gmra.mrb[14].mxu0 %vm269_vm1, %v6504_v24 }
 0x13a   : > { %4772 = vmatprep.mubr.msk.f32.mxu0 %vm269_vm1, %v5533_v42 }
 0x13b   : > { %4573 = vmatmul.mubr.msk.f32.vlgmr.msra.gmra.mrb[16].mxu1 %vm269_vm1, %v5535_v6 }
 0x13c   : > { %4575 = vmatprep.mubr.msk.f32.mxu1 %vm269_vm1, %v5547_v45 }
 0x13d   : > { %4773 = vmatmul.mubr.msk.f32.gmra.mrb[16].mxu0 %vm269_vm1, %v5538_v43 }
 0x13e   : > { %4775 = vmatprep.mubr.msk.f32.mxu0 %vm269_vm1, %v5551_v46 }
 0x13f   : > { %4576 = vmatmul.mubr.msk.f32.gmra.mrb[18].mxu1 %vm269_vm1, %v5553_v47 }
 0x140   : > { %4578 = vmatprep.mubr.msk.f32.mxu1 %vm269_vm1, %v5563_v49 }
 0x141   : > { %4776 = vmatmul.mubr.msk.f32.gmra.mrb[18].mxu0 %vm269_vm1, %v5555_v48 }
 0x142   : > { %4778 = vmatprep.mubr.msk.f32.mxu0 %vm269_vm1, %v5567_v50 }
 0x143   : > { %4579 = vmatmul.mubr.msk.f32.gmra.mrb[20].mxu1 %vm269_vm1, %v5569_v51 }
 0x144   : > { %4581 = vmatprep.mubr.msk.f32.mxu1 %vm269_vm1, %v5579_v52 }
 0x145   : > { %4779 = vmatmul.mubr.msk.f32.gmra.mrb[20].mxu0 %vm269_vm1, %v5571_v4 }
 0x146   : > { %4781 = vmatprep.mubr.msk.f32.mxu0 %vm269_vm1, %v5583_v54 }
 0x147   : > { %4582 = vmatmul.mubr.msk.f32.gmra.mrb[22].mxu1 %vm269_vm1, %v5872_v29 }
 0x148   : > { %4584 = vmatprep.mubr.msk.f32.mxu1 %vm269_vm1, %v5690_v17 }
 0x149   : > { %4782 = vmatmul.mubr.msk.f32.gmra.mrb[22].mxu0 %vm269_vm1, %v2822_v25 }
 0x14a   : > { %4784 = vmatprep.mubr.msk.f32.mxu0 %vm269_vm1, %v5652_v9 }
 0x14b   : > { %4585 = vmatmul.mubr.msk.f32.gmra.mrb[24].mxu1 %vm269_vm1, %v5700_v18 }
 0x14c   : > { %4587 = vmatprep.mubr.msk.f32.mxu1 %vm269_vm1, %v5702_v19 }
 0x14d   : > { %4785 = vmatmul.mubr.msk.f32.gmra.mrb[24].mxu0 %vm269_vm1, %v5654_v10 }
 0x14e   : > { %4787 = vmatprep.mubr.msk.f32.mxu0 %vm269_vm1, %v5664_v11 }
 0x14f   : > { %4588 = vmatmul.mubr.msk.f32.gmra.mrb[26].mxu1 %vm269_vm1, %v5719_v21 }
 0x150   : > { %4590 = vmatprep.mubr.msk.f32.mxu1 %vm269_vm1, %v5721_v27 }
 0x151   : > { %4788 = vmatmul.mubr.msk.f32.gmra.mrb[26].mxu0 %vm269_vm1, %v5666_v12 }
 0x152   : > { %4790 = vmatprep.mubr.msk.f32.mxu0 %vm269_vm1, %v5676_v14 }
 0x153   : > { %4591 = vmatmul.mubr.msk.f32.gmra.mrb[28].mxu1 %vm269_vm1, %v5733_v53 }
 0x154   : > { %4593 = vmatprep.mubr.msk.f32.mxu1 %vm269_vm1, %v5735_v28 }
 0x155   : > { %4791 = vmatmul.mubr.msk.f32.gmra.mrb[28].mxu0 %vm269_vm1, %v5678_v15 }
 0x156   : > { %4793 = vmatprep.mubr.msk.f32.mxu0 %vm269_vm1, %v6501_v36 }
 0x157   : > { %4594 = vmatmul.mubr.msk.f32.gmra.mrb[30].mxu1 %vm269_vm1, %v6502_v8 }
 0x159   : > { %4794 = vmatmul.mubr.msk.f32.gmra.mrb[30].mxu0 %vm269_vm1, %v3116_v26 }
 0x1ce   : > { %v4500_v32 = vpop.f32.mrb[0].mxu1 }
 0x1cf   : > { %v1708_v33 = vpop.f32.mrb[1].mxu1 }
 0x1d2   : > { %v4503_v38 = vpop.f32.mrb[2].mxu1 }
 0x1d3   : > { %v1718_v3 = vpop.f32.mrb[3].mxu1 }
 0x1d6   : > { %v4506_v44 = vpop.f32.mrb[4].mxu1 }
 0x1d7   : > { %v1728_v59 = vpop.f32.mrb[5].mxu1 }
 0x1da   : > { %v4509_v60 = vpop.f32.mrb[6].mxu1 }
 0x1db   : > { %v1738_v2 = vpop.f32.mrb[7].mxu1 }
 0x1de   : > { %v4512_v7 = vpop.f32.mrb[8].mxu1 }
 0x1df   : > { %v1748_v13 = vpop.f32.mrb[9].mxu1 }
 0x1e2   : > { %v4515_v22 = vpop.f32.mrb[10].mxu1 }
 0x1e3   : > { %v1758_v31 = vpop.f32.mrb[11].mxu1 }
 0x1e6   : > { %v6201_v40 = vpop.f32.mrb[12].mxu1 }
 0x1e7   : > { %v6203_v42 = vpop.f32.mrb[13].mxu1 }
 0x1ea   : > { %v6205_v6 = vpop.f32.mrb[14].mxu1 }
 0x1eb   : > { %v6207_v43 = vpop.f32.mrb[15].mxu1 }
 0x1f0   : > { %v4750_v45 = vpop.f32.mrb[0].mxu0 }
 0x1f1   : > { %v4798_v46 = vadd.f32 %v4750_v45, %v4500_v32  ;;  %v3212_v47 = vpop.f32.mrb[1].mxu0 }
 0x1f2   : > { %v4799_v48 = vadd.f32 %v3212_v47, %v1708_v33 }
 0x1f3   : > { %3404 = vst.msk [vmem:[%s6214_s9 + $0x8] sm:$0xff] %vm269_vm1, %v4798_v46  ;;  %v3513_v63 = vmul.f32 %v4798_v46, %v4798_v46  ;;  %v3442_v10 = vsel %vm269_vm1, %v4798_v46, 0.0 }
 0x1f4   : > { %3403 = vst.msk [vmem:[%s6214_s9] sm:$0xff] %vm269_vm1, %v4799_v48  ;;  %v4753_v49 = vpop.f32.mrb[2].mxu0  ;;  %v3512_v0 = vmul.f32 %v4799_v48, %v4799_v48  ;;  %v3435_v17 = vsel %vm269_vm1, %v4799_v48, 0.0 }
 0x1f5   : > { %v4800_v50 = vadd.f32 %v4753_v49, %v4503_v38  ;;  %v3222_v51 = vpop.f32.mrb[3].mxu0  ;;  %v3551_v15 = vsel %vm269_vm1, %v3513_v63, 0.0 }
 0x1f6   : > { %v4801_v4 = vadd.f32 %v3222_v51, %v1718_v3  ;;  %v3544_v21 = vsel %vm269_vm1, %v3512_v0, 0.0 }
 0x1f7   : > { %3406 = vst.msk [vmem:[%s6214_s9 + $0x18] sm:$0xff] %vm269_vm1, %v4800_v50  ;;  %v3515_v11 = vmul.f32 %v4800_v50, %v4800_v50  ;;  %v3456_v27 = vsel %vm269_vm1, %v4800_v50, 0.0 }
 0x1f8   : > { %3405 = vst.msk [vmem:[%s6214_s9 + $0x10] sm:$0xff] %vm269_vm1, %v4801_v4  ;;  %v4756_v52 = vpop.f32.mrb[4].mxu0  ;;  %v3514_v18 = vmul.f32 %v4801_v4, %v4801_v4  ;;  %v3449_v29 = vsel %vm269_vm1, %v4801_v4, 0.0 }
 0x1f9   : > { %v4802_v54 = vadd.f32 %v4756_v52, %v4506_v44  ;;  %v3232_v55 = vpop.f32.mrb[5].mxu0  ;;  %v3565_v39 = vsel %vm269_vm1, %v3515_v11, 0.0 }
 0x1fa   : > { %v4803_v56 = vadd.f32 %v3232_v55, %v1728_v59  ;;  %v3558_v36 = vsel %vm269_vm1, %v3514_v18, 0.0 }
 0x1fb   : > { %3408 = vst.msk [vmem:[%s6214_s9 + $0x28] sm:$0xff] %vm269_vm1, %v4802_v54  ;;  %v3517_v25 = vmul.f32 %v4802_v54, %v4802_v54 }
 0x1fc   : > { %3407 = vst.msk [vmem:[%s6214_s9 + $0x20] sm:$0xff] %vm269_vm1, %v4803_v56  ;;  %v4759_v57 = vpop.f32.mrb[6].mxu0  ;;  %v3516_v33 = vmul.f32 %v4803_v56, %v4803_v56 }
 0x1fd   : > { %v6228_v61 = vadd.f32 %v4759_v57, %v4509_v60  ;;  %v3242_v62 = vpop.f32.mrb[7].mxu0  ;;  %v3470_v60 = vsel %vm269_vm1, %v4802_v54, 0.0  ;;  %v3579_v48 = vsel %vm269_vm1, %v3517_v25, 0.0 }
 0x1fe   : > { %v6230_v23 = vadd.f32 %v3242_v62, %v1738_v2 }
 0x1ff   : > { %3410 = vst.msk [vmem:[%s6214_s9 + $0x38] sm:$0xff] %vm269_vm1, %v6228_v61  ;;  %v3519_v55 = vmul.f32 %v6228_v61, %v6228_v61 }
 0x200   : > { %3409 = vst.msk [vmem:[%s6214_s9 + $0x30] sm:$0xff] %vm269_vm1, %v6230_v23  ;;  %v4762_v9 = vpop.f32.mrb[8].mxu0  ;;  %v3518_v0 = vmul.f32 %v6230_v23, %v6230_v23  ;;  %v3477_v18 = vsel %vm269_vm1, %v6230_v23, 0.0 }
 0x201   : > { %v4806_v12 = vadd.f32 %v4762_v9, %v4512_v7  ;;  %v3252_v14 = vpop.f32.mrb[9].mxu0 }
 0x202   : > { %v4807_v19 = vadd.f32 %v3252_v14, %v1748_v13  ;;  %v3586_v23 = vsel %vm269_vm1, %v3518_v0, 0.0 }
 0x203   : > { %3412 = vst.msk [vmem:[%s6214_s9 + $0x48] sm:$0xff] %vm269_vm1, %v4806_v12  ;;  %v3443_v53 = vsel %vm269_vm1, %v4806_v12, 0.0  ;;  %v3521_v28 = vmul.f32 %v4806_v12, %v4806_v12  ;;  %v3484_v12 = vsel %vm269_vm1, %v6228_v61, 0.0 }
 0x204   : > { %v6247_v34 = vadd.f32 %v3443_v53, %v3442_v10  ;;  %3411 = vst.msk [vmem:[%s6214_s9 + $0x40] sm:$0xff] %vm269_vm1, %v4807_v19  ;;  %v3436_v35 = vsel %vm269_vm1, %v4807_v19, 0.0  ;;  %v3520_v5 = vmul.f32 %v4807_v19, %v4807_v19  ;;  %v4765_v37 = vpop.f32.mrb[10].mxu0  ;;  %v3593_v53 = vsel %vm269_vm1, %v3519_v55, 0.0 }
 0x205   : > { %v3552_v41 = vsel %vm269_vm1, %v3521_v28, 0.0  ;;  %v6254_v58 = vadd.f32 %v3436_v35, %v3435_v17  ;;  %v4808_v20 = vadd.f32 %v4765_v37, %v4515_v22  ;;  %v3262_v30 = vpop.f32.mrb[11].mxu0 }
 0x206   : > { %v6257_v8 = vadd.f32 %v3552_v41, %v3551_v15  ;;  %v3545_v16 = vsel %vm269_vm1, %v3520_v5, 0.0  ;;  %v4809_v1 = vadd.f32 %v3262_v30, %v1758_v31  ;;  %v3463_v31 = vsel %vm269_vm1, %v4803_v56, 0.0 }
 0x207   : > { %v6260_v24 = vadd.f32 %v3545_v16, %v3544_v21  ;;  %3414 = vst.msk [vmem:[%s6214_s9 + $0x58] sm:$0xff] %vm269_vm1, %v4808_v20  ;;  %v3457_v26 = vsel %vm269_vm1, %v4808_v20, 0.0  ;;  %v3523_v32 = vmul.f32 %v4808_v20, %v4808_v20 }
 0x208   : > { %v6265_v38 = vadd.f32 %v3457_v26, %v3456_v27  ;;  %3413 = vst.msk [vmem:[%s6214_s9 + $0x50] sm:$0xff] %vm269_vm1, %v4809_v1  ;;  %v3450_v3 = vsel %vm269_vm1, %v4809_v1, 0.0  ;;  %v3522_v44 = vmul.f32 %v4809_v1, %v4809_v1  ;;  %v4768_v59 = vpop.f32.mrb[12].mxu0 }
 0x209   : > { %v3566_v2 = vsel %vm269_vm1, %v3523_v32, 0.0  ;;  %v6272_v7 = vadd.f32 %v3450_v3, %v3449_v29  ;;  %v4810_v13 = vadd.f32 %v4768_v59, %v6201_v40  ;;  %v3272_v22 = vpop.f32.mrb[13].mxu0  ;;  %v3572_v40 = vsel %vm269_vm1, %v3516_v33, 0.0 }
 0x20a   : > { %v6276_v45 = vadd.f32 %v3566_v2, %v3565_v39  ;;  %v3559_v46 = vsel %vm269_vm1, %v3522_v44, 0.0  ;;  %v4811_v47 = vadd.f32 %v3272_v22, %v6203_v42 }
 0x20b   : > { %v6281_v49 = vadd.f32 %v3559_v46, %v3558_v36  ;;  %3416 = vst.msk [vmem:[%s6214_s9 + $0x68] sm:$0xff] %vm269_vm1, %v4810_v13  ;;  %v3471_v50 = vsel %vm269_vm1, %v4810_v13, 0.0  ;;  %v3525_v51 = vmul.f32 %v4810_v13, %v4810_v13 }
 0x20c   : > { %v6287_v4 = vadd.f32 %v3471_v50, %v3470_v60  ;;  %3415 = vst.msk [vmem:[%s6214_s9 + $0x60] sm:$0xff] %vm269_vm1, %v4811_v47  ;;  %v3464_v52 = vsel %vm269_vm1, %v4811_v47, 0.0  ;;  %v3524_v54 = vmul.f32 %v4811_v47, %v4811_v47  ;;  %v4771_v42 = vpop.f32.mrb[14].mxu0 }
 0x20d   : > { %v3580_v56 = vsel %vm269_vm1, %v3525_v51, 0.0  ;;  %v6295_v57 = vadd.f32 %v3464_v52, %v3463_v31  ;;  %v4812_v62 = vadd.f32 %v4771_v42, %v6205_v6  ;;  %v3282_v63 = vpop.f32.mrb[15].mxu0 }
 0x20e   : > { %v6300_v9 = vadd.f32 %v3580_v56, %v3579_v48  ;;  %v3573_v10 = vsel %vm269_vm1, %v3524_v54, 0.0  ;;  %v4813_v11 = vadd.f32 %v3282_v63, %v6207_v43  ;;  %v4574_v17 = vpop.f32.mrb[16].mxu1 }
 0x20f   : > { %v6306_v14 = vadd.f32 %v3573_v10, %v3572_v40  ;;  %3418 = vst.msk [vmem:[%s6214_s9 + $0x78] sm:$0xff] %vm269_vm1, %v4812_v62  ;;  %v3485_v15 = vsel %vm269_vm1, %v4812_v62, 0.0  ;;  %v3527_v6 = vmul.f32 %v4812_v62, %v4812_v62  ;;  %v2082_v61 = vpop.f32.mrb[17].mxu1 }
 0x210   : > { %v6313_v19 = vadd.f32 %v3485_v15, %v3484_v12  ;;  %3417 = vst.msk [vmem:[%s6214_s9 + $0x70] sm:$0xff] %vm269_vm1, %v4813_v11  ;;  %v3478_v43 = vsel %vm269_vm1, %v4813_v11, 0.0  ;;  %v3526_v21 = vmul.f32 %v4813_v11, %v4813_v11  ;;  %v4774_v27 = vpop.f32.mrb[16].mxu0 }
 0x211   : > { %v3594_v28 = vsel %vm269_vm1, %v3527_v6, 0.0  ;;  %v6320_v29 = vadd.f32 %v3478_v43, %v3477_v18  ;;  %v4814_v35 = vadd.f32 %v4774_v27, %v4574_v17  ;;  %v3292_v5 = vpop.f32.mrb[17].mxu0 }
 0x212   : > { %v6323_v37 = vadd.f32 %v3594_v28, %v3593_v53  ;;  %v3587_v39 = vsel %vm269_vm1, %v3526_v21, 0.0  ;;  %v4815_v41 = vadd.f32 %v3292_v5, %v2082_v61  ;;  %v4577_v16 = vpop.f32.mrb[18].mxu1 }
 0x213   : > { %v6326_v20 = vadd.f32 %v3587_v39, %v3586_v23  ;;  %3420 = vst.msk [vmem:[%s6214_s9 + $0x88] sm:$0xff] %vm269_vm1, %v4814_v35  ;;  %v3445_v30 = vsel %vm269_vm1, %v4814_v35, 0.0  ;;  %v3529_v36 = vmul.f32 %v4814_v35, %v4814_v35  ;;  %v2092_v32 = vpop.f32.mrb[19].mxu1 }
 0x214   : > { %v6332_v1 = vadd.f32 %v3445_v30, %v6247_v34  ;;  %3419 = vst.msk [vmem:[%s6214_s9 + $0x80] sm:$0xff] %vm269_vm1, %v4815_v41  ;;  %v3438_v25 = vsel %vm269_vm1, %v4815_v41, 0.0  ;;  %v3528_v26 = vmul.f32 %v4815_v41, %v4815_v41  ;;  %v4777_v33 = vpop.f32.mrb[18].mxu0 }
 0x215   : > { %v3554_v3 = vsel %vm269_vm1, %v3529_v36, 0.0  ;;  %v6339_v44 = vadd.f32 %v3438_v25, %v6254_v58  ;;  %v4816_v59 = vadd.f32 %v4777_v33, %v4577_v16  ;;  %v3302_v60 = vpop.f32.mrb[19].mxu0 }
 0x216   : > { %v6342_v2 = vadd.f32 %v3554_v3, %v6257_v8  ;;  %v3547_v34 = vsel %vm269_vm1, %v3528_v26, 0.0  ;;  %v4817_v13 = vadd.f32 %v3302_v60, %v2092_v32  ;;  %v4580_v47 = vpop.f32.mrb[20].mxu1 }
 0x217   : > { %v6346_v22 = vadd.f32 %v3547_v34, %v6260_v24  ;;  %3422 = vst.msk [vmem:[%s6214_s9 + $0x98] sm:$0xff] %vm269_vm1, %v4816_v59  ;;  %v3459_v31 = vsel %vm269_vm1, %v4816_v59, 0.0  ;;  %v3531_v46 = vmul.f32 %v4816_v59, %v4816_v59  ;;  %v2102_v50 = vpop.f32.mrb[21].mxu1 }
 0x218   : > { %v6352_v58 = vadd.f32 %v3459_v31, %v6265_v38  ;;  %3421 = vst.msk [vmem:[%s6214_s9 + $0x90] sm:$0xff] %vm269_vm1, %v4817_v13  ;;  %v3452_v8 = vsel %vm269_vm1, %v4817_v13, 0.0  ;;  %v3530_v48 = vmul.f32 %v4817_v13, %v4817_v13  ;;  %v4780_v51 = vpop.f32.mrb[20].mxu0 }
 0x219   : > { %v3568_v24 = vsel %vm269_vm1, %v3531_v46, 0.0  ;;  %v6359_v40 = vadd.f32 %v3452_v8, %v6272_v7  ;;  %v4818_v52 = vadd.f32 %v4780_v51, %v4580_v47  ;;  %v3312_v54 = vpop.f32.mrb[21].mxu0 }
 0x21a   : > { %v6362_v42 = vadd.f32 %v3568_v24, %v6276_v45  ;;  %v3561_v38 = vsel %vm269_vm1, %v3530_v48, 0.0  ;;  %v4819_v55 = vadd.f32 %v3312_v54, %v2102_v50  ;;  %v4583_v0 = vpop.f32.mrb[22].mxu1 }
 0x21b   : > { %v6366_v56 = vadd.f32 %v3561_v38, %v6281_v49  ;;  %3424 = vst.msk [vmem:[%s6214_s9 + $0xa8] sm:$0xff] %vm269_vm1, %v4818_v52  ;;  %v3473_v62 = vsel %vm269_vm1, %v4818_v52, 0.0  ;;  %v3533_v63 = vmul.f32 %v4818_v52, %v4818_v52  ;;  %v2112_v11 = vpop.f32.mrb[23].mxu1 }
 0x21c   : > { %v6372_v7 = vadd.f32 %v3473_v62, %v6287_v4  ;;  %3423 = vst.msk [vmem:[%s6214_s9 + $0xa0] sm:$0xff] %vm269_vm1, %v4819_v55  ;;  %v3466_v45 = vsel %vm269_vm1, %v4819_v55, 0.0  ;;  %v3532_v10 = vmul.f32 %v4819_v55, %v4819_v55  ;;  %v4783_v12 = vpop.f32.mrb[22].mxu0 }
 0x21d   : > { %v3582_v49 = vsel %vm269_vm1, %v3533_v63, 0.0  ;;  %v6379_v15 = vadd.f32 %v3466_v45, %v6295_v57  ;;  %v4820_v6 = vadd.f32 %v4783_v12, %v4583_v0  ;;  %v3322_v17 = vpop.f32.mrb[23].mxu0 }
 0x21e   : > { %v6382_v18 = vadd.f32 %v3582_v49, %v6300_v9  ;;  %v3575_v4 = vsel %vm269_vm1, %v3532_v10, 0.0  ;;  %v4821_v43 = vadd.f32 %v3322_v17, %v2112_v11  ;;  %v4586_v53 = vpop.f32.mrb[24].mxu1 }
 0x21f   : > { %v6386_v21 = vadd.f32 %v3575_v4, %v6306_v14  ;;  %3426 = vst.msk [vmem:[%s6214_s9 + $0xb8] sm:$0xff] %vm269_vm1, %v4820_v6  ;;  %v3487_v61 = vsel %vm269_vm1, %v4820_v6, 0.0  ;;  %v3535_v27 = vmul.f32 %v4820_v6, %v4820_v6  ;;  %v2122_v35 = vpop.f32.mrb[25].mxu1 }
 0x220   : > { %v6392_v57 = vadd.f32 %v3487_v61, %v6313_v19  ;;  %3425 = vst.msk [vmem:[%s6214_s9 + $0xb0] sm:$0xff] %vm269_vm1, %v4821_v43  ;;  %v3480_v9 = vsel %vm269_vm1, %v4821_v43, 0.0  ;;  %v3534_v28 = vmul.f32 %v4821_v43, %v4821_v43  ;;  %v4786_v5 = vpop.f32.mrb[24].mxu0 }
 0x221   : > { %v3596_v14 = vsel %vm269_vm1, %v3535_v27, 0.0  ;;  %v6399_v23 = vadd.f32 %v3480_v9, %v6320_v29  ;;  %v4822_v39 = vadd.f32 %v4786_v5, %v4586_v53  ;;  %v3332_v41 = vpop.f32.mrb[25].mxu0 }
 0x222   : > { %v6402_v30 = vadd.f32 %v3596_v14, %v6323_v37  ;;  %v3589_v19 = vsel %vm269_vm1, %v3534_v28, 0.0  ;;  %v4823_v36 = vadd.f32 %v3332_v41, %v2122_v35  ;;  %v4589_v32 = vpop.f32.mrb[26].mxu1 }
 0x223   : > { %v6406_v16 = vadd.f32 %v3589_v19, %v6326_v20  ;;  %3428 = vst.msk [vmem:[%s6214_s9 + $0xc8] sm:$0xff] %vm269_vm1, %v4822_v39  ;;  %v3447_v25 = vsel %vm269_vm1, %v4822_v39, 0.0  ;;  %v3537_v26 = vmul.f32 %v4822_v39, %v4822_v39  ;;  %v2132_v3 = vpop.f32.mrb[27].mxu1 }
 0x224   : > { %v3448_v29 = vadd.f32 %v3447_v25, %v6332_v1  ;;  %3427 = vst.msk [vmem:[%s6214_s9 + $0xc0] sm:$0xff] %vm269_vm1, %v4823_v36  ;;  %v3440_v37 = vsel %vm269_vm1, %v4823_v36, 0.0  ;;  %v3536_v33 = vmul.f32 %v4823_v36, %v4823_v36  ;;  %v4789_v59 = vpop.f32.mrb[26].mxu0 }
 0x225   : > { %v3556_v60 = vsel %vm269_vm1, %v3537_v26, 0.0  ;;  %v3441_v20 = vadd.f32 %v3440_v37, %v6339_v44  ;;  %v4824_v34 = vadd.f32 %v4789_v59, %v4589_v32  ;;  %v3342_v13 = vpop.f32.mrb[27].mxu0 }
 0x226   : > { %v3492_v31 = vsel %vm269_vm1, %v3448_v29, 0.0  ;;  %v3557_v46 = vadd.f32 %v3556_v60, %v6342_v2  ;;  %v3549_v1 = vsel %vm269_vm1, %v3536_v33, 0.0  ;;  %v4825_v47 = vadd.f32 %v3342_v13, %v2132_v3  ;;  %v4592_v44 = vpop.f32.mrb[28].mxu1 }
 0x227   : > { %v3491_v8 = vsel %vm269_vm1, %v3441_v20, 0.0  ;;  %v3550_v48 = vadd.f32 %v3549_v1, %v6346_v22  ;;  %3430 = vst.msk [vmem:[%s6214_s9 + $0xd8] sm:$0xff] %vm269_vm1, %v4824_v34  ;;  %v3461_v50 = vsel %vm269_vm1, %v4824_v34, 0.0  ;;  %v3539_v51 = vmul.f32 %v4824_v34, %v4824_v34  ;;  %v2142_v38 = vpop.f32.mrb[29].mxu1 }
 0x228   : > { %v3601_v24 = vsel %vm269_vm1, %v3557_v46, 0.0  ;;  %v3493_v52 = vadd.f32 %v3492_v31, %v3491_v8  ;;  %v3462_v54 = vadd.f32 %v3461_v50, %v6352_v58  ;;  %3429 = vst.msk [vmem:[%s6214_s9 + $0xd0] sm:$0xff] %vm269_vm1, %v4825_v47  ;;  %v3454_v2 = vsel %vm269_vm1, %v4825_v47, 0.0  ;;  %v4792_v55 = vpop.f32.mrb[28].mxu0 }
 0x229   : > { %v3600_v22 = vsel %vm269_vm1, %v3550_v48, 0.0  ;;  %v3570_v62 = vsel %vm269_vm1, %v3539_v51, 0.0  ;;  %v3455_v63 = vadd.f32 %v3454_v2, %v6359_v40  ;;  %v3538_v0 = vmul.f32 %v4825_v47, %v4825_v47  ;;  %v3352_v45 = vpop.f32.mrb[29].mxu0 }
 0x22a   : > { %v3602_v10 = vadd.f32 %v3601_v24, %v3600_v22  ;;  %v3571_v11 = vadd.f32 %v3570_v62, %v6362_v42  ;;  %v4826_v58 = vadd.f32 %v4792_v55, %v4592_v44  ;;  %v4827_v6 = vadd.f32 %v3352_v45, %v2142_v38  ;;  %v4595_v17 = vpop.f32.mrb[30].mxu1 }
 0x22b   : > { %v3494_v12 = vsel %vm269_vm1, %v3455_v63, 0.0  ;;  %v3563_v49 = vsel %vm269_vm1, %v3538_v0, 0.0  ;;  %v3496_v4 = vsel %vm269_vm1, %v3462_v54, 0.0  ;;  %v2152_v27 = vpop.f32.mrb[31].mxu1 }
 0x22c   : > { %v3495_v43 = vadd.f32 %v3494_v12, %v3493_v52  ;;  %v3564_v61 = vadd.f32 %v3563_v49, %v6366_v56  ;;  %3432 = vst.msk [vmem:[%s6214_s9 + $0xe8] sm:$0xff] %vm269_vm1, %v4826_v58  ;;  %v3475_v40 = vsel %vm269_vm1, %v4826_v58, 0.0  ;;  %v4795_v53 = vpop.f32.mrb[30].mxu0  ;;  %v3541_v9 = vmul.f32 %v4826_v58, %v4826_v58  ;;  %3431 = vst.msk [vmem:[%s6214_s9 + $0xe0] sm:$0xff] %vm269_vm1, %v4827_v6 }
 0x22d   : > { %v3476_v42 = vadd.f32 %v3475_v40, %v6372_v7  ;;  %v3468_v28 = vsel %vm269_vm1, %v4827_v6, 0.0  ;;  %v3540_v35 = vmul.f32 %v4827_v6, %v4827_v6  ;;  %v3362_v5 = vpop.f32.mrb[31].mxu0  ;;  %v4828_v41 = vadd.f32 %v4795_v53, %v4595_v17 }
 0x22e   : > { %v3603_v14 = vsel %vm269_vm1, %v3564_v61, 0.0  ;;  %v3469_v56 = vadd.f32 %v3468_v28, %v6379_v15  ;;  %v3497_v39 = vadd.f32 %v3496_v4, %v3495_v43  ;;  %v3605_v19 = vsel %vm269_vm1, %v3571_v11, 0.0 }
 0x22f   : > { %v3604_v36 = vadd.f32 %v3603_v14, %v3602_v10  ;;  %v3584_v25 = vsel %vm269_vm1, %v3541_v9, 0.0  ;;  %v3577_v7 = vsel %vm269_vm1, %v3540_v35, 0.0  ;;  %3434 = vst.msk [vmem:[%s6214_s9 + $0xf8] sm:$0xff] %vm269_vm1, %v4828_v41  ;;  %v3489_v15 = vsel %vm269_vm1, %v4828_v41, 0.0 }
 0x230   : > { %v3585_v26 = vadd.f32 %v3584_v25, %v6382_v18  ;;  %v3498_v32 = vsel %vm269_vm1, %v3469_v56, 0.0  ;;  %v3578_v29 = vadd.f32 %v3577_v7, %v6386_v21  ;;  %v3490_v3 = vadd.f32 %v3489_v15, %v6392_v57 }
 0x231   : > { %v3499_v37 = vadd.f32 %v3498_v32, %v3497_v39  ;;  %v3606_v33 = vadd.f32 %v3605_v19, %v3604_v36  ;;  %v3543_v59 = vmul.f32 %v4828_v41, %v4828_v41  ;;  %v3500_v60 = vsel %vm269_vm1, %v3476_v42, 0.0 }
 0x232   : > { %v3607_v20 = vsel %vm269_vm1, %v3578_v29, 0.0  ;;  %v4829_v34 = vadd.f32 %v3362_v5, %v2152_v27  ;;  %v3609_v21 = vsel %vm269_vm1, %v3585_v26, 0.0  ;;  %v3504_v24 = vsel %vm269_vm1, %v3490_v3, 0.0 }
 0x233   : > { %v3608_v18 = vadd.f32 %v3607_v20, %v3606_v33  ;;  %v3598_v13 = vsel %vm269_vm1, %v3543_v59, 0.0  ;;  %v3501_v31 = vadd.f32 %v3500_v60, %v3499_v37 }
 0x234   : > { %v3599_v46 = vadd.f32 %v3598_v13, %v6402_v30  ;;  %3433 = vst.msk [vmem:[%s6214_s9 + $0xf0] sm:$0xff] %vm269_vm1, %v4829_v34  ;;  %v3482_v1 = vsel %vm269_vm1, %v4829_v34, 0.0  ;;  %v3542_v47 = vmul.f32 %v4829_v34, %v4829_v34 }
 0x235   : > { %v3483_v57 = vadd.f32 %v3482_v1, %v6399_v23  ;;  %v3610_v8 = vadd.f32 %v3609_v21, %v3608_v18 }
 0x236   : > { %v3591_v48 = vsel %vm269_vm1, %v3542_v47, 0.0  ;;  %v3613_v2 = vsel %vm269_vm1, %v3599_v46, 0.0 }
 0x237   : > { %v3502_v50 = vsel %vm269_vm1, %v3483_v57, 0.0  ;;  %v3592_v51 = vadd.f32 %v3591_v48, %v6406_v16 }
 0x238   : > { %v3503_v44 = vadd.f32 %v3502_v50, %v3501_v31 }
 0x239   : > { %v3611_v30 = vsel %vm269_vm1, %v3592_v51, 0.0 }
 0x23a   : > { %v3505_v52 = vadd.f32 %v3504_v24, %v3503_v44  ;;  %v3612_v54 = vadd.f32 %v3611_v30, %v3610_v8 }
 0x23c   : > { %v3506_v38 = vrot.slane %v3505_v52, 4  ;;  %v3614_v23 = vadd.f32 %v3613_v2, %v3612_v54 }
 0x23e   : > { %v3507_v55 = vadd.f32 %v3506_v38, %v3505_v52  ;;  %v3615_v22 = vrot.slane %v3614_v23, 4 }
 0x240   : > { %v3508_v62 = vrot.slane %v3507_v55, 2  ;;  %v3616_v63 = vadd.f32 %v3615_v22, %v3614_v23 }
 0x242   : > { %v3509_v0 = vadd.f32 %v3508_v62, %v3507_v55  ;;  %v3617_v45 = vrot.slane %v3616_v63, 2 }
 0x244   : > { %v3510_v16 = vrot.slane %v3509_v0, 1  ;;  %v3618_v10 = vadd.f32 %v3617_v45, %v3616_v63 }
 0x246   : > { %v3511_v11 = vadd.f32 %v3510_v16, %v3509_v0  ;;  %v3619_v58 = vrot.slane %v3618_v10, 1 }
 0x248   : > { %v3620_v12 = vadd.f32 %v3619_v58, %v3618_v10  ;;  %3622 = vst.msk [vmem:[%s265_s11] sm:$0x1] %vm3621_vm3, %v3511_v11 }
 0x24a   : > { %3623 = vst.msk [vmem:[%s268_s14] sm:$0x1] %vm3621_vm3, %v3620_v12 }
 0x24b PF: > { %s17_s21 = sadd.s32 1, %s5070_s21  }
 0x24c   : > { %p14_p4 = scmp.ge.s32.totalorder %s17_s21, 4  }
 0x24e   :  { %16 = sbr.rel (!%p14_p4) target bundleno = 1 (0x1), region = 106 }

// kernel: decoder_layer_forward.3
= control target key start
LH: loop header
LB: loop body
LE: loop exit
PB: predicated region body
PF: predicated region fallthrough
CT: control target
= control target key end

     0   :  { %s5452_s24 = smov 0   ;;  %s6896_s0 = inlined_call_operand.vmem [shape: f32[2,8,8,8], index: 0, kind: input, shape index: {}]   ;;  %s6897_s1 = inlined_call_operand.vmem [shape: f32[2,4,8,8,4], index: 1, kind: input, shape index: {}]   ;;  %s6898_s2 = inlined_call_operand.vmem [shape: f32[8,16], index: 2, kind: input, shape index: {}]   ;;  %s6899_s3 = inlined_call_operand.vmem [shape: f32[1,16], index: 3, kind: input, shape index: {}]   ;;  %s6900_s4 = inlined_call_operand.vmem [shape: f32[9,8,4], index: 4, kind: input, shape index: {}]   ;;  %s6901_s5 = inlined_call_operand.vmem [shape: f32[2,4,8,8,4], index: 5, kind: output, shape index: {0}]   ;;  %s6902_s6 = inlined_call_operand.vmem [shape: f32[2,1,4], index: 6, kind: output, shape index: {1}]   ;;  %s6903_s7 = inlined_call_operand.vmem [shape: f32[2,1,4], index: 7, kind: output, shape index: {2}]  }
   0x1 LB: > { %s4037_s25 = sadd.s32 4294967295, %s5405_s24   ;;  %p4041_p0 = scmp.ge.s32.totalorder %s5405_s24, 1  ;;  %s5405_s24 = sphi %s5452_s24, %s18_s24  }
   0x2   : > { %p252_p1 = scmp.lt.s32.totalorder %s5405_s24, 3 }
   0x4   : > { %p253_p2 = pnand %p4041_p0, %p252_p1 }
   0x6   : > { %256 = sbr.rel (%p253_p2) target bundleno = 931 (0x3a3), region = 40 }
   0xd   : > { %v406_v0 = vld [vmem:[%s6898_s2] sm:$0xff]  ;;  %p295_p3 = scmp.lt.s32.totalorder %s4037_s25, 1  ;;  %vm316_vm0 = vcmask 64512   ;;  %s5407_s13 = smov 4   ;;  %vm318_vm1 = vcmask 58368   ;;  %v5408_v22 = vmov 0.0  }
   0xe   : > { %4664 = vmatprep.subr.mxu0 %v406_v0  ;;  %362 = vst.msk [vmem:[#allocation2 + $0x160] sm:$0xff] %vm316_vm0, %v5408_v22  ;;  %320 = vst.msk [vmem:[#allocation2 + $0x10] sm:$0xff] %vm316_vm0, %v5408_v22  ;;  %v4048_v23 = vld [vmem:[%s6899_s3] ss:$0 sm:$0xff]  ;;  %vm544_vm2 = vcmask 31744   ;;  %s5409_s18 = smov 120  }
   0xf   : > { %4665 = vmatpush3.msra.mxu0 %v406_v0  ;;  %s6920_s25 = smov (!%p295_p3, %s4037_s25), 1  ;;  %363 = vst.msk [vmem:[#allocation2 + $0x168] sm:$0x3] %vm318_vm1, %v5408_v22  ;;  %321 = vst.msk [vmem:[#allocation2 + $0x18] sm:$0x3] %vm318_vm1, %v5408_v22  ;;  %v887_v24 = vld [vmem:[%s6900_s4] sm:$0xff] }
  0x10   : > { %s4355_s28 = sshll.u32 %s6920_s25, 6  ;;  %s4356_s29 = sshll.u32 %s6920_s25, 8  ;;  %322 = vst.msk [vmem:[#allocation2 + $0x20] sm:$0xff] %vm316_vm0, %v5408_v22  ;;  %324 = vst.msk [vmem:[#allocation2 + $0x30] sm:$0xff] %vm316_vm0, %v5408_v22  ;;  %4678 = vmatprep.subr.mxu0 %v887_v24  ;;  %v5693_v42 = vld [vmem:[%s6900_s4 + $0x20] sm:$0xff]  ;;  %v5706_v45 = vld [vmem:[%s6900_s4 + $0x28] sm:$0xff] }
  0x11   : > { %s299_s9 = scalar_lea.vmem %s6896_s0, %s4355_s28  ;;  %s5475_s12 = scalar_lea.vmem %s6897_s1, %s4356_s29  ;;  %323 = vst.msk [vmem:[#allocation2 + $0x28] sm:$0x3] %vm318_vm1, %v5408_v22  ;;  %325 = vst.msk [vmem:[#allocation2 + $0x38] sm:$0x3] %vm318_vm1, %v5408_v22  ;;  %5128 = vmatprep.subr.mxu1 %v5693_v42  ;;  %v5714_v46 = vld [vmem:[%s6900_s4 + $0x8] sm:$0xff]  ;;  %vm820_vm3 = vcmask 64544  }
  0x12   : > { %v398_v1 = vld [vmem:[%s299_s9] sm:$0xff]  ;;  %v399_v2 = vld [vmem:[%s299_s9 + $0x8] sm:$0xff]  ;;  %v400_v3 = vld [vmem:[%s299_s9 + $0x10] sm:$0xff]  ;;  %326 = vst.msk [vmem:[#allocation2 + $0x40] sm:$0xff] %vm316_vm0, %v5408_v22  ;;  %s5410_s19 = smov 116   ;;  %s5411_s22 = smov 124   ;;  %5129 = vmatpush3.msra.mxu1 %v5693_v42 }
  0x13   : > { %4666 = vmatprep.mubr.msk.f32.mxu0 %vm316_vm0, %v398_v1  ;;  %v672_v4 = vld [vmem:[%s5475_s12 + $0x60] sm:$0xff]  ;;  %v401_v5 = vld [vmem:[%s299_s9 + $0x18] sm:$0xff]  ;;  %v673_v8 = vld [vmem:[%s5475_s12 + $0x68] sm:$0xff]  ;;  %327 = vst.msk [vmem:[#allocation2 + $0x48] sm:$0x3] %vm318_vm1, %v5408_v22  ;;  %4928 = vmatprep.subr.mxu1 %v5706_v45  ;;  %s312_s21 = scalar_lea.vmem %s6902_s6, %s6920_s25  ;;  %vm3917_vm4 = vcmask 24576   ;;  %s315_s26 = scalar_lea.vmem %s6903_s7, %s6920_s25 }
  0x14   : > { %4667 = vmatmul.mubr.msk.f32.vlgmr.msra.gmra.mrb[0].mxu0 %vm316_vm0, %v399_v2  ;;  %748 = vrot.lane.b32.xlu1 %v672_v4, %s5407_s13  ;;  %v675_v6 = vld [vmem:[%s5475_s12 + $0x78] sm:$0xff]  ;;  %v402_v7 = vld [vmem:[%s299_s9 + $0x20] sm:$0xff]  ;;  %v403_v10 = vld [vmem:[%s299_s9 + $0x28] sm:$0xff]  ;;  %328 = vst.msk [vmem:[#allocation2 + $0x50] sm:$0xff] %vm316_vm0, %v5408_v22 }
  0x15   : > { %4669 = vmatprep.mubr.msk.f32.mxu0 %vm316_vm0, %v400_v3  ;;  %754 = vrot.lane.b32.xlu0 %v675_v6, %s5407_s13  ;;  %v676_v9 = vld [vmem:[%s5475_s12 + $0x80] sm:$0xff]  ;;  %v404_v11 = vld [vmem:[%s299_s9 + $0x30] sm:$0xff]  ;;  %v677_v13 = vld [vmem:[%s5475_s12 + $0x88] sm:$0xff]  ;;  %329 = vst.msk [vmem:[#allocation2 + $0x58] sm:$0x3] %vm318_vm1, %v5408_v22 }
  0x16   : > { %v674_v12 = vld [vmem:[%s5475_s12 + $0x70] sm:$0xff]  ;;  %v405_v14 = vld [vmem:[%s299_s9 + $0x38] sm:$0xff]  ;;  %v684_v15 = vld [vmem:[%s5475_s12 + $0xc0] sm:$0xff]  ;;  %330 = vst.msk [vmem:[#allocation2 + $0x60] sm:$0xff] %vm316_vm0, %v5408_v22  ;;  %4679 = vmatpush3.msra.mxu0 %v887_v24 }
  0x17   : > { %v678_v16 = vld [vmem:[%s5475_s12 + $0x90] sm:$0xff]  ;;  %v685_v17 = vld [vmem:[%s5475_s12 + $0xc8] sm:$0xff]  ;;  %v679_v18 = vld [vmem:[%s5475_s12 + $0x98] sm:$0xff]  ;;  %331 = vst.msk [vmem:[#allocation2 + $0x68] sm:$0x3] %vm318_vm1, %v5408_v22  ;;  %4728 = vmatprep.subr.mxu0 %v5714_v46 }
  0x18   : > { %4670 = vmatmul.mubr.msk.f32.gmra.mrb[2].mxu0 %vm316_vm0, %v401_v5  ;;  %750 = vrot.lane.b32.xlu1 %v673_v8, %s5407_s13  ;;  %v686_v19 = vld [vmem:[%s5475_s12 + $0xd0] sm:$0xff]  ;;  %v687_v20 = vld [vmem:[%s5475_s12 + $0xd8] sm:$0xff]  ;;  %v688_v21 = vld [vmem:[%s5475_s12 + $0xe0] sm:$0xff]  ;;  %332 = vst.msk [vmem:[#allocation2 + $0x70] sm:$0xff] %vm316_vm0, %v5408_v22 }
  0x19   : > { %4672 = vmatprep.mubr.msk.f32.mxu0 %vm316_vm0, %v402_v7  ;;  %756 = vrot.lane.b32.xlu0 %v676_v9, %s5407_s13  ;;  %333 = vst.msk [vmem:[#allocation2 + $0x78] sm:$0x3] %vm318_vm1, %v5408_v22  ;;  %335 = vst.msk [vmem:[#allocation2 + $0x88] sm:$0x3] %vm318_vm1, %v5408_v22  ;;  %v689_v43 = vld [vmem:[%s5475_s12 + $0xe8] sm:$0xff]  ;;  %v690_v44 = vld [vmem:[%s5475_s12 + $0xf0] sm:$0xff] }
  0x1a   : > { %334 = vst.msk [vmem:[#allocation2 + $0x80] sm:$0xff] %vm316_vm0, %v5408_v22  ;;  %336 = vst.msk [vmem:[#allocation2 + $0x90] sm:$0xff] %vm316_vm0, %v5408_v22  ;;  %v683_v47 = vld [vmem:[%s5475_s12 + $0xb8] sm:$0xff]  ;;  %v680_v48 = vld [vmem:[%s5475_s12 + $0xa0] sm:$0xff] }
  0x1b   : > { %337 = vst.msk [vmem:[#allocation2 + $0x98] sm:$0x3] %vm318_vm1, %v5408_v22  ;;  %341 = vst.msk [vmem:[#allocation2 + $0xb8] sm:$0x3] %vm318_vm1, %v5408_v22  ;;  %v681_v49 = vld [vmem:[%s5475_s12 + $0xa8] sm:$0xff]  ;;  %v668_v50 = vld [vmem:[%s5475_s12 + $0x40] sm:$0xff] }
  0x1c   : > { %4673 = vmatmul.mubr.msk.f32.gmra.mrb[4].mxu0 %vm316_vm0, %v403_v10  ;;  %752 = vrot.lane.b32.xlu1 %v674_v12, %s5407_s13  ;;  %340 = vst.msk [vmem:[#allocation2 + $0xb0] sm:$0xff] %vm316_vm0, %v5408_v22  ;;  %342 = vst.msk [vmem:[#allocation2 + $0xc0] sm:$0xff] %vm316_vm0, %v5408_v22  ;;  %v691_v51 = vld [vmem:[%s5475_s12 + $0xf8] sm:$0xff]  ;;  %v682_v52 = vld [vmem:[%s5475_s12 + $0xb0] sm:$0xff] }
  0x1d   : > { %4675 = vmatprep.mubr.msk.f32.mxu0 %vm316_vm0, %v404_v11  ;;  %758 = vrot.lane.b32.xlu0 %v677_v13, %s5407_s13  ;;  %343 = vst.msk [vmem:[#allocation2 + $0xc8] sm:$0x3] %vm318_vm1, %v5408_v22  ;;  %345 = vst.msk [vmem:[#allocation2 + $0xd8] sm:$0x3] %vm318_vm1, %v5408_v22  ;;  %v671_v53 = vld [vmem:[%s5475_s12 + $0x58] sm:$0xff]  ;;  %v669_v54 = vld [vmem:[%s5475_s12 + $0x48] sm:$0xff] }
  0x1e   : > { %344 = vst.msk [vmem:[#allocation2 + $0xd0] sm:$0xff] %vm316_vm0, %v5408_v22  ;;  %346 = vst.msk [vmem:[#allocation2 + $0xe0] sm:$0xff] %vm316_vm0, %v5408_v22  ;;  %v661_v55 = vld [vmem:[%s5475_s12 + $0x8] sm:$0xff]  ;;  %v663_v56 = vld [vmem:[%s5475_s12 + $0x18] sm:$0xff] }
  0x1f   : > { %347 = vst.msk [vmem:[#allocation2 + $0xe8] sm:$0x3] %vm318_vm1, %v5408_v22  ;;  %349 = vst.msk [vmem:[#allocation2 + $0xf8] sm:$0x3] %vm318_vm1, %v5408_v22  ;;  %v670_v58 = vld [vmem:[%s5475_s12 + $0x50] sm:$0xff]  ;;  %v665_v59 = vld [vmem:[%s5475_s12 + $0x28] sm:$0xff] }
  0x20   : > { %4676 = vmatmul.mubr.msk.f32.gmra.mrb[6].mxu0 %vm316_vm0, %v405_v14  ;;  %772 = vrot.lane.b32.xlu1 %v684_v15, %s5407_s13  ;;  %348 = vst.msk [vmem:[#allocation2 + $0xf0] sm:$0xff] %vm316_vm0, %v5408_v22  ;;  %350 = vst.msk [vmem:[#allocation2 + $0x100] sm:$0xff] %vm316_vm0, %v5408_v22  ;;  %v660_v61 = vld [vmem:[%s5475_s12] sm:$0xff]  ;;  %v667_v62 = vld [vmem:[%s5475_s12 + $0x38] sm:$0xff] }
  0x21   : > { %760 = vrot.lane.b32.xlu0 %v678_v16, %s5407_s13  ;;  %351 = vst.msk [vmem:[#allocation2 + $0x108] sm:$0x3] %vm318_vm1, %v5408_v22  ;;  %353 = vst.msk [vmem:[#allocation2 + $0x118] sm:$0x3] %vm318_vm1, %v5408_v22  ;;  %v662_v63 = vld [vmem:[%s5475_s12 + $0x10] sm:$0xff]  ;;  %v664_v1 = vld [vmem:[%s5475_s12 + $0x20] sm:$0xff] }
  0x22   : > { %352 = vst.msk [vmem:[#allocation2 + $0x110] sm:$0xff] %vm316_vm0, %v5408_v22  ;;  %354 = vst.msk [vmem:[#allocation2 + $0x120] sm:$0xff] %vm316_vm0, %v5408_v22  ;;  %v666_v4 = vld [vmem:[%s5475_s12 + $0x30] sm:$0xff] }
  0x23   : > { %355 = vst.msk [vmem:[#allocation2 + $0x128] sm:$0x3] %vm318_vm1, %v5408_v22  ;;  %357 = vst.msk [vmem:[#allocation2 + $0x138] sm:$0x3] %vm318_vm1, %v5408_v22 }
  0x24   : > { %774 = vrot.lane.b32.xlu1 %v685_v17, %s5407_s13  ;;  %356 = vst.msk [vmem:[#allocation2 + $0x130] sm:$0xff] %vm316_vm0, %v5408_v22  ;;  %358 = vst.msk [vmem:[#allocation2 + $0x140] sm:$0xff] %vm316_vm0, %v5408_v22 }
  0x25   : > { %762 = vrot.lane.b32.xlu0 %v679_v18, %s5407_s13  ;;  %359 = vst.msk [vmem:[#allocation2 + $0x148] sm:$0x3] %vm318_vm1, %v5408_v22  ;;  %361 = vst.msk [vmem:[#allocation2 + $0x158] sm:$0x3] %vm318_vm1, %v5408_v22 }
  0x26   : > { %360 = vst.msk [vmem:[#allocation2 + $0x150] sm:$0xff] %vm316_vm0, %v5408_v22  ;;  %364 = vst.msk [vmem:[#allocation2 + $0x170] sm:$0xff] %vm316_vm0, %v5408_v22 }
  0x27   : > { %365 = vst.msk [vmem:[#allocation2 + $0x178] sm:$0x3] %vm318_vm1, %v5408_v22  ;;  %367 = vst.msk [vmem:[#allocation2 + $0x188] sm:$0x3] %vm318_vm1, %v5408_v22 }
  0x28   : > { %776 = vrot.lane.b32.xlu1 %v686_v19, %s5407_s13  ;;  %366 = vst.msk [vmem:[#allocation2 + $0x180] sm:$0xff] %vm316_vm0, %v5408_v22  ;;  %368 = vst.msk [vmem:[#allocation2 + $0x190] sm:$0xff] %vm316_vm0, %v5408_v22 }
  0x29   : > { %369 = vst.msk [vmem:[#allocation2 + $0x198] sm:$0x3] %vm318_vm1, %v5408_v22  ;;  %371 = vst.msk [vmem:[#allocation2 + $0x1a8] sm:$0x3] %vm318_vm1, %v5408_v22 }
  0x2a   : > { %370 = vst.msk [vmem:[#allocation2 + $0x1a0] sm:$0xff] %vm316_vm0, %v5408_v22  ;;  %372 = vst.msk [vmem:[#allocation2 + $0x1b0] sm:$0xff] %vm316_vm0, %v5408_v22 }
  0x2b   : > { %373 = vst.msk [vmem:[#allocation2 + $0x1b8] sm:$0x3] %vm318_vm1, %v5408_v22  ;;  %375 = vst.msk [vmem:[#allocation2 + $0x1c8] sm:$0x3] %vm318_vm1, %v5408_v22 }
  0x2c   : > { %778 = vrot.lane.b32.xlu1 %v687_v20, %s5407_s13  ;;  %374 = vst.msk [vmem:[#allocation2 + $0x1c0] sm:$0xff] %vm316_vm0, %v5408_v22  ;;  %378 = vst.msk [vmem:[#allocation2 + $0x1e0] sm:$0xff] %vm316_vm0, %v5408_v22 }
  0x2d   : > { %379 = vst.msk [vmem:[#allocation2 + $0x1e8] sm:$0x3] %vm318_vm1, %v5408_v22  ;;  %381 = vst.msk [vmem:[#allocation2 + $0x1f8] sm:$0x3] %vm318_vm1, %v5408_v22 }
  0x2e   : > { %380 = vst.msk [vmem:[#allocation2 + $0x1f0] sm:$0xff] %vm316_vm0, %v5408_v22  ;;  %382 = vst.msk [vmem:[#allocation2 + $0x200] sm:$0xff] %vm316_vm0, %v5408_v22 }
  0x2f   : > { %383 = vst.msk [vmem:[#allocation2 + $0x208] sm:$0x3] %vm318_vm1, %v5408_v22  ;;  %385 = vst.msk [vmem:[#allocation2 + $0x218] sm:$0x3] %vm318_vm1, %v5408_v22 }
  0x30   : > { %780 = vrot.lane.b32.xlu1 %v688_v21, %s5407_s13  ;;  %384 = vst.msk [vmem:[#allocation2 + $0x210] sm:$0xff] %vm316_vm0, %v5408_v22  ;;  %386 = vst.msk [vmem:[#allocation2 + $0x220] sm:$0xff] %vm316_vm0, %v5408_v22 }
  0x31   : > { %387 = vst.msk [vmem:[#allocation2 + $0x228] sm:$0x3] %vm318_vm1, %v5408_v22  ;;  %389 = vst.msk [vmem:[#allocation2 + $0x238] sm:$0x3] %vm318_vm1, %v5408_v22 }
  0x32   : > { %388 = vst.msk [vmem:[#allocation2 + $0x230] sm:$0xff] %vm316_vm0, %v5408_v22  ;;  %390 = vst.msk [vmem:[#allocation2 + $0x240] sm:$0xff] %vm316_vm0, %v5408_v22 }
  0x33   : > { %391 = vst.msk [vmem:[#allocation2 + $0x248] sm:$0x3] %vm318_vm1, %v5408_v22  ;;  %393 = vst.msk [vmem:[#allocation2 + $0x258] sm:$0x3] %vm318_vm1, %v5408_v22  ;;  %v854_v28 = vld [vmem:[#allocation2 + $0x1e0] sm:$0xff] }
  0x34   : > { %392 = vst.msk [vmem:[#allocation2 + $0x250] sm:$0xff] %vm316_vm0, %v5408_v22  ;;  %394 = vst.msk [vmem:[#allocation2 + $0x260] sm:$0xff] %vm316_vm0, %v5408_v22  ;;  %4680 = vmatprep.mubr.msk.f32.mxu0 %vm316_vm0, %v854_v28 }
  0x35   : > { %395 = vst.msk [vmem:[#allocation2 + $0x268] sm:$0x3] %vm318_vm1, %v5408_v22  ;;  %v5788_v22 = vld [vmem:[%s6900_s4 + $0x10] sm:$0xff] }
  0x86   : > { %v5746_v57 = vpop.permute.xlu1 %748 }
  0x87   : > { %v755_v2 = vpop.permute.xlu0 %754 }
  0x8a   : > { %v5754_v60 = vpop.permute.xlu1 %750 }
  0x8b   : > { %v757_v5 = vpop.permute.xlu0 %756 }
  0x8e   : > { %v5762_v0 = vpop.permute.xlu1 %752 }
  0x8f   : > { %v759_v7 = vpop.permute.xlu0 %758 }
  0x92   : > { %v773_v3 = vpop.permute.xlu1 %772 }
  0x93   : > { %v761_v9 = vpop.permute.xlu0 %760 }
  0x96   : > { %v775_v6 = vpop.permute.xlu1 %774 }
  0x97   : > { %v763_v11 = vpop.permute.xlu0 %762 }
  0x9a   : > { %v777_v8 = vpop.permute.xlu1 %776 }
  0x9e   : > { %v779_v10 = vpop.permute.xlu1 %778 }
  0xa2   : > { %v781_v12 = vpop.permute.xlu1 %780 }
  0xe7   : > { %v4668_v25 = vpop.f32.mrb[0].mxu0 }
  0xe8   : > { %v510_v26 = vadd.f32 %v4668_v25, %v4048_v23  ;;  %v504_v27 = vpop.f32.mrb[1].mxu0 }
  0xe9   : > { %v5661_v29 = vadd.f32 %v4048_v23, %v504_v27 }
  0xea   : > { %596 = vrot.lane.b32.xlu0 %v510_v26, %s5409_s18  ;;  %629 = vrot.lane.b32.xlu1 %v510_v26, %s5410_s19  ;;  %546 = vst.msk [vmem:[#allocation2 + $0x21] sm:$0xff] %vm544_vm2, %v510_v26 }
  0xeb   : > { %v4671_v30 = vpop.f32.mrb[2].mxu0  ;;  %545 = vst.msk [vmem:[#allocation2 + $0x11] sm:$0xff] %vm544_vm2, %v5661_v29 }
  0xec   : > { %v520_v31 = vadd.f32 %v4671_v30, %v4048_v23  ;;  %v514_v32 = vpop.f32.mrb[3].mxu0 }
  0xed   : > { %v5669_v33 = vadd.f32 %v4048_v23, %v514_v32 }
  0xee   : > { %633 = vrot.lane.b32.xlu1 %v520_v31, %s5410_s19  ;;  %627 = vrot.lane.b32.xlu0 %v5661_v29, %s5410_s19  ;;  %548 = vst.msk [vmem:[#allocation2 + $0x41] sm:$0xff] %vm544_vm2, %v520_v31 }
  0xef   : > { %v4674_v34 = vpop.f32.mrb[4].mxu0  ;;  %547 = vst.msk [vmem:[#allocation2 + $0x31] sm:$0xff] %vm544_vm2, %v5669_v33 }
  0xf0   : > { %v530_v35 = vadd.f32 %v4674_v34, %v4048_v23  ;;  %v524_v36 = vpop.f32.mrb[5].mxu0 }
  0xf1   : > { %v525_v37 = vadd.f32 %v4048_v23, %v524_v36 }
  0xf2   : > { %631 = vrot.lane.b32.xlu1 %v5669_v33, %s5410_s19  ;;  %594 = vrot.lane.b32.xlu0 %v5661_v29, %s5409_s18  ;;  %550 = vst.msk [vmem:[#allocation2 + $0x61] sm:$0xff] %vm544_vm2, %v530_v35 }
  0xf3   : > { %v4677_v38 = vpop.f32.mrb[6].mxu0  ;;  %549 = vst.msk [vmem:[#allocation2 + $0x51] sm:$0xff] %vm544_vm2, %v525_v37 }
  0xf4   : > { %v540_v39 = vadd.f32 %v4677_v38, %v4048_v23  ;;  %v534_v40 = vpop.f32.mrb[7].mxu0 }
  0xf5   : > { %v535_v41 = vadd.f32 %v4048_v23, %v534_v40  ;;  %v5843_v40 = vld [vmem:[%s6900_s4 + $0x30] sm:$0xff] }
  0xf6   : > { %637 = vrot.lane.b32.xlu1 %v530_v35, %s5410_s19  ;;  %600 = vrot.lane.b32.xlu0 %v520_v31, %s5409_s18  ;;  %552 = vst.msk [vmem:[#allocation2 + $0x81] sm:$0xff] %vm544_vm2, %v540_v39 }
  0xf7   : > { %551 = vst.msk [vmem:[#allocation2 + $0x71] sm:$0xff] %vm544_vm2, %v535_v41 }
  0xfa   : > { %635 = vrot.lane.b32.xlu1 %v525_v37, %s5410_s19  ;;  %598 = vrot.lane.b32.xlu0 %v5669_v33, %s5409_s18 }
  0xfe   : > { %575 = vrot.lane.b32.xlu1 %v540_v39, %s5411_s22  ;;  %571 = vrot.lane.b32.xlu0 %v530_v35, %s5411_s22 }
 0x102   : > { %782 = vrot.lane.b32.xlu1 %v689_v43, %s5407_s13  ;;  %569 = vrot.lane.b32.xlu0 %v525_v37, %s5411_s22 }
 0x106   : > { %784 = vrot.lane.b32.xlu1 %v690_v44, %s5407_s13  ;;  %602 = vrot.lane.b32.xlu0 %v525_v37, %s5409_s18 }
 0x10a   : > { %639 = vrot.lane.b32.xlu1 %v535_v41, %s5410_s19  ;;  %573 = vrot.lane.b32.xlu0 %v535_v41, %s5411_s22 }
 0x10e   : > { %608 = vrot.lane.b32.xlu1 %v540_v39, %s5409_s18  ;;  %604 = vrot.lane.b32.xlu0 %v530_v35, %s5409_s18 }
 0x112   : > { %770 = vrot.lane.b32.xlu1 %v683_v47, %s5407_s13  ;;  %764 = vrot.lane.b32.xlu0 %v680_v48, %s5407_s13  ;;  %v5851_v47 = vld [vmem:[#allocation2 + $0x141] sm:$0xff] }
 0x116   : > { %563 = vrot.lane.b32.xlu1 %v510_v26, %s5411_s22  ;;  %766 = vrot.lane.b32.xlu0 %v681_v49, %s5407_s13 }
 0x11a   : > { %740 = vrot.lane.b32.xlu1 %v668_v50, %s5407_s13  ;;  %606 = vrot.lane.b32.xlu0 %v535_v41, %s5409_s18 }
 0x11e   : > { %786 = vrot.lane.b32.xlu1 %v691_v51, %s5407_s13  ;;  %768 = vrot.lane.b32.xlu0 %v682_v52, %s5407_s13 }
 0x122   : > { %567 = vrot.lane.b32.xlu1 %v520_v31, %s5411_s22  ;;  %561 = vrot.lane.b32.xlu0 %v5661_v29, %s5411_s22 }
 0x126   : > { %641 = vrot.lane.b32.xlu0 %v540_v39, %s5410_s19  ;;  %746 = vrot.lane.b32.xlu1 %v671_v53, %s5407_s13  ;;  %s6615_s19 = scalar_lea.vmem %s6901_s5, %s4356_s29 }
 0x12a   : > { %742 = vrot.lane.b32.xlu0 %v669_v54, %s5407_s13  ;;  %726 = vrot.lane.b32.xlu1 %v661_v55, %s5407_s13 }
 0x12e   : > { %565 = vrot.lane.b32.xlu0 %v5669_v33, %s5411_s22  ;;  %730 = vrot.lane.b32.xlu1 %v663_v56, %s5407_s13 }
 0x132   : > { %744 = vrot.lane.b32.xlu0 %v670_v58, %s5407_s13  ;;  %734 = vrot.lane.b32.xlu1 %v665_v59, %s5407_s13 }
 0x136   : > { %724 = vrot.lane.b32.xlu0 %v660_v61, %s5407_s13  ;;  %738 = vrot.lane.b32.xlu1 %v667_v62, %s5407_s13 }
 0x13a   : > { %728 = vrot.lane.b32.xlu0 %v662_v63, %s5407_s13 }
 0x13e   : > { %732 = vrot.lane.b32.xlu0 %v664_v1, %s5407_s13 }
 0x142   : > { %736 = vrot.lane.b32.xlu0 %v666_v4, %s5407_s13 }
 0x15c   : > { %v597_v13 = vpop.permute.xlu0 %596  ;;  %v630_v14 = vpop.permute.xlu1 %629 }
 0x15d   : > { %620 = vst.msk [vmem:[#allocation2 + $0x161] sm:$0xff] %vm544_vm2, %v597_v13  ;;  %653 = vst.msk [vmem:[#allocation2 + $0x201] sm:$0xff] %vm544_vm2, %v630_v14 }
 0x15e   : > { %838 = vst.msk [vmem:[#allocation2 + $0x161] sm:$0xff] %vm820_vm3, %v759_v7  ;;  %846 = vst.msk [vmem:[#allocation2 + $0x201] sm:$0xff] %vm820_vm3, %v775_v6 }
 0x160   : > { %v634_v15 = vpop.permute.xlu1 %633  ;;  %v628_v16 = vpop.permute.xlu0 %627 }
 0x161   : > { %655 = vst.msk [vmem:[#allocation2 + $0x221] sm:$0xff] %vm544_vm2, %v634_v15  ;;  %652 = vst.msk [vmem:[#allocation2 + $0x1f1] sm:$0xff] %vm544_vm2, %v628_v16 }
 0x162   : > { %848 = vst.msk [vmem:[#allocation2 + $0x221] sm:$0xff] %vm820_vm3, %v779_v10  ;;  %845 = vst.msk [vmem:[#allocation2 + $0x1f1] sm:$0xff] %vm820_vm3, %v773_v3 }
 0x164   : > { %v632_v17 = vpop.permute.xlu1 %631  ;;  %v595_v18 = vpop.permute.xlu0 %594 }
 0x165   : > { %654 = vst.msk [vmem:[#allocation2 + $0x211] sm:$0xff] %vm544_vm2, %v632_v17  ;;  %619 = vst.msk [vmem:[#allocation2 + $0x151] sm:$0xff] %vm544_vm2, %v595_v18  ;;  %v5793_v23 = vld [vmem:[#allocation2 + $0x200] sm:$0xff] }
 0x166   : > { %847 = vst.msk [vmem:[#allocation2 + $0x211] sm:$0xff] %vm820_vm3, %v777_v8  ;;  %837 = vst.msk [vmem:[#allocation2 + $0x151] sm:$0xff] %vm820_vm3, %v757_v5  ;;  %v5877_v53 = vld [vmem:[#allocation2 + $0x161] sm:$0xff] }
 0x167   : > { %v5930_v7 = vld [vmem:[#allocation2 + $0x201] sm:$0xff] }
 0x168   : > { %v638_v19 = vpop.permute.xlu1 %637  ;;  %v601_v20 = vpop.permute.xlu0 %600 }
 0x169   : > { %657 = vst.msk [vmem:[#allocation2 + $0x241] sm:$0xff] %vm544_vm2, %v638_v19  ;;  %622 = vst.msk [vmem:[#allocation2 + $0x181] sm:$0xff] %vm544_vm2, %v601_v20  ;;  %v5783_v21 = vld [vmem:[#allocation2 + $0x1f0] sm:$0xff]  ;;  %v5807_v27 = vld [vmem:[#allocation2 + $0x220] sm:$0xff] }
 0x16a   : > { %840 = vst.msk [vmem:[#allocation2 + $0x181] sm:$0xff] %vm820_vm3, %v763_v11  ;;  %4681 = vmatmul.mubr.msk.f32.vlgmr.msra.gmra.mrb[8].mxu0 %vm316_vm0, %v5783_v21  ;;  %v5925_v4 = vld [vmem:[#allocation2 + $0x1f1] sm:$0xff] }
 0x16b   : > { %4683 = vmatprep.mubr.msk.f32.mxu0 %vm316_vm0, %v5793_v23  ;;  %4729 = vmatpush3.msra.mxu0 %v5714_v46 }
 0x16c   : > { %v636_v24 = vpop.permute.xlu1 %635  ;;  %v599_v25 = vpop.permute.xlu0 %598  ;;  %4778 = vmatprep.subr.mxu0 %v5788_v22 }
 0x16d   : > { %656 = vst.msk [vmem:[#allocation2 + $0x231] sm:$0xff] %vm544_vm2, %v636_v24  ;;  %621 = vst.msk [vmem:[#allocation2 + $0x171] sm:$0xff] %vm544_vm2, %v599_v25  ;;  %v5801_v26 = vld [vmem:[#allocation2 + $0x210] sm:$0xff] }
 0x16e   : > { %849 = vst.msk [vmem:[#allocation2 + $0x231] sm:$0xff] %vm820_vm3, %v781_v12  ;;  %839 = vst.msk [vmem:[#allocation2 + $0x171] sm:$0xff] %vm820_vm3, %v761_v9  ;;  %4684 = vmatmul.mubr.msk.f32.gmra.mrb[10].mxu0 %vm316_vm0, %v5801_v26  ;;  %v5867_v50 = vld [vmem:[#allocation2 + $0x151] sm:$0xff]  ;;  %v5944_v12 = vld [vmem:[#allocation2 + $0x221] sm:$0xff] }
 0x16f   : > { %4686 = vmatprep.mubr.msk.f32.mxu0 %vm316_vm0, %v5807_v27  ;;  %v5937_v9 = vld [vmem:[#allocation2 + $0x211] sm:$0xff] }
 0x170   : > { %v576_v28 = vpop.permute.xlu1 %575  ;;  %v572_v29 = vpop.permute.xlu0 %571 }
 0x171   : > { %593 = vst.msk [vmem:[#allocation2 + $0x121] sm:$0xff] %vm544_vm2, %v576_v28  ;;  %591 = vst.msk [vmem:[#allocation2 + $0x101] sm:$0xff] %vm544_vm2, %v572_v29 }
 0x172   : > { %836 = vst.msk [vmem:[#allocation2 + $0x121] sm:$0xff] %vm820_vm3, %v755_v2  ;;  %834 = vst.msk [vmem:[#allocation2 + $0x101] sm:$0xff] %vm820_vm3, %v5754_v60 }
 0x174   : > { %v783_v30 = vpop.permute.xlu1 %782  ;;  %v570_v31 = vpop.permute.xlu0 %569 }
 0x175   : > { %850 = vst.msk [vmem:[#allocation2 + $0x241] sm:$0xff] %vm820_vm3, %v783_v30  ;;  %v5818_v32 = vld [vmem:[#allocation2 + $0x230] sm:$0xff] }
 0x176   : > { %590 = vst.msk [vmem:[#allocation2 + $0xf1] sm:$0xff] %vm544_vm2, %v570_v31  ;;  %4687 = vmatmul.mubr.msk.f32.gmra.mrb[12].mxu0 %vm316_vm0, %v5818_v32  ;;  %v5883_v54 = vld [vmem:[#allocation2 + $0x171] sm:$0xff] }
 0x177   : > { %833 = vst.msk [vmem:[#allocation2 + $0xf1] sm:$0xff] %vm820_vm3, %v5746_v57  ;;  %v5890_v57 = vld [vmem:[#allocation2 + $0x181] sm:$0xff]  ;;  %v5949_v13 = vld [vmem:[#allocation2 + $0x231] sm:$0xff] }
 0x178   : > { %v785_v33 = vpop.permute.xlu1 %784  ;;  %v603_v34 = vpop.permute.xlu0 %602 }
 0x179   : > { %623 = vst.msk [vmem:[#allocation2 + $0x191] sm:$0xff] %vm544_vm2, %v603_v34  ;;  %v5838_v39 = vld [vmem:[#allocation2 + $0x101] sm:$0xff] }
 0x17c   : > { %v640_v35 = vpop.permute.xlu1 %639  ;;  %v574_v36 = vpop.permute.xlu0 %573  ;;  %v5825_v37 = vld [vmem:[#allocation2 + $0x240] sm:$0xff] }
 0x17d   : > { %658 = vst.msk [vmem:[#allocation2 + $0x251] sm:$0xff] %vm544_vm2, %v640_v35  ;;  %592 = vst.msk [vmem:[#allocation2 + $0x111] sm:$0xff] %vm544_vm2, %v574_v36  ;;  %4689 = vmatprep.mubr.msk.f32.mxu0 %vm316_vm0, %v5825_v37  ;;  %v5958_v17 = vld [vmem:[#allocation2 + $0x241] sm:$0xff] }
 0x17e   : > { %v5829_v38 = vld [vmem:[#allocation2 + $0xf1] sm:$0xff]  ;;  %851 = vst.msk [vmem:[#allocation2 + $0x251] sm:$0xff] %vm820_vm3, %v785_v33  ;;  %835 = vst.msk [vmem:[#allocation2 + $0x111] sm:$0xff] %vm820_vm3, %v5762_v0 }
 0x17f   : > { %4898 = vmatprep.mubr.msk.f32.mxu1 %vm316_vm0, %v5829_v38  ;;  %v5989_v33 = vld [vmem:[%s6900_s4 + $0x38] sm:$0xff]  ;;  %v5995_v34 = vld [vmem:[#allocation2 + $0xf0] sm:$0xff] }
 0x180   : > { %4899 = vmatmul.mubr.msk.f32.vlgmr.msra.gmra.mrb[0].mxu1 %vm316_vm0, %v5838_v39  ;;  %v609_v41 = vpop.permute.xlu1 %608  ;;  %v605_v43 = vpop.permute.xlu0 %604 }
 0x181   : > { %4929 = vmatpush3.msra.mxu1 %v5706_v45  ;;  %626 = vst.msk [vmem:[#allocation2 + $0x1c1] sm:$0xff] %vm544_vm2, %v609_v41  ;;  %624 = vst.msk [vmem:[#allocation2 + $0x1a1] sm:$0xff] %vm544_vm2, %v605_v43  ;;  %v5863_v45 = vld [vmem:[#allocation2 + $0x121] sm:$0xff] }
 0x182   : > { %4978 = vmatprep.subr.mxu1 %v5843_v40  ;;  %v6005_v41 = vld [vmem:[#allocation2 + $0x100] sm:$0xff] }
 0x184   : > { %v771_v44 = vpop.permute.xlu1 %770  ;;  %v765_v46 = vpop.permute.xlu0 %764 }
 0x185   : > { %844 = vst.msk [vmem:[#allocation2 + $0x1c1] sm:$0xff] %vm820_vm3, %v771_v44  ;;  %841 = vst.msk [vmem:[#allocation2 + $0x191] sm:$0xff] %vm820_vm3, %v765_v46  ;;  %v5855_v48 = vld [vmem:[#allocation2 + $0x250] sm:$0xff] }
 0x186   : > { %v5857_v49 = vld [vmem:[#allocation2 + $0x111] sm:$0xff]  ;;  %4690 = vmatmul.mubr.msk.f32.gmra.mrb[14].mxu0 %vm316_vm0, %v5855_v48 }
 0x187   : > { %4901 = vmatprep.mubr.msk.f32.mxu1 %vm316_vm0, %v5857_v49  ;;  %4692 = vmatprep.mubr.msk.f32.mxu0 %vm316_vm0, %v5851_v47  ;;  %v5963_v18 = vld [vmem:[#allocation2 + $0x251] sm:$0xff] }
 0x188   : > { %4902 = vmatmul.mubr.msk.f32.gmra.mrb[2].mxu1 %vm316_vm0, %v5863_v45  ;;  %v564_v51 = vpop.permute.xlu1 %563  ;;  %v767_v52 = vpop.permute.xlu0 %766 }
 0x189   : > { %4904 = vmatprep.mubr.msk.f32.mxu1 %vm316_vm0, %v5867_v50  ;;  %587 = vst.msk [vmem:[#allocation2 + $0xc1] sm:$0xff] %vm544_vm2, %v564_v51  ;;  %v6022_v51 = vld [vmem:[#allocation2 + $0x120] sm:$0xff] }
 0x18a   : > { %842 = vst.msk [vmem:[#allocation2 + $0x1a1] sm:$0xff] %vm820_vm3, %v767_v52  ;;  %4693 = vmatmul.mubr.msk.f32.gmra.mrb[16].mxu0 %vm316_vm0, %v5867_v50 }
 0x18b   : > { %4695 = vmatprep.mubr.msk.f32.mxu0 %vm316_vm0, %v5877_v53 }
 0x18c   : > { %4905 = vmatmul.mubr.msk.f32.gmra.mrb[4].mxu1 %vm316_vm0, %v5877_v53  ;;  %v741_v55 = vpop.permute.xlu1 %740  ;;  %v607_v56 = vpop.permute.xlu0 %606  ;;  %v5896_v58 = vld [vmem:[#allocation2 + $0x191] sm:$0xff]  ;;  %v5912_v0 = vld [vmem:[#allocation2 + $0x1c1] sm:$0xff] }
 0x18d   : > { %4907 = vmatprep.mubr.msk.f32.mxu1 %vm316_vm0, %v5883_v54  ;;  %625 = vst.msk [vmem:[#allocation2 + $0x1b1] sm:$0xff] %vm544_vm2, %v607_v56 }
 0x18e   : > { %4696 = vmatmul.mubr.msk.f32.gmra.mrb[18].mxu0 %vm316_vm0, %v5883_v54 }
 0x18f   : > { %4698 = vmatprep.mubr.msk.f32.mxu0 %vm316_vm0, %v5890_v57 }
 0x190   : > { %4908 = vmatmul.mubr.msk.f32.gmra.mrb[6].mxu1 %vm316_vm0, %v5890_v57  ;;  %v787_v59 = vpop.permute.xlu1 %786  ;;  %v769_v60 = vpop.permute.xlu0 %768 }
 0x191   : > { %4910 = vmatprep.mubr.msk.f32.mxu1 %vm316_vm0, %v5896_v58  ;;  %843 = vst.msk [vmem:[#allocation2 + $0x1b1] sm:$0xff] %vm820_vm3, %v769_v60  ;;  %v5903_v61 = vld [vmem:[#allocation2 + $0x1a1] sm:$0xff] }
 0x192   : > { %4699 = vmatmul.mubr.msk.f32.gmra.mrb[20].mxu0 %vm316_vm0, %v5896_v58 }
 0x193   : > { %4701 = vmatprep.mubr.msk.f32.mxu0 %vm316_vm0, %v5903_v61 }
 0x194   : > { %4911 = vmatmul.mubr.msk.f32.gmra.mrb[8].mxu1 %vm316_vm0, %v5903_v61  ;;  %v568_v62 = vpop.permute.xlu1 %567  ;;  %v562_v63 = vpop.permute.xlu0 %561 }
 0x195   : > { %589 = vst.msk [vmem:[#allocation2 + $0xe1] sm:$0xff] %vm544_vm2, %v568_v62  ;;  %586 = vst.msk [vmem:[#allocation2 + $0xb1] sm:$0xff] %vm544_vm2, %v562_v63 }
 0x196   : > { %829 = vst.msk [vmem:[#allocation2 + $0xb1] sm:$0xff] %vm820_vm3, %v741_v55 }
 0x198   : > { %v642_v1 = vpop.permute.xlu0 %641  ;;  %v5914_v2 = vld [vmem:[#allocation2 + $0x1b1] sm:$0xff]  ;;  %v747_v3 = vpop.permute.xlu1 %746 }
 0x199   : > { %659 = vst.msk [vmem:[#allocation2 + $0x261] sm:$0xff] %vm544_vm2, %v642_v1  ;;  %4702 = vmatmul.mubr.msk.f32.gmra.mrb[22].mxu0 %vm316_vm0, %v5914_v2  ;;  %4913 = vmatprep.mubr.msk.f32.mxu1 %vm316_vm0, %v5914_v2 }
 0x19a   : > { %832 = vst.msk [vmem:[#allocation2 + $0xe1] sm:$0xff] %vm820_vm3, %v747_v3  ;;  %852 = vst.msk [vmem:[#allocation2 + $0x261] sm:$0xff] %vm820_vm3, %v787_v59  ;;  %4914 = vmatmul.mubr.msk.f32.gmra.mrb[10].mxu1 %vm316_vm0, %v5912_v0 }
 0x19b   : > { %4916 = vmatprep.mubr.msk.f32.mxu1 %vm316_vm0, %v5925_v4 }
 0x19c   : > { %v743_v5 = vpop.permute.xlu0 %742  ;;  %v727_v6 = vpop.permute.xlu1 %726 }
 0x19d   : > { %830 = vst.msk [vmem:[#allocation2 + $0xc1] sm:$0xff] %vm820_vm3, %v743_v5  ;;  %v5932_v8 = vld [vmem:[#allocation2 + $0xb0] sm:$0xff]  ;;  %822 = vst.msk [vmem:[#allocation2 + $0x21] sm:$0xff] %vm820_vm3, %v727_v6 }
 0x19e   : > { %6911 = vst [vmem:[#allocation3_spill] sm:$0xff] %v5932_v8  ;;  %4917 = vmatmul.mubr.msk.f32.gmra.mrb[12].mxu1 %vm316_vm0, %v5930_v7  ;;  %4704 = vmatprep.mubr.msk.f32.mxu0 %vm316_vm0, %v5932_v8  ;;  %v5973_v25 = vld [vmem:[#allocation2 + $0xb1] sm:$0xff] }
 0x19f   : > { %4919 = vmatprep.mubr.msk.f32.mxu1 %vm316_vm0, %v5937_v9  ;;  %v6176_v8 = vld [vmem:[#allocation2 + $0x1b2] sm:$0xff] }
 0x1a0   : > { %v566_v10 = vpop.permute.xlu0 %565  ;;  %v731_v11 = vpop.permute.xlu1 %730 }
 0x1a1   : > { %588 = vst.msk [vmem:[#allocation2 + $0xd1] sm:$0xff] %vm544_vm2, %v566_v10  ;;  %v5967_v24 = vld [vmem:[#allocation2 + $0x261] sm:$0xff] }
 0x1a2   : > { %824 = vst.msk [vmem:[#allocation2 + $0x41] sm:$0xff] %vm820_vm3, %v731_v11  ;;  %4920 = vmatmul.mubr.msk.f32.gmra.mrb[14].mxu1 %vm316_vm0, %v5944_v12  ;;  %6912 = vst [vmem:[#allocation4_spill] sm:$0xff] %v5967_v24  ;;  %v5977_v28 = vld [vmem:[#allocation2 + $0xe0] sm:$0xff] }
 0x1a3   : > { %4922 = vmatprep.mubr.msk.f32.mxu1 %vm316_vm0, %v5949_v13  ;;  %v6007_v43 = vld [vmem:[#allocation2 + $0xe1] sm:$0xff] }
 0x1a4   : > { %v745_v14 = vpop.permute.xlu0 %744  ;;  %v5953_v15 = vld [vmem:[#allocation2 + $0xc0] sm:$0xff]  ;;  %v735_v16 = vpop.permute.xlu1 %734 }
 0x1a5   : > { %831 = vst.msk [vmem:[#allocation2 + $0xd1] sm:$0xff] %vm820_vm3, %v745_v14  ;;  %4705 = vmatmul.mubr.msk.f32.gmra.mrb[24].mxu0 %vm316_vm0, %v5953_v15  ;;  %826 = vst.msk [vmem:[#allocation2 + $0x61] sm:$0xff] %vm820_vm3, %v735_v16  ;;  %v5983_v31 = vld [vmem:[#allocation2 + $0xc1] sm:$0xff] }
 0x1a6   : > { %4923 = vmatmul.mubr.msk.f32.gmra.mrb[16].mxu1 %vm316_vm0, %v5958_v17  ;;  %v6033_v52 = vld [vmem:[#allocation2 + $0x21] sm:$0xff] }
 0x1a7   : > { %4925 = vmatprep.mubr.msk.f32.mxu1 %vm316_vm0, %v5963_v18  ;;  %v6051_v62 = vld [vmem:[#allocation2 + $0x22] sm:$0xff] }
 0x1a8   : > { %v725_v19 = vpop.permute.xlu0 %724  ;;  %v739_v20 = vpop.permute.xlu1 %738 }
 0x1a9   : > { %821 = vst.msk [vmem:[#allocation2 + $0x11] sm:$0xff] %vm820_vm3, %v725_v19  ;;  %828 = vst.msk [vmem:[#allocation2 + $0x81] sm:$0xff] %vm820_vm3, %v739_v20  ;;  %v6047_v59 = vld [vmem:[#allocation2 + $0x41] sm:$0xff]  ;;  %v6098_v19 = vld [vmem:[%s6900_s4 + $0x18] sm:$0xff] }
 0x1aa   : > { %4926 = vmatmul.mubr.msk.f32.gmra.mrb[18].mxu1 %vm316_vm0, %v5967_v24  ;;  %v6067_v5 = vld [vmem:[#allocation2 + $0x42] sm:$0xff] }
 0x1ab   : > { %4930 = vmatprep.mubr.msk.f32.mxu1 %vm316_vm0, %v5973_v25  ;;  %v6146_v20 = vld [vmem:[#allocation2 + $0x162] sm:$0xff] }
 0x1ac   : > { %v5979_v29 = vld [vmem:[#allocation2 + $0xd0] sm:$0xff]  ;;  %v729_v30 = vpop.permute.xlu0 %728  ;;  %v6063_v1 = vld [vmem:[#allocation2 + $0x61] sm:$0xff] }
 0x1ad   : > { %4707 = vmatprep.mubr.msk.f32.mxu0 %vm316_vm0, %v5979_v29  ;;  %823 = vst.msk [vmem:[#allocation2 + $0x31] sm:$0xff] %vm820_vm3, %v729_v30  ;;  %v6000_v35 = vld [vmem:[#allocation2 + $0xd1] sm:$0xff]  ;;  %v6081_v11 = vld [vmem:[#allocation2 + $0x62] sm:$0xff] }
 0x1ae   : > { %4708 = vmatmul.mubr.msk.f32.gmra.mrb[26].mxu0 %vm316_vm0, %v5977_v28  ;;  %4931 = vmatmul.mubr.msk.f32.vlgmr.msra.gmra.mrb[20].mxu1 %vm316_vm0, %v5983_v31  ;;  %v6152_v30 = vld [vmem:[#allocation2 + $0x172] sm:$0xff] }
 0x1af   : > { %4979 = vmatpush3.msra.mxu1 %v5843_v40  ;;  %4710 = vmatprep.mubr.msk.f32.mxu0 %vm316_vm0, %v5995_v34  ;;  %v6014_v40 = vld [vmem:[#allocation2 + $0x110] sm:$0xff] }
 0x1b0   : > { %4933 = vmatprep.mubr.msk.f32.mxu1 %vm316_vm0, %v6000_v35  ;;  %v733_v36 = vpop.permute.xlu0 %732  ;;  %5028 = vmatprep.subr.mxu1 %v5989_v33  ;;  %v6020_v44 = vld [vmem:[#allocation2 + $0x11] sm:$0xff]  ;;  %v6079_v10 = vld [vmem:[#allocation2 + $0x81] sm:$0xff] }
 0x1b1   : > { %825 = vst.msk [vmem:[#allocation2 + $0x51] sm:$0xff] %vm820_vm3, %v733_v36  ;;  %6913 = vst [vmem:[#allocation5_spill] sm:$0xff] %v6020_v44  ;;  %v6041_v56 = vld [vmem:[#allocation2 + $0x12] sm:$0xff]  ;;  %v6093_v16 = vld [vmem:[#allocation2 + $0x82] sm:$0xff] }
 0x1b2   : > { %4711 = vmatmul.mubr.msk.f32.gmra.mrb[28].mxu0 %vm316_vm0, %v6005_v41  ;;  %4934 = vmatmul.mubr.msk.f32.gmra.mrb[22].mxu1 %vm316_vm0, %v6007_v43  ;;  %6914 = vst [vmem:[#allocation6_spill] sm:$0xff] %v6093_v16  ;;  %v6158_v36 = vld [vmem:[#allocation2 + $0x182] sm:$0xff] }
 0x1b3   : > { %4713 = vmatprep.mubr.msk.f32.mxu0 %vm316_vm0, %v6014_v40  ;;  %4936 = vmatprep.mubr.msk.f32.mxu1 %vm316_vm0, %v5829_v38 }
 0x1b4   : > { %v737_v46 = vpop.permute.xlu0 %736  ;;  %v6035_v55 = vld [vmem:[#allocation2 + $0x31] sm:$0xff] }
 0x1b5   : > { %827 = vst.msk [vmem:[#allocation2 + $0x71] sm:$0xff] %vm820_vm3, %v737_v46  ;;  %v6057_v63 = vld [vmem:[#allocation2 + $0x32] sm:$0xff] }
 0x1b6   : > { %4714 = vmatmul.mubr.msk.f32.gmra.mrb[30].mxu0 %vm316_vm0, %v6022_v51  ;;  %4937 = vmatmul.mubr.msk.f32.gmra.mrb[24].mxu1 %vm316_vm0, %v5838_v39  ;;  %v6164_v46 = vld [vmem:[#allocation2 + $0x192] sm:$0xff] }
 0x1b7   : > { %4939 = vmatprep.mubr.msk.f32.mxu1 %vm316_vm0, %v5857_v49  ;;  %4716 = vmatprep.mubr.msk.f32.mxu0 %vm316_vm0, %v6020_v44 }
 0x1b8   : > { %v6049_v60 = vld [vmem:[#allocation2 + $0x51] sm:$0xff] }
 0x1b9   : > { %v6073_v6 = vld [vmem:[#allocation2 + $0x52] sm:$0xff] }
 0x1ba   : > { %4717 = vmatmul.mubr.msk.f32.gmra.mrb[32].mxu0 %vm316_vm0, %v6033_v52  ;;  %4940 = vmatmul.mubr.msk.f32.gmra.mrb[26].mxu1 %vm316_vm0, %v5863_v45 }
 0x1bb   : > { %4942 = vmatprep.mubr.msk.f32.mxu1 %vm316_vm0, %v6041_v56  ;;  %4719 = vmatprep.mubr.msk.f32.mxu0 %vm316_vm0, %v6035_v55 }
 0x1bc   : > { %v6065_v3 = vld [vmem:[#allocation2 + $0x71] sm:$0xff] }
 0x1bd   : > { %v6087_v14 = vld [vmem:[#allocation2 + $0x72] sm:$0xff] }
 0x1be   : > { %4720 = vmatmul.mubr.msk.f32.gmra.mrb[34].mxu0 %vm316_vm0, %v6047_v59  ;;  %4943 = vmatmul.mubr.msk.f32.gmra.mrb[28].mxu1 %vm316_vm0, %v6051_v62 }
 0x1bf   : > { %4945 = vmatprep.mubr.msk.f32.mxu1 %vm316_vm0, %v6057_v63  ;;  %4722 = vmatprep.mubr.msk.f32.mxu0 %vm316_vm0, %v6049_v60 }
 0x1c2   : > { %4723 = vmatmul.mubr.msk.f32.gmra.mrb[36].mxu0 %vm316_vm0, %v6063_v1  ;;  %4946 = vmatmul.mubr.msk.f32.gmra.mrb[30].mxu1 %vm316_vm0, %v6067_v5 }
 0x1c3   : > { %4948 = vmatprep.mubr.msk.f32.mxu1 %vm316_vm0, %v6073_v6  ;;  %4725 = vmatprep.mubr.msk.f32.mxu0 %vm316_vm0, %v6065_v3 }
 0x1c6   : > { %4726 = vmatmul.mubr.msk.f32.gmra.mrb[38].mxu0 %vm316_vm0, %v6079_v10  ;;  %4949 = vmatmul.mubr.msk.f32.gmra.mrb[0].mxu1 %vm316_vm0, %v6081_v11 }
 0x1c7   : > { %4951 = vmatprep.mubr.msk.f32.mxu1 %vm316_vm0, %v6087_v14  ;;  %4730 = vmatprep.mubr.msk.f32.mxu0 %vm316_vm0, %v5851_v47  ;;  %v6140_v47 = vld [vmem:[#allocation2 + $0x152] sm:$0xff] }
 0x1ca   : > { %4731 = vmatmul.mubr.msk.f32.vlgmr.msra.gmra.mrb[8].mxu0 %vm316_vm0, %v5867_v50  ;;  %4952 = vmatmul.mubr.msk.f32.gmra.mrb[2].mxu1 %vm316_vm0, %v6093_v16  ;;  %v6182_v16 = vld [vmem:[#allocation2 + $0x1c2] sm:$0xff] }
 0x1cb   : > { %4779 = vmatpush3.msra.mxu0 %v5788_v22  ;;  %4733 = vmatprep.mubr.msk.f32.mxu0 %vm316_vm0, %v5877_v53  ;;  %v6126_v22 = vld [vmem:[#allocation2 + $0x1e1] sm:$0xff] }
 0x1cc   : > { %4954 = vmatprep.mubr.msk.f32.mxu1 %vm316_vm0, %v5925_v4  ;;  %4828 = vmatprep.subr.mxu0 %v6098_v19 }
 0x1ce   : > { %4734 = vmatmul.mubr.msk.f32.gmra.mrb[10].mxu0 %vm316_vm0, %v5883_v54  ;;  %4955 = vmatmul.mubr.msk.f32.gmra.mrb[4].mxu1 %vm316_vm0, %v5930_v7 }
 0x1cf   : > { %4736 = vmatprep.mubr.msk.f32.mxu0 %vm316_vm0, %v5890_v57  ;;  %4957 = vmatprep.mubr.msk.f32.mxu1 %vm316_vm0, %v5937_v9 }
 0x1d2   : > { %4737 = vmatmul.mubr.msk.f32.gmra.mrb[12].mxu0 %vm316_vm0, %v5896_v58  ;;  %4958 = vmatmul.mubr.msk.f32.gmra.mrb[6].mxu1 %vm316_vm0, %v5944_v12 }
 0x1d3   : > { %4739 = vmatprep.mubr.msk.f32.mxu0 %vm316_vm0, %v5903_v61  ;;  %4960 = vmatprep.mubr.msk.f32.mxu1 %vm316_vm0, %v5949_v13 }
 0x1d6   : > { %4740 = vmatmul.mubr.msk.f32.gmra.mrb[14].mxu0 %vm316_vm0, %v5914_v2  ;;  %4961 = vmatmul.mubr.msk.f32.gmra.mrb[8].mxu1 %vm316_vm0, %v5958_v17 }
 0x1d7   : > { %4963 = vmatprep.mubr.msk.f32.mxu1 %vm316_vm0, %v5963_v18  ;;  %4742 = vmatprep.mubr.msk.f32.mxu0 %vm316_vm0, %v6126_v22 }
 0x1da   : > { %4743 = vmatmul.mubr.msk.f32.gmra.mrb[16].mxu0 %vm316_vm0, %v5925_v4  ;;  %4964 = vmatmul.mubr.msk.f32.gmra.mrb[10].mxu1 %vm316_vm0, %v5967_v24  ;;  %v6170_v24 = vld [vmem:[#allocation2 + $0x1a2] sm:$0xff] }
 0x1db   : > { %4745 = vmatprep.mubr.msk.f32.mxu0 %vm316_vm0, %v5930_v7  ;;  %4966 = vmatprep.mubr.msk.f32.mxu1 %vm316_vm0, %v6140_v47 }
 0x1de   : > { %4746 = vmatmul.mubr.msk.f32.gmra.mrb[18].mxu0 %vm316_vm0, %v5937_v9  ;;  %4967 = vmatmul.mubr.msk.f32.gmra.mrb[12].mxu1 %vm316_vm0, %v6146_v20 }
 0x1df   : > { %4748 = vmatprep.mubr.msk.f32.mxu0 %vm316_vm0, %v5944_v12  ;;  %4969 = vmatprep.mubr.msk.f32.mxu1 %vm316_vm0, %v6152_v30 }
 0x1e2   : > { %4749 = vmatmul.mubr.msk.f32.gmra.mrb[20].mxu0 %vm316_vm0, %v5949_v13  ;;  %4970 = vmatmul.mubr.msk.f32.gmra.mrb[14].mxu1 %vm316_vm0, %v6158_v36 }
 0x1e3   : > { %4751 = vmatprep.mubr.msk.f32.mxu0 %vm316_vm0, %v5958_v17  ;;  %4972 = vmatprep.mubr.msk.f32.mxu1 %vm316_vm0, %v6164_v46 }
 0x1e6   : > { %4752 = vmatmul.mubr.msk.f32.gmra.mrb[22].mxu0 %vm316_vm0, %v5963_v18  ;;  %4973 = vmatmul.mubr.msk.f32.gmra.mrb[16].mxu1 %vm316_vm0, %v6170_v24 }
 0x1e7   : > { %4754 = vmatprep.mubr.msk.f32.mxu0 %vm316_vm0, %v6020_v44  ;;  %4975 = vmatprep.mubr.msk.f32.mxu1 %vm316_vm0, %v6176_v8  ;;  %v6195_v44 = vld [vmem:[%s6900_s4 + $0x40] sm:$0xff] }
 0x1ea   : > { %4755 = vmatmul.mubr.msk.f32.gmra.mrb[24].mxu0 %vm316_vm0, %v6033_v52  ;;  %4976 = vmatmul.mubr.msk.f32.gmra.mrb[18].mxu1 %vm316_vm0, %v6182_v16 }
 0x1eb   : > { %4757 = vmatprep.mubr.msk.f32.mxu0 %vm316_vm0, %v6035_v55  ;;  %4980 = vmatprep.mubr.msk.f32.mxu1 %vm316_vm0, %v5783_v21 }
 0x1ee   : > { %4758 = vmatmul.mubr.msk.f32.gmra.mrb[26].mxu0 %vm316_vm0, %v6047_v59  ;;  %4981 = vmatmul.mubr.msk.f32.vlgmr.msra.gmra.mrb[20].mxu1 %vm316_vm0, %v5793_v23 }
 0x1ef   : > { %5029 = vmatpush3.msra.mxu1 %v5989_v33  ;;  %4760 = vmatprep.mubr.msk.f32.mxu0 %vm316_vm0, %v6049_v60  ;;  %v6223_v33 = vld [vmem:[#allocation2 + $0x260] sm:$0xff] }
 0x1f0   : > { %4983 = vmatprep.mubr.msk.f32.mxu1 %vm316_vm0, %v5801_v26  ;;  %5078 = vmatprep.subr.mxu1 %v6195_v44 }
 0x1f2   : > { %4761 = vmatmul.mubr.msk.f32.gmra.mrb[28].mxu0 %vm316_vm0, %v6063_v1  ;;  %4984 = vmatmul.mubr.msk.f32.gmra.mrb[22].mxu1 %vm316_vm0, %v5807_v27 }
 0x1f3   : > { %4763 = vmatprep.mubr.msk.f32.mxu0 %vm316_vm0, %v6065_v3  ;;  %4986 = vmatprep.mubr.msk.f32.mxu1 %vm316_vm0, %v5818_v32 }
 0x1f6   : > { %4764 = vmatmul.mubr.msk.f32.gmra.mrb[30].mxu0 %vm316_vm0, %v6079_v10  ;;  %4987 = vmatmul.mubr.msk.f32.gmra.mrb[24].mxu1 %vm316_vm0, %v5825_v37 }
 0x1f7   : > { %4766 = vmatprep.mubr.msk.f32.mxu0 %vm316_vm0, %v5973_v25  ;;  %4989 = vmatprep.mubr.msk.f32.mxu1 %vm316_vm0, %v5855_v48 }
 0x1fa   : > { %4767 = vmatmul.mubr.msk.f32.gmra.mrb[32].mxu0 %vm316_vm0, %v5983_v31  ;;  %4990 = vmatmul.mubr.msk.f32.gmra.mrb[26].mxu1 %vm316_vm0, %v6223_v33 }
 0x1fb   : > { %4769 = vmatprep.mubr.msk.f32.mxu0 %vm316_vm0, %v6000_v35  ;;  %4992 = vmatprep.mubr.msk.f32.mxu1 %vm316_vm0, %v5867_v50 }
 0x1fe   : > { %4770 = vmatmul.mubr.msk.f32.gmra.mrb[34].mxu0 %vm316_vm0, %v6007_v43  ;;  %4993 = vmatmul.mubr.msk.f32.gmra.mrb[28].mxu1 %vm316_vm0, %v5877_v53 }
 0x1ff   : > { %4772 = vmatprep.mubr.msk.f32.mxu0 %vm316_vm0, %v5829_v38  ;;  %4995 = vmatprep.mubr.msk.f32.mxu1 %vm316_vm0, %v5883_v54 }
 0x202   : > { %4773 = vmatmul.mubr.msk.f32.gmra.mrb[36].mxu0 %vm316_vm0, %v5838_v39  ;;  %4996 = vmatmul.mubr.msk.f32.gmra.mrb[30].mxu1 %vm316_vm0, %v5890_v57 }
 0x203   : > { %4775 = vmatprep.mubr.msk.f32.mxu0 %vm316_vm0, %v5857_v49  ;;  %4998 = vmatprep.mubr.msk.f32.mxu1 %vm316_vm0, %v5896_v58 }
 0x206   : > { %4776 = vmatmul.mubr.msk.f32.gmra.mrb[38].mxu0 %vm316_vm0, %v5863_v45  ;;  %4999 = vmatmul.mubr.msk.f32.gmra.mrb[0].mxu1 %vm316_vm0, %v5903_v61 }
 0x207   : > { %5001 = vmatprep.mubr.msk.f32.mxu1 %vm316_vm0, %v5914_v2  ;;  %4780 = vmatprep.mubr.msk.f32.mxu0 %vm316_vm0, %v6126_v22  ;;  %v2800_v22 = vld [vmem:[#allocation2 + $0x130] sm:$0xff] }
 0x20a   : > { %4781 = vmatmul.mubr.msk.f32.vlgmr.msra.gmra.mrb[8].mxu0 %vm316_vm0, %v5925_v4  ;;  %5002 = vmatmul.mubr.msk.f32.gmra.mrb[2].mxu1 %vm316_vm0, %v5912_v0 }
 0x20b   : > { %4829 = vmatpush3.msra.mxu0 %v6098_v19  ;;  %4783 = vmatprep.mubr.msk.f32.mxu0 %vm316_vm0, %v5930_v7  ;;  %v1564_v19 = vld [vmem:[#allocation2 + $0x142] sm:$0xff] }
 0x20c   : > { %5004 = vmatprep.mubr.msk.f32.mxu1 %vm316_vm0, %v5953_v15  ;;  %4878 = vmatprep.subr.mxu0 %v5693_v42 }
 0x20e   : > { %4784 = vmatmul.mubr.msk.f32.gmra.mrb[10].mxu0 %vm316_vm0, %v5937_v9  ;;  %5005 = vmatmul.mubr.msk.f32.gmra.mrb[4].mxu1 %vm316_vm0, %v5979_v29 }
 0x20f   : > { %4786 = vmatprep.mubr.msk.f32.mxu0 %vm316_vm0, %v5944_v12  ;;  %5007 = vmatprep.mubr.msk.f32.mxu1 %vm316_vm0, %v5977_v28 }
 0x212   : > { %4787 = vmatmul.mubr.msk.f32.gmra.mrb[12].mxu0 %vm316_vm0, %v5949_v13  ;;  %5008 = vmatmul.mubr.msk.f32.gmra.mrb[6].mxu1 %vm316_vm0, %v5995_v34 }
 0x213   : > { %4789 = vmatprep.mubr.msk.f32.mxu0 %vm316_vm0, %v5958_v17  ;;  %5010 = vmatprep.mubr.msk.f32.mxu1 %vm316_vm0, %v6005_v41 }
 0x216   : > { %4790 = vmatmul.mubr.msk.f32.gmra.mrb[14].mxu0 %vm316_vm0, %v5963_v18  ;;  %5011 = vmatmul.mubr.msk.f32.gmra.mrb[8].mxu1 %vm316_vm0, %v6014_v40 }
 0x217   : > { %5013 = vmatprep.mubr.msk.f32.mxu1 %vm316_vm0, %v6022_v51  ;;  %4792 = vmatprep.mubr.msk.f32.mxu0 %vm316_vm0, %v1564_v19  ;;  %v2809_v19 = vld [vmem:[#allocation2 + $0x91] sm:$0xff] }
 0x21a   : > { %4793 = vmatmul.mubr.msk.f32.gmra.mrb[16].mxu0 %vm316_vm0, %v6140_v47  ;;  %5014 = vmatmul.mubr.msk.f32.gmra.mrb[10].mxu1 %vm316_vm0, %v2800_v22  ;;  %v6917_v22 = vld [vmem:[#allocation4_spill] sm:$0xff] }
 0x21b   : > { %4795 = vmatprep.mubr.msk.f32.mxu0 %vm316_vm0, %v6146_v20  ;;  %5016 = vmatprep.mubr.msk.f32.mxu1 %vm316_vm0, %v6033_v52 }
 0x21e   : > { %4796 = vmatmul.mubr.msk.f32.gmra.mrb[18].mxu0 %vm316_vm0, %v6152_v30  ;;  %5017 = vmatmul.mubr.msk.f32.gmra.mrb[12].mxu1 %vm316_vm0, %v6035_v55 }
 0x21f   : > { %4798 = vmatprep.mubr.msk.f32.mxu0 %vm316_vm0, %v6158_v36  ;;  %5019 = vmatprep.mubr.msk.f32.mxu1 %vm316_vm0, %v6047_v59 }
 0x222   : > { %4799 = vmatmul.mubr.msk.f32.gmra.mrb[20].mxu0 %vm316_vm0, %v6164_v46  ;;  %5020 = vmatmul.mubr.msk.f32.gmra.mrb[14].mxu1 %vm316_vm0, %v6049_v60 }
 0x223   : > { %4801 = vmatprep.mubr.msk.f32.mxu0 %vm316_vm0, %v6170_v24  ;;  %5022 = vmatprep.mubr.msk.f32.mxu1 %vm316_vm0, %v6063_v1 }
 0x226   : > { %4802 = vmatmul.mubr.msk.f32.gmra.mrb[22].mxu0 %vm316_vm0, %v6176_v8  ;;  %5023 = vmatmul.mubr.msk.f32.gmra.mrb[16].mxu1 %vm316_vm0, %v6065_v3 }
 0x227   : > { %4804 = vmatprep.mubr.msk.f32.mxu0 %vm316_vm0, %v5973_v25  ;;  %5025 = vmatprep.mubr.msk.f32.mxu1 %vm316_vm0, %v6079_v10 }
 0x22a   : > { %4805 = vmatmul.mubr.msk.f32.gmra.mrb[24].mxu0 %vm316_vm0, %v5983_v31  ;;  %5026 = vmatmul.mubr.msk.f32.gmra.mrb[18].mxu1 %vm316_vm0, %v2809_v19 }
 0x22b   : > { %4807 = vmatprep.mubr.msk.f32.mxu0 %vm316_vm0, %v6000_v35  ;;  %5030 = vmatprep.mubr.msk.f32.mxu1 %vm316_vm0, %v5867_v50 }
 0x22e   : > { %4808 = vmatmul.mubr.msk.f32.gmra.mrb[26].mxu0 %vm316_vm0, %v6007_v43  ;;  %5031 = vmatmul.mubr.msk.f32.vlgmr.msra.gmra.mrb[20].mxu1 %vm316_vm0, %v5877_v53 }
 0x22f   : > { %5079 = vmatpush3.msra.mxu1 %v6195_v44  ;;  %4810 = vmatprep.mubr.msk.f32.mxu0 %vm316_vm0, %v5829_v38  ;;  %v6915_v44 = vld [vmem:[#allocation6_spill] sm:$0xff] }
 0x230   : > { %5033 = vmatprep.mubr.msk.f32.mxu1 %vm316_vm0, %v5883_v54 }
 0x232   : > { %4811 = vmatmul.mubr.msk.f32.gmra.mrb[28].mxu0 %vm316_vm0, %v5838_v39  ;;  %5034 = vmatmul.mubr.msk.f32.gmra.mrb[22].mxu1 %vm316_vm0, %v5890_v57 }
 0x233   : > { %4813 = vmatprep.mubr.msk.f32.mxu0 %vm316_vm0, %v5857_v49  ;;  %5036 = vmatprep.mubr.msk.f32.mxu1 %vm316_vm0, %v5896_v58 }
 0x236   : > { %4814 = vmatmul.mubr.msk.f32.gmra.mrb[30].mxu0 %vm316_vm0, %v5863_v45  ;;  %5037 = vmatmul.mubr.msk.f32.gmra.mrb[24].mxu1 %vm316_vm0, %v5903_v61 }
 0x237   : > { %4816 = vmatprep.mubr.msk.f32.mxu0 %vm316_vm0, %v6041_v56  ;;  %5039 = vmatprep.mubr.msk.f32.mxu1 %vm316_vm0, %v5914_v2  ;;  %v6916_v56 = vld [vmem:[#allocation3_spill] sm:$0xff] }
 0x23a   : > { %4817 = vmatmul.mubr.msk.f32.gmra.mrb[32].mxu0 %vm316_vm0, %v6051_v62  ;;  %5040 = vmatmul.mubr.msk.f32.gmra.mrb[26].mxu1 %vm316_vm0, %v5912_v0 }
 0x23b   : > { %4819 = vmatprep.mubr.msk.f32.mxu0 %vm316_vm0, %v6057_v63  ;;  %5042 = vmatprep.mubr.msk.f32.mxu1 %vm316_vm0, %v5925_v4 }
 0x23e   : > { %4820 = vmatmul.mubr.msk.f32.gmra.mrb[34].mxu0 %vm316_vm0, %v6067_v5  ;;  %5043 = vmatmul.mubr.msk.f32.gmra.mrb[28].mxu1 %vm316_vm0, %v5930_v7 }
 0x23f   : > { %4822 = vmatprep.mubr.msk.f32.mxu0 %vm316_vm0, %v6073_v6  ;;  %5045 = vmatprep.mubr.msk.f32.mxu1 %vm316_vm0, %v5937_v9 }
 0x242   : > { %4823 = vmatmul.mubr.msk.f32.gmra.mrb[36].mxu0 %vm316_vm0, %v6081_v11  ;;  %5046 = vmatmul.mubr.msk.f32.gmra.mrb[30].mxu1 %vm316_vm0, %v5944_v12 }
 0x243   : > { %4825 = vmatprep.mubr.msk.f32.mxu0 %vm316_vm0, %v6087_v14  ;;  %5048 = vmatprep.mubr.msk.f32.mxu1 %vm316_vm0, %v5949_v13 }
 0x246   : > { %4826 = vmatmul.mubr.msk.f32.gmra.mrb[38].mxu0 %vm316_vm0, %v6915_v44  ;;  %5049 = vmatmul.mubr.msk.f32.gmra.mrb[0].mxu1 %vm316_vm0, %v5958_v17 }
 0x247   : > { %4830 = vmatprep.mubr.msk.f32.mxu0 %vm316_vm0, %v6916_v56  ;;  %5051 = vmatprep.mubr.msk.f32.mxu1 %vm316_vm0, %v5963_v18 }
 0x24a   : > { %4831 = vmatmul.mubr.msk.f32.vlgmr.msra.gmra.mrb[8].mxu0 %vm316_vm0, %v5953_v15  ;;  %5052 = vmatmul.mubr.msk.f32.gmra.mrb[2].mxu1 %vm316_vm0, %v6917_v22  ;;  %v3124_v15 = vld [vmem:[#allocation2 + $0x131] sm:$0xff] }
 0x24b   : > { %4879 = vmatpush3.msra.mxu0 %v5693_v42  ;;  %4833 = vmatprep.mubr.msk.f32.mxu0 %vm316_vm0, %v5979_v29  ;;  %v6918_v42 = vld [vmem:[#allocation5_spill] sm:$0xff] }
 0x24c   : > { %5054 = vmatprep.mubr.msk.f32.mxu1 %vm316_vm0, %v6033_v52 }
 0x24e   : > { %4834 = vmatmul.mubr.msk.f32.gmra.mrb[10].mxu0 %vm316_vm0, %v5977_v28  ;;  %5055 = vmatmul.mubr.msk.f32.gmra.mrb[4].mxu1 %vm316_vm0, %v6035_v55 }
 0x24f   : > { %4836 = vmatprep.mubr.msk.f32.mxu0 %vm316_vm0, %v5995_v34  ;;  %5057 = vmatprep.mubr.msk.f32.mxu1 %vm316_vm0, %v6047_v59 }
 0x252   : > { %4837 = vmatmul.mubr.msk.f32.gmra.mrb[12].mxu0 %vm316_vm0, %v6005_v41  ;;  %5058 = vmatmul.mubr.msk.f32.gmra.mrb[6].mxu1 %vm316_vm0, %v6049_v60 }
 0x253   : > { %4839 = vmatprep.mubr.msk.f32.mxu0 %vm316_vm0, %v6014_v40  ;;  %5060 = vmatprep.mubr.msk.f32.mxu1 %vm316_vm0, %v6063_v1 }
 0x256   : > { %4840 = vmatmul.mubr.msk.f32.gmra.mrb[14].mxu0 %vm316_vm0, %v6022_v51  ;;  %5061 = vmatmul.mubr.msk.f32.gmra.mrb[8].mxu1 %vm316_vm0, %v6065_v3 }
 0x257   : > { %4842 = vmatprep.mubr.msk.f32.mxu0 %vm316_vm0, %v6918_v42  ;;  %5063 = vmatprep.mubr.msk.f32.mxu1 %vm316_vm0, %v6079_v10 }
 0x25a   : > { %4843 = vmatmul.mubr.msk.f32.gmra.mrb[16].mxu0 %vm316_vm0, %v6033_v52  ;;  %5064 = vmatmul.mubr.msk.f32.gmra.mrb[10].mxu1 %vm316_vm0, %v2809_v19 }
 0x25b   : > { %4845 = vmatprep.mubr.msk.f32.mxu0 %vm316_vm0, %v6035_v55  ;;  %5066 = vmatprep.mubr.msk.f32.mxu1 %vm316_vm0, %v5983_v31 }
 0x25e   : > { %4846 = vmatmul.mubr.msk.f32.gmra.mrb[18].mxu0 %vm316_vm0, %v6047_v59  ;;  %5067 = vmatmul.mubr.msk.f32.gmra.mrb[12].mxu1 %vm316_vm0, %v6000_v35 }
 0x25f   : > { %4848 = vmatprep.mubr.msk.f32.mxu0 %vm316_vm0, %v6049_v60  ;;  %5069 = vmatprep.mubr.msk.f32.mxu1 %vm316_vm0, %v6007_v43 }
 0x262   : > { %4849 = vmatmul.mubr.msk.f32.gmra.mrb[20].mxu0 %vm316_vm0, %v6063_v1  ;;  %5070 = vmatmul.mubr.msk.f32.gmra.mrb[14].mxu1 %vm316_vm0, %v5829_v38 }
 0x263   : > { %4851 = vmatprep.mubr.msk.f32.mxu0 %vm316_vm0, %v6065_v3  ;;  %5072 = vmatprep.mubr.msk.f32.mxu1 %vm316_vm0, %v5838_v39 }
 0x266   : > { %4852 = vmatmul.mubr.msk.f32.gmra.mrb[22].mxu0 %vm316_vm0, %v6079_v10  ;;  %5073 = vmatmul.mubr.msk.f32.gmra.mrb[16].mxu1 %vm316_vm0, %v5857_v49 }
 0x267   : > { %4854 = vmatprep.mubr.msk.f32.mxu0 %vm316_vm0, %v5783_v21  ;;  %5075 = vmatprep.mubr.msk.f32.mxu1 %vm316_vm0, %v5863_v45  ;;  %v3415_v21 = vld [vmem:[#allocation2 + $0x92] sm:$0xff] }
 0x26a   : > { %4855 = vmatmul.mubr.msk.f32.gmra.mrb[24].mxu0 %vm316_vm0, %v5793_v23  ;;  %5076 = vmatmul.mubr.msk.f32.gmra.mrb[18].mxu1 %vm316_vm0, %v3124_v15 }
 0x26b   : > { %4857 = vmatprep.mubr.msk.f32.mxu0 %vm316_vm0, %v5801_v26  ;;  %5080 = vmatprep.mubr.msk.f32.mxu1 %vm316_vm0, %v5925_v4 }
 0x26e   : > { %4858 = vmatmul.mubr.msk.f32.gmra.mrb[26].mxu0 %vm316_vm0, %v5807_v27  ;;  %5081 = vmatmul.mubr.msk.f32.vlgmr.msra.gmra.mrb[20].mxu1 %vm316_vm0, %v5930_v7 }
 0x26f   : > { %4860 = vmatprep.mubr.msk.f32.mxu0 %vm316_vm0, %v5818_v32  ;;  %5083 = vmatprep.mubr.msk.f32.mxu1 %vm316_vm0, %v5937_v9 }
 0x272   : > { %4861 = vmatmul.mubr.msk.f32.gmra.mrb[28].mxu0 %vm316_vm0, %v5825_v37  ;;  %5084 = vmatmul.mubr.msk.f32.gmra.mrb[22].mxu1 %vm316_vm0, %v5944_v12 }
 0x273   : > { %4863 = vmatprep.mubr.msk.f32.mxu0 %vm316_vm0, %v5855_v48  ;;  %5086 = vmatprep.mubr.msk.f32.mxu1 %vm316_vm0, %v5949_v13 }
 0x276   : > { %4864 = vmatmul.mubr.msk.f32.gmra.mrb[30].mxu0 %vm316_vm0, %v6223_v33  ;;  %5087 = vmatmul.mubr.msk.f32.gmra.mrb[24].mxu1 %vm316_vm0, %v5958_v17 }
 0x277   : > { %4866 = vmatprep.mubr.msk.f32.mxu0 %vm316_vm0, %v5867_v50  ;;  %5089 = vmatprep.mubr.msk.f32.mxu1 %vm316_vm0, %v5963_v18 }
 0x27a   : > { %4867 = vmatmul.mubr.msk.f32.gmra.mrb[32].mxu0 %vm316_vm0, %v5877_v53  ;;  %5090 = vmatmul.mubr.msk.f32.gmra.mrb[26].mxu1 %vm316_vm0, %v6917_v22 }
 0x27b   : > { %4869 = vmatprep.mubr.msk.f32.mxu0 %vm316_vm0, %v5883_v54  ;;  %5092 = vmatprep.mubr.msk.f32.mxu1 %vm316_vm0, %v6140_v47 }
 0x27e   : > { %4870 = vmatmul.mubr.msk.f32.gmra.mrb[34].mxu0 %vm316_vm0, %v5890_v57  ;;  %5093 = vmatmul.mubr.msk.f32.gmra.mrb[28].mxu1 %vm316_vm0, %v6146_v20 }
 0x27f   : > { %4872 = vmatprep.mubr.msk.f32.mxu0 %vm316_vm0, %v5896_v58  ;;  %5095 = vmatprep.mubr.msk.f32.mxu1 %vm316_vm0, %v6152_v30 }
 0x282   : > { %4873 = vmatmul.mubr.msk.f32.gmra.mrb[36].mxu0 %vm316_vm0, %v5903_v61  ;;  %5096 = vmatmul.mubr.msk.f32.gmra.mrb[30].mxu1 %vm316_vm0, %v6158_v36 }
 0x283   : > { %4875 = vmatprep.mubr.msk.f32.mxu0 %vm316_vm0, %v5914_v2  ;;  %5098 = vmatprep.mubr.msk.f32.mxu1 %vm316_vm0, %v6164_v46 }
 0x286   : > { %4876 = vmatmul.mubr.msk.f32.gmra.mrb[38].mxu0 %vm316_vm0, %v5912_v0  ;;  %5099 = vmatmul.mubr.msk.f32.gmra.mrb[0].mxu1 %vm316_vm0, %v6170_v24 }
 0x287   : > { %4880 = vmatprep.mubr.msk.f32.mxu0 %vm316_vm0, %v6918_v42  ;;  %5101 = vmatprep.mubr.msk.f32.mxu1 %vm316_vm0, %v6176_v8 }
 0x28a   : > { %4881 = vmatmul.mubr.msk.f32.vlgmr.msra.gmra.mrb[8].mxu0 %vm316_vm0, %v6033_v52  ;;  %5102 = vmatmul.mubr.msk.f32.gmra.mrb[2].mxu1 %vm316_vm0, %v6182_v16 }
 0x28b   : > { %4883 = vmatprep.mubr.msk.f32.mxu0 %vm316_vm0, %v6035_v55  ;;  %5104 = vmatprep.mubr.msk.f32.mxu1 %vm316_vm0, %v5983_v31 }
 0x28e   : > { %4884 = vmatmul.mubr.msk.f32.gmra.mrb[10].mxu0 %vm316_vm0, %v6047_v59  ;;  %5105 = vmatmul.mubr.msk.f32.gmra.mrb[4].mxu1 %vm316_vm0, %v6000_v35 }
 0x28f   : > { %4886 = vmatprep.mubr.msk.f32.mxu0 %vm316_vm0, %v6049_v60  ;;  %5107 = vmatprep.mubr.msk.f32.mxu1 %vm316_vm0, %v6007_v43 }
 0x292   : > { %4887 = vmatmul.mubr.msk.f32.gmra.mrb[12].mxu0 %vm316_vm0, %v6063_v1  ;;  %5108 = vmatmul.mubr.msk.f32.gmra.mrb[6].mxu1 %vm316_vm0, %v5829_v38 }
 0x293   : > { %4889 = vmatprep.mubr.msk.f32.mxu0 %vm316_vm0, %v6065_v3  ;;  %5110 = vmatprep.mubr.msk.f32.mxu1 %vm316_vm0, %v5838_v39 }
 0x296   : > { %4890 = vmatmul.mubr.msk.f32.gmra.mrb[14].mxu0 %vm316_vm0, %v6079_v10  ;;  %5111 = vmatmul.mubr.msk.f32.gmra.mrb[8].mxu1 %vm316_vm0, %v5857_v49 }
 0x297   : > { %4892 = vmatprep.mubr.msk.f32.mxu0 %vm316_vm0, %v5973_v25  ;;  %5113 = vmatprep.mubr.msk.f32.mxu1 %vm316_vm0, %v5863_v45 }
 0x29a   : > { %4893 = vmatmul.mubr.msk.f32.gmra.mrb[16].mxu0 %vm316_vm0, %v5983_v31  ;;  %5114 = vmatmul.mubr.msk.f32.gmra.mrb[10].mxu1 %vm316_vm0, %v3124_v15 }
 0x29b   : > { %4895 = vmatprep.mubr.msk.f32.mxu0 %vm316_vm0, %v6000_v35  ;;  %5116 = vmatprep.mubr.msk.f32.mxu1 %vm316_vm0, %v6051_v62 }
 0x29e   : > { %4896 = vmatmul.mubr.msk.f32.gmra.mrb[18].mxu0 %vm316_vm0, %v6007_v43  ;;  %5117 = vmatmul.mubr.msk.f32.gmra.mrb[12].mxu1 %vm316_vm0, %v6057_v63 }
 0x29f   : > { %5119 = vmatprep.mubr.msk.f32.mxu1 %vm316_vm0, %v6067_v5 }
 0x2a2   : > { %5120 = vmatmul.mubr.msk.f32.gmra.mrb[14].mxu1 %vm316_vm0, %v6073_v6 }
 0x2a3   : > { %5122 = vmatprep.mubr.msk.f32.mxu1 %vm316_vm0, %v6081_v11 }
 0x2a6   : > { %5123 = vmatmul.mubr.msk.f32.gmra.mrb[16].mxu1 %vm316_vm0, %v6087_v14 }
 0x2a7   : > { %5125 = vmatprep.mubr.msk.f32.mxu1 %vm316_vm0, %v6915_v44 }
 0x2aa   : > { %5126 = vmatmul.mubr.msk.f32.gmra.mrb[18].mxu1 %vm316_vm0, %v3415_v21 }
 0x335   : > { %v4850_v23 = vpop.f32.mrb[20].mxu0 }
 0x336   : > { %v2079_v26 = vpop.f32.mrb[21].mxu0 }
 0x339   : > { %v4853_v27 = vpop.f32.mrb[22].mxu0 }
 0x33a   : > { %v2089_v32 = vpop.f32.mrb[23].mxu0 }
 0x33d   : > { %v6566_v37 = vpop.f32.mrb[24].mxu0 }
 0x33e   : > { %v6568_v38 = vpop.f32.mrb[25].mxu0 }
 0x341   : > { %v6570_v39 = vpop.f32.mrb[26].mxu0  ;;  %v5082_v48 = vpop.f32.mrb[20].mxu1 }
 0x342   : > { %v6572_v49 = vpop.f32.mrb[27].mxu0  ;;  %v3508_v45 = vpop.f32.mrb[21].mxu1 }
 0x345   : > { %v6574_v50 = vpop.f32.mrb[28].mxu0  ;;  %v5085_v53 = vpop.f32.mrb[22].mxu1 }
 0x346   : > { %v6576_v54 = vpop.f32.mrb[29].mxu0  ;;  %v3518_v57 = vpop.f32.mrb[23].mxu1 }
 0x349   : > { %v6578_v58 = vpop.f32.mrb[30].mxu0  ;;  %v6580_v61 = vpop.f32.mrb[24].mxu1 }
 0x34a   : > { %v6582_v0 = vpop.f32.mrb[31].mxu0  ;;  %v6584_v2 = vpop.f32.mrb[25].mxu1 }
 0x34d   : > { %v6586_v4 = vpop.f32.mrb[32].mxu0  ;;  %v6588_v7 = vpop.f32.mrb[26].mxu1 }
 0x34e   : > { %v6590_v8 = vpop.f32.mrb[33].mxu0  ;;  %v6592_v9 = vpop.f32.mrb[27].mxu1 }
 0x351   : > { %v6594_v12 = vpop.f32.mrb[34].mxu0  ;;  %v6596_v13 = vpop.f32.mrb[28].mxu1 }
 0x352   : > { %v6598_v17 = vpop.f32.mrb[35].mxu0  ;;  %v6600_v18 = vpop.f32.mrb[29].mxu1 }
 0x355   : > { %v6602_v24 = vpop.f32.mrb[36].mxu0  ;;  %v6604_v25 = vpop.f32.mrb[30].mxu1 }
 0x356   : > { %v6606_v28 = vpop.f32.mrb[37].mxu0  ;;  %v6608_v29 = vpop.f32.mrb[31].mxu1 }
 0x359   : > { %v6617_v31 = vpop.f32.mrb[38].mxu0  ;;  %v5100_v34 = vpop.f32.mrb[0].mxu1 }
 0x35a   : > { %v5142_v35 = vadd.f32 %v5100_v34, %v4850_v23  ;;  %v6619_v41 = vpop.f32.mrb[39].mxu0  ;;  %v3568_v43 = vpop.f32.mrb[1].mxu1 }
 0x35b   : > { %v5143_v40 = vadd.f32 %v3568_v43, %v2079_v26 }
 0x35c   : > { %3712 = vst.msk [vmem:[%s6615_s19 + $0x68] sm:$0xff] %vm544_vm2, %v5142_v35  ;;  %v3821_v51 = vmul.f32 %v5142_v35, %v5142_v35  ;;  %v6626_v60 = vsel %vm544_vm2, %v5142_v35, 0.0 }
 0x35d   : > { %3711 = vst.msk [vmem:[%s6615_s19 + $0x60] sm:$0xff] %vm544_vm2, %v5143_v40  ;;  %v3820_v52 = vmul.f32 %v5143_v40, %v5143_v40  ;;  %v4882_v55 = vpop.f32.mrb[8].mxu0  ;;  %v5103_v59 = vpop.f32.mrb[2].mxu1  ;;  %v6629_v62 = vsel %vm544_vm2, %v5143_v40, 0.0 }
 0x35e   : > { %v5130_v63 = vadd.f32 %v5082_v48, %v4882_v55  ;;  %v5144_v1 = vadd.f32 %v5103_v59, %v4853_v27  ;;  %v2310_v3 = vpop.f32.mrb[9].mxu0  ;;  %v3578_v5 = vpop.f32.mrb[3].mxu1  ;;  %v6632_v6 = vsel %vm544_vm2, %v3821_v51, 0.0 }
 0x35f   : > { %v6635_v10 = vsel %vm544_vm2, %v3820_v52, 0.0  ;;  %v5131_v11 = vadd.f32 %v3508_v45, %v2310_v3  ;;  %v5145_v14 = vadd.f32 %v3578_v5, %v2089_v32 }
 0x360   : > { %3700 = vst.msk [vmem:[%s6615_s19 + $0x8] sm:$0xff] %vm544_vm2, %v5130_v63  ;;  %v6640_v16 = vsel %vm544_vm2, %v5130_v63, 0.0  ;;  %v3809_v47 = vmul.f32 %v5130_v63, %v5130_v63  ;;  %3714 = vst.msk [vmem:[%s6615_s19 + $0x78] sm:$0xff] %vm544_vm2, %v5144_v1  ;;  %v6645_v20 = vsel %vm544_vm2, %v5144_v1, 0.0  ;;  %v3823_v30 = vmul.f32 %v5144_v1, %v5144_v1 }
 0x361   : > { %3699 = vst.msk [vmem:[%s6615_s19] sm:$0xff] %vm544_vm2, %v5131_v11  ;;  %v6650_v36 = vsel %vm544_vm2, %v5131_v11, 0.0  ;;  %v3808_v46 = vmul.f32 %v5131_v11, %v5131_v11  ;;  %3713 = vst.msk [vmem:[%s6615_s19 + $0x70] sm:$0xff] %vm544_vm2, %v5145_v14  ;;  %v6655_v33 = vsel %vm544_vm2, %v5145_v14, 0.0  ;;  %v3822_v19 = vmul.f32 %v5145_v14, %v5145_v14  ;;  %v4885_v44 = vpop.f32.mrb[10].mxu0  ;;  %v5106_v56 = vpop.f32.mrb[4].mxu1 }
 0x362   : > { %v6658_v22 = vsel %vm544_vm2, %v3809_v47, 0.0  ;;  %v6661_v42 = vsel %vm544_vm2, %v3823_v30, 0.0  ;;  %v5132_v15 = vadd.f32 %v5085_v53, %v4885_v44  ;;  %v5146_v21 = vadd.f32 %v5106_v56, %v6566_v37  ;;  %v2320_v23 = vpop.f32.mrb[11].mxu0  ;;  %v3588_v26 = vpop.f32.mrb[5].mxu1 }
 0x363   : > { %v6665_v27 = vsel %vm544_vm2, %v3808_v46, 0.0  ;;  %v6668_v32 = vsel %vm544_vm2, %v3822_v19, 0.0  ;;  %v5133_v48 = vadd.f32 %v3518_v57, %v2320_v23  ;;  %v5147_v45 = vadd.f32 %v3588_v26, %v6568_v38 }
 0x364   : > { %3702 = vst.msk [vmem:[%s6615_s19 + $0x18] sm:$0xff] %vm544_vm2, %v5132_v15  ;;  %v6674_v34 = vsel %vm544_vm2, %v5132_v15, 0.0  ;;  %v3811_v53 = vmul.f32 %v5132_v15, %v5132_v15  ;;  %3716 = vst.msk [vmem:[%s6615_s19 + $0x88] sm:$0xff] %vm544_vm2, %v5146_v21  ;;  %v6679_v37 = vsel %vm544_vm2, %v5146_v21, 0.0  ;;  %v3825_v35 = vmul.f32 %v5146_v21, %v5146_v21 }
 0x365   : > { %3701 = vst.msk [vmem:[%s6615_s19 + $0x10] sm:$0xff] %vm544_vm2, %v5133_v48  ;;  %v6684_v43 = vsel %vm544_vm2, %v5133_v48, 0.0  ;;  %v3810_v57 = vmul.f32 %v5133_v48, %v5133_v48  ;;  %3715 = vst.msk [vmem:[%s6615_s19 + $0x80] sm:$0xff] %vm544_vm2, %v5147_v45  ;;  %v6689_v38 = vsel %vm544_vm2, %v5147_v45, 0.0  ;;  %v3824_v40 = vmul.f32 %v5147_v45, %v5147_v45  ;;  %v4888_v51 = vpop.f32.mrb[12].mxu0  ;;  %v5109_v52 = vpop.f32.mrb[6].mxu1 }
 0x366   : > { %v6692_v55 = vsel %vm544_vm2, %v3811_v53, 0.0  ;;  %v6695_v59 = vsel %vm544_vm2, %v3825_v35, 0.0  ;;  %v5134_v63 = vadd.f32 %v6580_v61, %v4888_v51  ;;  %v5148_v1 = vadd.f32 %v5109_v52, %v6570_v39  ;;  %v2330_v3 = vpop.f32.mrb[13].mxu0  ;;  %v3598_v5 = vpop.f32.mrb[7].mxu1 }
 0x367   : > { %v6700_v11 = vsel %vm544_vm2, %v3810_v57, 0.0  ;;  %v6703_v14 = vsel %vm544_vm2, %v3824_v40, 0.0  ;;  %v5135_v47 = vadd.f32 %v6584_v2, %v2330_v3  ;;  %v5149_v30 = vadd.f32 %v3598_v5, %v6572_v49 }
 0x368   : > { %3704 = vst.msk [vmem:[%s6615_s19 + $0x28] sm:$0xff] %vm544_vm2, %v5134_v63  ;;  %v3766_v46 = vsel %vm544_vm2, %v5134_v63, 0.0  ;;  %v3813_v61 = vmul.f32 %v5134_v63, %v5134_v63  ;;  %3718 = vst.msk [vmem:[%s6615_s19 + $0x98] sm:$0xff] %vm544_vm2, %v5148_v1  ;;  %v6713_v39 = vsel %vm544_vm2, %v5148_v1, 0.0  ;;  %v3827_v19 = vmul.f32 %v5148_v1, %v5148_v1 }
 0x369   : > { %v3768_v44 = vadd.f32 %v6626_v60, %v3766_v46  ;;  %3703 = vst.msk [vmem:[%s6615_s19 + $0x20] sm:$0xff] %vm544_vm2, %v5135_v47  ;;  %v3759_v56 = vsel %vm544_vm2, %v5135_v47, 0.0  ;;  %v3812_v2 = vmul.f32 %v5135_v47, %v5135_v47  ;;  %3717 = vst.msk [vmem:[%s6615_s19 + $0x90] sm:$0xff] %vm544_vm2, %v5149_v30  ;;  %v6722_v49 = vsel %vm544_vm2, %v5149_v30, 0.0  ;;  %v4891_v15 = vpop.f32.mrb[14].mxu0  ;;  %v5112_v21 = vpop.f32.mrb[8].mxu1 }
 0x36a   : > { %v3875_v23 = vsel %vm544_vm2, %v3813_v61, 0.0  ;;  %v6726_v26 = vsel %vm544_vm2, %v3827_v19, 0.0  ;;  %v3761_v60 = vadd.f32 %v6629_v62, %v3759_v56  ;;  %v3826_v48 = vmul.f32 %v5149_v30, %v5149_v30  ;;  %v2340_v45 = vpop.f32.mrb[15].mxu0  ;;  %v3608_v53 = vpop.f32.mrb[9].mxu1 }
 0x36b   : > { %v3877_v35 = vadd.f32 %v6632_v6, %v3875_v23  ;;  %v3868_v57 = vsel %vm544_vm2, %v3812_v2, 0.0  ;;  %v5136_v40 = vadd.f32 %v6588_v7, %v4891_v15  ;;  %v5150_v51 = vadd.f32 %v5112_v21, %v6574_v50 }
 0x36c   : > { %v3870_v52 = vadd.f32 %v6635_v10, %v3868_v57  ;;  %v6735_v63 = vsel %vm544_vm2, %v3826_v48, 0.0  ;;  %v5137_v62 = vadd.f32 %v6592_v9, %v2340_v45  ;;  %v5151_v1 = vadd.f32 %v3608_v53, %v6576_v54 }
 0x36d   : > { %3706 = vst.msk [vmem:[%s6615_s19 + $0x38] sm:$0xff] %vm544_vm2, %v5136_v40  ;;  %v3780_v6 = vsel %vm544_vm2, %v5136_v40, 0.0  ;;  %v3815_v3 = vmul.f32 %v5136_v40, %v5136_v40  ;;  %3720 = vst.msk [vmem:[%s6615_s19 + $0xa8] sm:$0xff] %vm544_vm2, %v5150_v51  ;;  %v3769_v7 = vsel %vm544_vm2, %v5150_v51, 0.0  ;;  %v3829_v50 = vmul.f32 %v5150_v51, %v5150_v51  ;;  %v4894_v5 = vpop.f32.mrb[16].mxu0  ;;  %v5115_v10 = vpop.f32.mrb[10].mxu1 }
 0x36e   : > { %v3782_v47 = vadd.f32 %v6645_v20, %v3780_v6  ;;  %v6746_v30 = vadd.f32 %v3769_v7, %v3768_v44  ;;  %3705 = vst.msk [vmem:[%s6615_s19 + $0x30] sm:$0xff] %vm544_vm2, %v5137_v62  ;;  %v3773_v54 = vsel %vm544_vm2, %v5137_v62, 0.0  ;;  %v3814_v9 = vmul.f32 %v5137_v62, %v5137_v62  ;;  %3719 = vst.msk [vmem:[%s6615_s19 + $0xa0] sm:$0xff] %vm544_vm2, %v5151_v1  ;;  %v2350_v46 = vpop.f32.mrb[17].mxu0  ;;  %v3618_v61 = vpop.f32.mrb[11].mxu1 }
 0x36f   : > { %v3889_v19 = vsel %vm544_vm2, %v3815_v3, 0.0  ;;  %v3878_v56 = vsel %vm544_vm2, %v3829_v50, 0.0  ;;  %v3775_v2 = vadd.f32 %v6655_v33, %v3773_v54  ;;  %v3762_v15 = vsel %vm544_vm2, %v5151_v1, 0.0 }
 0x370   : > { %v3891_v20 = vadd.f32 %v6661_v42, %v3889_v19  ;;  %v6758_v44 = vadd.f32 %v3878_v56, %v3877_v35  ;;  %v3882_v21 = vsel %vm544_vm2, %v3814_v9, 0.0  ;;  %v6761_v23 = vadd.f32 %v3762_v15, %v3761_v60 }
 0x371   : > { %v3884_v48 = vadd.f32 %v6668_v32, %v3882_v21  ;;  %v3828_v45 = vmul.f32 %v5151_v1, %v5151_v1  ;;  %v5138_v53 = vadd.f32 %v6596_v13, %v4894_v5  ;;  %v5152_v57 = vadd.f32 %v5115_v10, %v6578_v58  ;;  %v4897_v33 = vpop.f32.mrb[18].mxu0  ;;  %v5118_v40 = vpop.f32.mrb[12].mxu1 }
 0x372   : > { %v5139_v51 = vadd.f32 %v6600_v18, %v2350_v46  ;;  %v5153_v42 = vadd.f32 %v3618_v61, %v6582_v0  ;;  %v5140_v35 = vadd.f32 %v6604_v25, %v4897_v33  ;;  %v5154_v60 = vadd.f32 %v5118_v40, %v6586_v4  ;;  %v2360_v32 = vpop.f32.mrb[19].mxu0  ;;  %v3628_v62 = vpop.f32.mrb[13].mxu1 }
 0x373   : > { %v3871_v13 = vsel %vm544_vm2, %v3828_v45, 0.0  ;;  %3708 = vst.msk [vmem:[%s6615_s19 + $0x48] sm:$0xff] %vm544_vm2, %v5138_v53  ;;  %v3739_v58 = vsel %vm544_vm2, %v5138_v53, 0.0  ;;  %v3817_v1 = vmul.f32 %v5138_v53, %v5138_v53  ;;  %3722 = vst.msk [vmem:[%s6615_s19 + $0xb8] sm:$0xff] %vm544_vm2, %v5152_v57  ;;  %v3783_v0 = vsel %vm544_vm2, %v5152_v57, 0.0 }
 0x374   : > { %v6777_v18 = vadd.f32 %v3871_v13, %v3870_v52  ;;  %v3740_v25 = vadd.f32 %v3739_v58, %v6640_v16  ;;  %v6780_v6 = vadd.f32 %v3783_v0, %v3782_v47  ;;  %v3831_v4 = vmul.f32 %v5152_v57, %v5152_v57  ;;  %3707 = vst.msk [vmem:[%s6615_s19 + $0x40] sm:$0xff] %vm544_vm2, %v5139_v51 }
 0x375   : > { %3721 = vst.msk [vmem:[%s6615_s19 + $0xb0] sm:$0xff] %vm544_vm2, %v5153_v42  ;;  %3710 = vst.msk [vmem:[%s6615_s19 + $0x58] sm:$0xff] %vm544_vm2, %v5140_v35  ;;  %v3848_v3 = vsel %vm544_vm2, %v3817_v1, 0.0  ;;  %v3732_v7 = vsel %vm544_vm2, %v5139_v51, 0.0  ;;  %v3816_v50 = vmul.f32 %v5139_v51, %v5139_v51  ;;  %v3776_v52 = vsel %vm544_vm2, %v5153_v42, 0.0  ;;  %v5121_v5 = vpop.f32.mrb[14].mxu1 }
 0x376   : > { %3724 = vst.msk [vmem:[%s6615_s19 + $0xc8] sm:$0xff] %vm544_vm2, %v5154_v60  ;;  %v3849_v16 = vadd.f32 %v3848_v3, %v6658_v22  ;;  %v3892_v10 = vsel %vm544_vm2, %v3831_v4, 0.0  ;;  %v3733_v47 = vadd.f32 %v3732_v7, %v6650_v36  ;;  %v6796_v54 = vadd.f32 %v3776_v52, %v3775_v2  ;;  %v3638_v9 = vpop.f32.mrb[15].mxu1 }
 0x377   : > { %v6798_v46 = vadd.f32 %v3892_v10, %v3891_v20  ;;  %v3841_v61 = vsel %vm544_vm2, %v3816_v50, 0.0  ;;  %v3830_v19 = vmul.f32 %v5153_v42, %v5153_v42  ;;  %v3753_v56 = vsel %vm544_vm2, %v5140_v35, 0.0 }
 0x378   : > { %v3842_v15 = vadd.f32 %v3841_v61, %v6665_v27  ;;  %v3754_v21 = vadd.f32 %v3753_v56, %v6674_v34  ;;  %v3819_v45 = vmul.f32 %v5140_v35, %v5140_v35  ;;  %v3742_v22 = vadd.f32 %v6679_v37, %v3740_v25 }
 0x379   : > { %v3885_v53 = vsel %vm544_vm2, %v3830_v19, 0.0  ;;  %v3743_v36 = vsel %vm544_vm2, %v5154_v60, 0.0  ;;  %v3833_v2 = vmul.f32 %v5154_v60, %v5154_v60  ;;  %v3851_v20 = vadd.f32 %v6695_v59, %v3849_v16  ;;  %v5124_v57 = vpop.f32.mrb[16].mxu1 }
 0x37a   : > { %v6808_v33 = vadd.f32 %v3885_v53, %v3884_v48  ;;  %v3862_v40 = vsel %vm544_vm2, %v3819_v45, 0.0  ;;  %v3744_v27 = vadd.f32 %v3743_v36, %v3742_v22  ;;  %v5141_v34 = vadd.f32 %v6608_v29, %v2360_v32  ;;  %v3648_v51 = vpop.f32.mrb[17].mxu1 }
 0x37b   : > { %v3863_v37 = vadd.f32 %v3862_v40, %v6692_v55  ;;  %v3852_v42 = vsel %vm544_vm2, %v3833_v2, 0.0  ;;  %v5155_v35 = vadd.f32 %v3628_v62, %v6590_v8  ;;  %v3735_v60 = vadd.f32 %v6689_v38, %v3733_v47 }
 0x37c   : > { %v3788_v59 = vsel %vm544_vm2, %v3744_v27, 0.0  ;;  %v3853_v13 = vadd.f32 %v3852_v42, %v3851_v20  ;;  %3709 = vst.msk [vmem:[%s6615_s19 + $0x50] sm:$0xff] %vm544_vm2, %v5141_v34  ;;  %v3746_v48 = vsel %vm544_vm2, %v5141_v34, 0.0  ;;  %v3818_v58 = vmul.f32 %v5141_v34, %v5141_v34 }
 0x37d   : > { %v3747_v1 = vadd.f32 %v3746_v48, %v6684_v43  ;;  %3723 = vst.msk [vmem:[%s6615_s19 + $0xc0] sm:$0xff] %vm544_vm2, %v5155_v35  ;;  %v3736_v29 = vsel %vm544_vm2, %v5155_v35, 0.0  ;;  %v3832_v55 = vmul.f32 %v5155_v35, %v5155_v35  ;;  %v3844_v8 = vadd.f32 %v6703_v14, %v3842_v15  ;;  %v5127_v32 = vpop.f32.mrb[18].mxu1 }
 0x37e   : > { %v3897_v38 = vsel %vm544_vm2, %v3853_v13, 0.0  ;;  %v3855_v62 = vsel %vm544_vm2, %v3818_v58, 0.0  ;;  %v3737_v0 = vadd.f32 %v3736_v29, %v3735_v60  ;;  %v5156_v25 = vadd.f32 %v5121_v5, %v6594_v12  ;;  %v3658_v4 = vpop.f32.mrb[19].mxu1 }
 0x37f   : > { %v3856_v3 = vadd.f32 %v3855_v62, %v6700_v11  ;;  %v3845_v43 = vsel %vm544_vm2, %v3832_v55, 0.0  ;;  %v3756_v7 = vadd.f32 %v6713_v39, %v3754_v21  ;;  %v3865_v50 = vadd.f32 %v6726_v26, %v3863_v37 }
 0x380   : > { %v3787_v14 = vsel %vm544_vm2, %v3737_v0, 0.0  ;;  %v3846_v52 = vadd.f32 %v3845_v43, %v3844_v8  ;;  %3726 = vst.msk [vmem:[%s6615_s19 + $0xd8] sm:$0xff] %vm544_vm2, %v5156_v25  ;;  %v3757_v16 = vsel %vm544_vm2, %v5156_v25, 0.0  ;;  %v3835_v10 = vmul.f32 %v5156_v25, %v5156_v25 }
 0x381   : > { %v3789_v12 = vadd.f32 %v3788_v59, %v3787_v14  ;;  %v3758_v5 = vadd.f32 %v3757_v16, %v3756_v7  ;;  %v5157_v11 = vadd.f32 %v3638_v9, %v6598_v17  ;;  %v3749_v47 = vadd.f32 %v6722_v49, %v3747_v1 }
 0x382   : > { %v3896_v39 = vsel %vm544_vm2, %v3846_v52, 0.0  ;;  %v3866_v26 = vsel %vm544_vm2, %v3835_v10, 0.0  ;;  %v3858_v61 = vadd.f32 %v6735_v63, %v3856_v3  ;;  %v5158_v19 = vadd.f32 %v5124_v57, %v6602_v24 }
 0x383   : > { %v3898_v56 = vadd.f32 %v3897_v38, %v3896_v39  ;;  %v3867_v15 = vadd.f32 %v3866_v26, %v3865_v50  ;;  %3725 = vst.msk [vmem:[%s6615_s19 + $0xd0] sm:$0xff] %vm544_vm2, %v5157_v11  ;;  %v3750_v21 = vsel %vm544_vm2, %v5157_v11, 0.0  ;;  %v3834_v22 = vmul.f32 %v5157_v11, %v5157_v11 }
 0x384   : > { %v3751_v45 = vadd.f32 %v3750_v21, %v3749_v47  ;;  %3728 = vst.msk [vmem:[%s6615_s19 + $0xe8] sm:$0xff] %vm544_vm2, %v5158_v19  ;;  %v3771_v17 = vsel %vm544_vm2, %v5158_v19, 0.0  ;;  %v3837_v49 = vmul.f32 %v5158_v19, %v5158_v19  ;;  %v5159_v63 = vadd.f32 %v3648_v51, %v6606_v28 }
 0x385   : > { %v3772_v9 = vadd.f32 %v3771_v17, %v6746_v30  ;;  %v5160_v24 = vadd.f32 %v5127_v32, %v6617_v31  ;;  %v3859_v36 = vsel %vm544_vm2, %v3834_v22, 0.0  ;;  %v5161_v20 = vadd.f32 %v3658_v4, %v6619_v41 }
 0x386   : > { %v3790_v53 = vsel %vm544_vm2, %v3751_v45, 0.0  ;;  %v3880_v2 = vsel %vm544_vm2, %v3837_v49, 0.0  ;;  %v3792_v57 = vsel %vm544_vm2, %v3758_v5, 0.0  ;;  %v3860_v27 = vadd.f32 %v3859_v36, %v3858_v61  ;;  %3727 = vst.msk [vmem:[%s6615_s19 + $0xe0] sm:$0xff] %vm544_vm2, %v5159_v63 }
 0x387   : > { %v3791_v40 = vadd.f32 %v3790_v53, %v3789_v12  ;;  %v3881_v34 = vadd.f32 %v3880_v2, %v6758_v44  ;;  %3730 = vst.msk [vmem:[%s6615_s19 + $0xf8] sm:$0xff] %vm544_vm2, %v5160_v24  ;;  %v3764_v28 = vsel %vm544_vm2, %v5159_v63, 0.0  ;;  %v3836_v31 = vmul.f32 %v5159_v63, %v5159_v63  ;;  %3729 = vst.msk [vmem:[%s6615_s19 + $0xf0] sm:$0xff] %vm544_vm2, %v5161_v20 }
 0x388   : > { %v3785_v30 = vsel %vm544_vm2, %v5160_v24, 0.0  ;;  %v3839_v51 = vmul.f32 %v5160_v24, %v5160_v24  ;;  %v3901_v41 = vsel %vm544_vm2, %v3867_v15, 0.0  ;;  %v3899_v37 = vsel %vm544_vm2, %v3860_v27, 0.0 }
 0x389   : > { %v3765_v42 = vadd.f32 %v3764_v28, %v6761_v23  ;;  %v3793_v35 = vadd.f32 %v3792_v57, %v3791_v40  ;;  %v3900_v44 = vadd.f32 %v3899_v37, %v3898_v56  ;;  %v3873_v60 = vsel %vm544_vm2, %v3836_v31, 0.0 }
 0x38a   : > { %v3786_v59 = vadd.f32 %v3785_v30, %v6780_v6  ;;  %v3894_v13 = vsel %vm544_vm2, %v3839_v51, 0.0  ;;  %v3874_v58 = vadd.f32 %v3873_v60, %v6777_v18  ;;  %v3778_v29 = vsel %vm544_vm2, %v5161_v20, 0.0 }
 0x38b   : > { %v3794_v48 = vsel %vm544_vm2, %v3765_v42, 0.0  ;;  %v3895_v1 = vadd.f32 %v3894_v13, %v6798_v46  ;;  %v3902_v8 = vadd.f32 %v3901_v41, %v3900_v44  ;;  %v3779_v23 = vadd.f32 %v3778_v29, %v6796_v54 }
 0x38c   : > { %v3795_v55 = vadd.f32 %v3794_v48, %v3793_v35  ;;  %v3796_v32 = vsel %vm544_vm2, %v3772_v9, 0.0  ;;  %v3903_v38 = vsel %vm544_vm2, %v3874_v58, 0.0  ;;  %v3838_v62 = vmul.f32 %v5161_v20, %v5161_v20 }
 0x38d   : > { %v3904_v6 = vadd.f32 %v3903_v38, %v3902_v8  ;;  %v3798_v25 = vsel %vm544_vm2, %v3779_v23, 0.0  ;;  %v3905_v4 = vsel %vm544_vm2, %v3881_v34, 0.0  ;;  %v3800_v54 = vsel %vm544_vm2, %v3786_v59, 0.0 }
 0x38e   : > { %v3797_v0 = vadd.f32 %v3796_v32, %v3795_v55  ;;  %v3887_v18 = vsel %vm544_vm2, %v3838_v62, 0.0  ;;  %v3909_v52 = vsel %vm544_vm2, %v3895_v1, 0.0 }
 0x38f   : > { %v3888_v3 = vadd.f32 %v3887_v18, %v6808_v33  ;;  %v3906_v43 = vadd.f32 %v3905_v4, %v3904_v6 }
 0x390   : > { %v3799_v46 = vadd.f32 %v3798_v25, %v3797_v0 }
 0x391   : > { %v3907_v50 = vsel %vm544_vm2, %v3888_v3, 0.0 }
 0x392   : > { %v3801_v7 = vadd.f32 %v3800_v54, %v3799_v46  ;;  %v3908_v14 = vadd.f32 %v3907_v50, %v3906_v43 }
 0x394   : > { %v3802_v16 = vrot.slane %v3801_v7, 4  ;;  %v3910_v10 = vadd.f32 %v3909_v52, %v3908_v14 }
 0x396   : > { %v3803_v12 = vadd.f32 %v3802_v16, %v3801_v7  ;;  %v3911_v5 = vrot.slane %v3910_v10, 4 }
 0x398   : > { %v3804_v11 = vrot.slane %v3803_v12, 2  ;;  %v3912_v47 = vadd.f32 %v3911_v5, %v3910_v10 }
 0x39a   : > { %v3805_v39 = vadd.f32 %v3804_v11, %v3803_v12  ;;  %v3913_v26 = vrot.slane %v3912_v47, 2 }
 0x39c   : > { %v3806_v33 = vrot.slane %v3805_v39, 1  ;;  %v3914_v61 = vadd.f32 %v3913_v26, %v3912_v47 }
 0x39e   : > { %v3807_v19 = vadd.f32 %v3806_v33, %v3805_v39  ;;  %v3915_v56 = vrot.slane %v3914_v61, 1 }
 0x3a0   : > { %3918 = vst.msk [vmem:[%s312_s21] sm:$0x1] %vm3917_vm4, %v3807_v19  ;;  %v3916_v15 = vadd.f32 %v3915_v56, %v3914_v61 }
 0x3a2   : > { %3919 = vst.msk [vmem:[%s315_s26] sm:$0x1] %vm3917_vm4, %v3916_v15 }
 0x3a3 PF: > { %s18_s24 = sadd.s32 1, %s5405_s24  }
 0x3a4   : > { %p15_p4 = scmp.ge.s32.totalorder %s18_s24, 4  }
 0x3a6   :  { %17 = sbr.rel (!%p15_p4) target bundleno = 1 (0x1), region = 113 }

</bundles_post_ra>
